<compile_context>
chip_gen: v6e
topology: v6e:2x2x1
jax: 0.10.0
libtpu: 0.0.40
codegen_flags: <defaults>
</compile_context>

<pallas_src>
import jax
import jax.numpy as jnp
from jax.experimental import pallas as pl
from jax.experimental.pallas import tpu as pltpu

# ---- small, module-consistent sizes -------------------------------------------------
B = 2                 # batch
CIN = 4               # input image channels
H = W = 16            # data_shape (attention works on an HxW feature grid)
HW = H * W
FEAT = 32             # backbone feature channels (feat_dim)
INTER = FEAT // 2     # ModulatedAttLayer reduction=2
NUM_CLASSES = 10

# packed small-output slab layout (lane-dense, 512 = 4*128)
LOGITS_OFF = 0
POOLED_OFF = 128
SATT_OFF = 256
SLAB = SATT_OFF + HW

# packed feature-map slab: (HW, FEAT) = (256, 32) -> (64, 128); two maps side by side.
PACK_ROWS = HW // 4       # 64
PACK_COLS = 4 * FEAT      # 128
LOG2_FEAT = FEAT.bit_length() - 1   # FEAT is a power of two


def _softmax_last(x):
    m = jnp.max(x, axis=-1, keepdims=True)
    e = jnp.exp(x - m)
    s = jnp.sum(e, axis=-1, keepdims=True)
    return e * pl.reciprocal(s, approx=True)   # EUP reciprocal instead of VALU divide


def network_kernel(x_ref,
                   wb_ref, bb_ref,
                   wgtp_ref, bgtp_ref, wm_ref,
                   w1_ref, b1_ref, w2_ref, b2_ref,
                   wc_ref, bc_ref,
                   slab_ref, maps_ref):
    x = x_ref[0]                                          # (HW, CIN)

    # TODO(synk): full ResNet18 backbone (external `models` module) reduced to a
    # 1x1-conv + ReLU channel projection stub producing the (HW, FEAT) feature map.
    feat = jnp.maximum(
        jnp.dot(x, wb_ref[...], preferred_element_type=jnp.float32) + bb_ref[...], 0.0)

    # --- ModulatedAttLayer: embedded-gaussian non-local block.
    # g/theta/phi 1x1 convs fused into a single (FEAT, 3*INTER) matmul, then sliced.
    gtp = jnp.dot(feat, wgtp_ref[...], preferred_element_type=jnp.float32) + bgtp_ref[...]
    g = gtp[:, 0:INTER]
    th = gtp[:, INTER:2 * INTER]
    ph = gtp[:, 2 * INTER:3 * INTER]

    scores = jax.lax.dot_general(th, ph, (((1,), (1,)), ((), ())),
                                 preferred_element_type=jnp.float32)   # (HW, HW)
    attn = _softmax_last(scores)
    map_ = jnp.dot(attn, g, preferred_element_type=jnp.float32)        # (HW, INTER)
    mask_nl = jnp.dot(map_, wm_ref[...], preferred_element_type=jnp.float32)  # (HW, FEAT)

    # --- spatial attention branch: Linear(HW*C -> C) -> ReLU -> Linear(C -> HW) -> softmax
    # One MXU contraction; torch's flatten-Linear result is the block diagonal of R:
    #   w1_ref is (HW, FEAT*FEAT) bf16 with column index c*FEAT + o (NCHW-flatten order)
    #   R[c', c*FEAT + o] = sum_h feat[h, c'] * w1[h, c*FEAT + o]
    # and h1_pre[o] = sum_c R[c, c*FEAT + o], extracted with an iota block-diagonal mask,
    # a sublane reduce and a log2 lane-fold (no serial slice-add chain, no transpose).
    R = jax.lax.dot_general(feat.astype(jnp.bfloat16), w1_ref[...],
                            (((0,), (0,)), ((), ())),
                            preferred_element_type=jnp.float32)        # (FEAT, FEAT*FEAT)
    row = jax.lax.broadcasted_iota(jnp.int32, (FEAT, FEAT * FEAT), 0)
    col = jax.lax.broadcasted_iota(jnp.int32, (FEAT, FEAT * FEAT), 1)
    masked = jnp.where((col >> LOG2_FEAT) == row, R, 0.0)              # keep block diagonal
    s = jnp.sum(masked, axis=0, keepdims=True)                         # (1, FEAT*FEAT)
    # lane fold: h1_pre[o] = sum_c s[c*FEAT + o]
    v = s
    width = FEAT * FEAT
    while width > FEAT:
        width //= 2
        v = v[:, :width] + v[:, width:2 * width]
    h1 = jnp.maximum(v + b1_ref[...], 0.0)                             # (1, FEAT)

    satt = _softmax_last(
        jnp.dot(h1, w2_ref[...], preferred_element_type=jnp.float32) + b2_ref[...])  # (1, HW)

    satt_col = jnp.transpose(satt)                                      # (HW, 1)
    final = satt_col * mask_nl + feat                                   # (HW, FEAT)

    # --- adaptive_avg_pool2d(1) + DotProduct classifier
    pooled = jnp.mean(final, axis=0, keepdims=True)                     # (1, FEAT)
    logits = jnp.dot(pooled, wc_ref[...], preferred_element_type=jnp.float32) + bc_ref[...]

    # pack the two (HW, FEAT) feature maps into ONE lane-dense (64, 256) slab:
    # columns [k*FEAT:(k+1)*FEAT) of `final` hold rows [k*64:(k+1)*64); same for `feat`
    # in columns 128..255.  Single unmasked full-width output store/DMA per grid step.
    chunks = [final[k * PACK_ROWS:(k + 1) * PACK_ROWS, :] for k in range(4)] + \
             [feat[k * PACK_ROWS:(k + 1) * PACK_ROWS, :] for k in range(4)]
    maps_ref[0] = jnp.concatenate(chunks, axis=-1)                      # (64, 256)

    # pack the three lane-sparse small outputs into one lane-dense 512-wide slab
    slab_ref[0] = jnp.concatenate(
        [logits, jnp.zeros((1, 128 - NUM_CLASSES), jnp.float32),
         pooled, jnp.zeros((1, 128 - FEAT), jnp.float32),
         satt], axis=-1)                                                # (1, SLAB)


# ---- deterministic parameters in PyTorch layouts ------------------------------------
def init_torch_params(key):
    ks = jax.random.split(key, 15)
    r = lambda k, s: 0.05 * jax.random.normal(k, s, dtype=jnp.float32)
    return dict(
        wb=r(ks[0], (FEAT, CIN)),        bb=r(ks[1], (FEAT,)),          # backbone stub 1x1 conv
        wg=r(ks[2], (INTER, FEAT)),      bg=r(ks[3], (INTER,)),         # att.g
        wt=r(ks[4], (INTER, FEAT)),      bt=r(ks[5], (INTER,)),         # att.theta
        wp=r(ks[6], (INTER, FEAT)),      bp=r(ks[7], (INTER,)),         # att.phi
        wm=r(ks[8], (FEAT, INTER)),                                     # att.conv_mask (no bias)
        w1=r(ks[9], (FEAT, HW * FEAT)),  b1=r(ks[10], (FEAT,)),         # fc_spatial[0]
        w2=r(ks[11], (HW, FEAT)),        b2=r(ks[12], (HW,)),           # fc_spatial[2]
        wc=r(ks[13], (NUM_CLASSES, FEAT)), bc=r(ks[14], (NUM_CLASSES,)),  # DotProduct fc
    )


def to_kernel_params(p):
    # torch Linear/1x1-conv weights are (out, in); kernel uses (in, out).
    # fc_spatial[0] consumes torch's NCHW flatten (input index c*HW + h); repack it to
    # (HW, FEAT*FEAT) with column index c*FEAT + o so one dot_general over HW plus a
    # block-diagonal select reproduces the flatten-Linear.  Stored in bf16 (dominant HBM
    # transfer); MXU accumulation stays f32.
    w1_mat = (p['w1'].reshape(FEAT, FEAT, HW).transpose(2, 1, 0)
              .reshape(HW, FEAT * FEAT).astype(jnp.bfloat16))
    # g/theta/phi fused: (FEAT, 3*INTER) weight and (1, 3*INTER) bias
    wgtp = jnp.concatenate([p['wg'].T, p['wt'].T, p['wp'].T], axis=1)
    bgtp = jnp.concatenate([p['bg'], p['bt'], p['bp']])[None, :]
    return dict(
        wb=p['wb'].T, bb=p['bb'][None, :],
        wgtp=wgtp,    bgtp=bgtp,
        wm=p['wm'].T,
        w1=w1_mat,    b1=p['b1'][None, :],
        w2=p['w2'].T, b2=p['b2'][None, :],
        wc=p['wc'].T, bc=p['bc'][None, :],
    )


@jax.jit
def network_forward(x_nchw, kp):
    x = jnp.transpose(x_nchw, (0, 2, 3, 1)).reshape(B, HW, CIN).astype(jnp.float32)

    names = ('wb', 'bb', 'wgtp', 'bgtp', 'wm', 'w1', 'b1', 'w2', 'b2', 'wc', 'bc')
    in_specs = [pl.BlockSpec((1, HW, CIN), lambda b: (b, 0, 0))] + \
               [pl.BlockSpec(kp[n].shape, lambda b: (0, 0)) for n in names]

    out_shape = (
        jax.ShapeDtypeStruct((B, 1, SLAB), jnp.float32),                 # logits/pooled/satt
        jax.ShapeDtypeStruct((B, PACK_ROWS, 2 * PACK_COLS), jnp.float32),  # packed final||feat
    )
    out_specs = (
        pl.BlockSpec((1, 1, SLAB), lambda b: (b, 0, 0)),
        pl.BlockSpec((1, PACK_ROWS, 2 * PACK_COLS), lambda b: (b, 0, 0)),
    )

    # advisory cost estimate: tiny, overhead-dominated call -> let XLA overlap it
    flops = 2 * B * (HW * CIN * FEAT + HW * FEAT * 3 * INTER + HW * INTER * HW
                     + HW * HW * INTER + HW * INTER * FEAT
                     + HW * FEAT * FEAT * FEAT          # R contraction
                     + FEAT * HW + FEAT * NUM_CLASSES)
    transcendentals = B * (HW * HW + 2 * HW + 4)
    bytes_accessed = int(
        x.size * 4
        + sum(int(kp[n].size) * kp[n].dtype.itemsize for n in names)
        + B * SLAB * 4 + B * PACK_ROWS * 2 * PACK_COLS * 4)

    slab, maps = pl.pallas_call(
        network_kernel,
        out_shape=out_shape,
        grid=(B,),
        in_specs=in_specs,
        out_specs=out_specs,
        compiler_params=pltpu.CompilerParams(dimension_semantics=("parallel",)),
        cost_estimate=pl.CostEstimate(flops=flops, transcendentals=transcendentals,
                                      bytes_accessed=bytes_accessed),
    )(x, *[kp[n] for n in names])

    y = slab[:, 0, LOGITS_OFF:LOGITS_OFF + NUM_CLASSES]
    x_pooled = slab[:, 0, POOLED_OFF:POOLED_OFF + FEAT]
    satt = slab[:, 0, SATT_OFF:SATT_OFF + HW]

    def unpack(cols):   # (B, 64, 128) -> (B, HW, FEAT); inverse of the kernel packing
        return cols.reshape(B, PACK_ROWS, 4, FEAT).transpose(0, 2, 1, 3).reshape(B, HW, FEAT)

    final = unpack(maps[:, :, :PACK_COLS])
    feat = unpack(maps[:, :, PACK_COLS:])

    fea = None                                    # DotProduct_Classifier returns (logits, None)
    feature_maps = (feat, satt, final)            # analogue of [x, spatial_att, final]
    return y, fea, feature_maps, x_pooled


# ---- pure-JAX reference (same semantics, torch-layout weights) ------------------------
def reference_forward(x_nchw, p):
    prec = jax.lax.Precision.HIGHEST
    x = jnp.transpose(x_nchw, (0, 2, 3, 1)).reshape(B, HW, CIN)
    feat = jax.nn.relu(jnp.einsum('bhc,fc->bhf', x, p['wb'], precision=prec) + p['bb'])
    g = jnp.einsum('bhf,if->bhi', feat, p['wg'], precision=prec) + p['bg']
    th = jnp.einsum('bhf,if->bhi', feat, p['wt'], precision=prec) + p['bt']
    ph = jnp.einsum('bhf,if->bhi', feat, p['wp'], precision=prec) + p['bp']
    attn = jax.nn.softmax(jnp.einsum('bqi,bki->bqk', th, ph, precision=prec), axis=-1)
    map_ = jnp.einsum('bqk,bki->bqi', attn, g, precision=prec)
    mask = jnp.einsum('bhi,fi->bhf', map_, p['wm'], precision=prec)
    x_flat = jnp.transpose(feat, (0, 2, 1)).reshape(B, FEAT * HW)     # NCHW flatten
    # kernel runs the flatten-Linear with bf16 MXU operands (f32 accumulation)
    x_flat_b = x_flat.astype(jnp.bfloat16).astype(jnp.float32)
    w1_b = p['w1'].astype(jnp.bfloat16).astype(jnp.float32)
    h1 = jax.nn.relu(jnp.einsum('bn,fn->bf', x_flat_b, w1_b, precision=prec) + p['b1'])
    satt = jax.nn.softmax(jnp.einsum('bf,hf->bh', h1, p['w2'], precision=prec) + p['b2'], axis=-1)
    final = satt[:, :, None] * mask + feat
    pooled = jnp.mean(final, axis=1)
    logits = jnp.einsum('bf,nf->bn', pooled, p['wc'], precision=prec) + p['bc']
    return logits, pooled, final, satt, feat


if __name__ == "__main__":
    import numpy as np

    key = jax.random.PRNGKey(0)
    kx, kparams = jax.random.split(key)
    x = jax.random.normal(kx, (B, CIN, H, W), dtype=jnp.float32)

    p = init_torch_params(kparams)
    kp = to_kernel_params(p)

    y, fea, feature_maps, x_pooled = network_forward(x, kp)
    jax.block_until_ready((y, feature_maps, x_pooled))

    ry, rpool, rfinal, rsatt, rfeat = reference_forward(x, p)
    np.testing.assert_allclose(np.asarray(y), np.asarray(ry), rtol=2e-3, atol=2e-4)
    np.testing.assert_allclose(np.asarray(x_pooled), np.asarray(rpool), rtol=2e-3, atol=2e-4)
    np.testing.assert_allclose(np.asarray(feature_maps[2]), np.asarray(rfinal), rtol=2e-3, atol=2e-4)
    np.testing.assert_allclose(np.asarray(feature_maps[1]), np.asarray(rsatt), rtol=2e-3, atol=2e-4)
    np.testing.assert_allclose(np.asarray(feature_maps[0]), np.asarray(rfeat), rtol=2e-3, atol=2e-4)

    print("KERNEL_OK")
</pallas_src>

<mosaic_0001>
module attributes {stable_mosaic.version = 11 : i64} {
  func.func @network_kernel(%arg0: i32, %arg1: memref<1x256x4xf32, #tpu.memory_space<vmem>>, %arg2: memref<4x32xf32, #tpu.memory_space<vmem>>, %arg3: memref<1x32xf32, #tpu.memory_space<vmem>>, %arg4: memref<32x48xf32, #tpu.memory_space<vmem>>, %arg5: memref<1x48xf32, #tpu.memory_space<vmem>>, %arg6: memref<16x32xf32, #tpu.memory_space<vmem>>, %arg7: memref<256x1024xbf16, #tpu.memory_space<vmem>>, %arg8: memref<1x32xf32, #tpu.memory_space<vmem>>, %arg9: memref<32x256xf32, #tpu.memory_space<vmem>>, %arg10: memref<1x256xf32, #tpu.memory_space<vmem>>, %arg11: memref<32x10xf32, #tpu.memory_space<vmem>>, %arg12: memref<1x10xf32, #tpu.memory_space<vmem>>, %arg13: memref<1x1x512xf32, #tpu.memory_space<vmem>>, %arg14: memref<1x64x256xf32, #tpu.memory_space<vmem>>) attributes {dimension_semantics = [#tpu.dimension_semantics<parallel>], iteration_bounds = array<i64: 2>, scalar_prefetch = 0 : i64, scratch_operands = 0 : i64, tpu.core_type = #tpu.core_type<tc>, window_params = [{transform_indices = @transform_0, window_bounds = array<i64: 1, 256, 4>}, {pipeline_mode = #tpu.pipeline_mode<synchronous>, transform_indices = @transform_1, window_bounds = array<i64: 4, 32>}, {pipeline_mode = #tpu.pipeline_mode<synchronous>, transform_indices = @transform_2, window_bounds = array<i64: 1, 32>}, {pipeline_mode = #tpu.pipeline_mode<synchronous>, transform_indices = @transform_3, window_bounds = array<i64: 32, 48>}, {pipeline_mode = #tpu.pipeline_mode<synchronous>, transform_indices = @transform_4, window_bounds = array<i64: 1, 48>}, {pipeline_mode = #tpu.pipeline_mode<synchronous>, transform_indices = @transform_5, window_bounds = array<i64: 16, 32>}, {pipeline_mode = #tpu.pipeline_mode<synchronous>, transform_indices = @transform_6, window_bounds = array<i64: 256, 1024>}, {pipeline_mode = #tpu.pipeline_mode<synchronous>, transform_indices = @transform_7, window_bounds = array<i64: 1, 32>}, {pipeline_mode = #tpu.pipeline_mode<synchronous>, transform_indices = @transform_8, window_bounds = array<i64: 32, 256>}, {pipeline_mode = #tpu.pipeline_mode<synchronous>, transform_indices = @transform_9, window_bounds = array<i64: 1, 256>}, {pipeline_mode = #tpu.pipeline_mode<synchronous>, transform_indices = @transform_10, window_bounds = array<i64: 32, 10>}, {pipeline_mode = #tpu.pipeline_mode<synchronous>, transform_indices = @transform_11, window_bounds = array<i64: 1, 10>}, {transform_indices = @transform_12, window_bounds = array<i64: 1, 1, 512>}, {transform_indices = @transform_13, window_bounds = array<i64: 1, 64, 256>}]} {
    %c0 = arith.constant 0 : index
    %c0_0 = arith.constant 0 : index
    %c0_1 = arith.constant 0 : index
    %0 = vector.load %arg1[%c0, %c0_0, %c0_1] : memref<1x256x4xf32, #tpu.memory_space<vmem>>, vector<1x256x4xf32>
    %1 = vector.shape_cast %0 : vector<1x256x4xf32> to vector<256x4xf32>
    %c0_2 = arith.constant 0 : index
    %c0_3 = arith.constant 0 : index
    %2 = vector.load %arg2[%c0_2, %c0_3] : memref<4x32xf32, #tpu.memory_space<vmem>>, vector<4x32xf32>
    %cst = arith.constant dense<0.000000e+00> : vector<256x32xf32>
    %3 = tpu.matmul %1, %2, %cst {dimension_numbers = #tpu.dot_dimension_numbers<[1], [0], [0], [1], [0, 0, 1, 1], [], []>} : vector<256x4xf32>, vector<4x32xf32>, vector<256x32xf32> -> vector<256x32xf32>
    %c0_4 = arith.constant 0 : index
    %c0_5 = arith.constant 0 : index
    %4 = vector.load %arg3[%c0_4, %c0_5] : memref<1x32xf32, #tpu.memory_space<vmem>>, vector<1x32xf32>
    %5 = vector.broadcast %4 : vector<1x32xf32> to vector<256x32xf32>
    %6 = arith.addf %3, %5 : vector<256x32xf32>
    %cst_6 = arith.constant 0.000000e+00 : f32
    %7 = vector.broadcast %cst_6 : f32 to vector<256x32xf32>
    %8 = arith.maximumf %6, %7 : vector<256x32xf32>
    %c0_7 = arith.constant 0 : index
    %c0_8 = arith.constant 0 : index
    %9 = vector.load %arg4[%c0_7, %c0_8] : memref<32x48xf32, #tpu.memory_space<vmem>>, vector<32x48xf32>
    %cst_9 = arith.constant dense<0.000000e+00> : vector<256x48xf32>
    %10 = tpu.matmul %8, %9, %cst_9 {dimension_numbers = #tpu.dot_dimension_numbers<[1], [0], [0], [1], [0, 0, 1, 1], [], []>} : vector<256x32xf32>, vector<32x48xf32>, vector<256x48xf32> -> vector<256x48xf32>
    %c0_10 = arith.constant 0 : index
    %c0_11 = arith.constant 0 : index
    %11 = vector.load %arg5[%c0_10, %c0_11] : memref<1x48xf32, #tpu.memory_space<vmem>>, vector<1x48xf32>
    %12 = vector.broadcast %11 : vector<1x48xf32> to vector<256x48xf32>
    %13 = arith.addf %10, %12 : vector<256x48xf32>
    %14 = vector.extract_strided_slice %13 {offsets = [0, 0], sizes = [256, 16], strides = [1, 1]} : vector<256x48xf32> to vector<256x16xf32>
    %15 = vector.extract_strided_slice %13 {offsets = [0, 16], sizes = [256, 16], strides = [1, 1]} : vector<256x48xf32> to vector<256x16xf32>
    %16 = vector.extract_strided_slice %13 {offsets = [0, 32], sizes = [256, 16], strides = [1, 1]} : vector<256x48xf32> to vector<256x16xf32>
    %cst_12 = arith.constant dense<0.000000e+00> : vector<256x256xf32>
    %17 = tpu.matmul %15, %16, %cst_12 {dimension_numbers = #tpu.dot_dimension_numbers<[1], [1], [0], [0], [0, 0, 1, 0], [], []>} : vector<256x16xf32>, vector<256x16xf32>, vector<256x256xf32> -> vector<256x256xf32>
    %cst_13 = arith.constant dense<0xFF800000> : vector<256xf32>
    %18 = vector.multi_reduction <maximumf>, %17, %cst_13 [1] : vector<256x256xf32> to vector<256xf32>
    %19 = vector.shape_cast %18 : vector<256xf32> to vector<256x1xf32>
    %20 = vector.broadcast %19 : vector<256x1xf32> to vector<256x256xf32>
    %21 = arith.subf %17, %20 : vector<256x256xf32>
    %22 = math.exp %21 : vector<256x256xf32>
    %cst_14 = arith.constant dense<0.000000e+00> : vector<256xf32>
    %23 = vector.multi_reduction <add>, %22, %cst_14 [1] : vector<256x256xf32> to vector<256xf32>
    %24 = vector.shape_cast %23 : vector<256xf32> to vector<256x1xf32>
    %25 = tpu.reciprocal %24 {approx = true} : vector<256x1xf32> -> vector<256x1xf32>
    %26 = vector.broadcast %25 : vector<256x1xf32> to vector<256x256xf32>
    %27 = arith.mulf %22, %26 : vector<256x256xf32>
    %cst_15 = arith.constant dense<0.000000e+00> : vector<256x16xf32>
    %28 = tpu.matmul %27, %14, %cst_15 {dimension_numbers = #tpu.dot_dimension_numbers<[1], [0], [0], [1], [0, 0, 1, 1], [], []>} : vector<256x256xf32>, vector<256x16xf32>, vector<256x16xf32> -> vector<256x16xf32>
    %c0_16 = arith.constant 0 : index
    %c0_17 = arith.constant 0 : index
    %29 = vector.load %arg6[%c0_16, %c0_17] : memref<16x32xf32, #tpu.memory_space<vmem>>, vector<16x32xf32>
    %cst_18 = arith.constant dense<0.000000e+00> : vector<256x32xf32>
    %30 = tpu.matmul %28, %29, %cst_18 {dimension_numbers = #tpu.dot_dimension_numbers<[1], [0], [0], [1], [0, 0, 1, 1], [], []>} : vector<256x16xf32>, vector<16x32xf32>, vector<256x32xf32> -> vector<256x32xf32>
    %31 = arith.truncf %8 : vector<256x32xf32> to vector<256x32xbf16>
    %c0_19 = arith.constant 0 : index
    %c0_20 = arith.constant 0 : index
    %32 = vector.load %arg7[%c0_19, %c0_20] : memref<256x1024xbf16, #tpu.memory_space<vmem>>, vector<256x1024xbf16>
    %cst_21 = arith.constant dense<0.000000e+00> : vector<32x1024xf32>
    %33 = tpu.matmul %31, %32, %cst_21 {dimension_numbers = #tpu.dot_dimension_numbers<[0], [0], [1], [1], [0, 1, 1, 1], [], []>} : vector<256x32xbf16>, vector<256x1024xbf16>, vector<32x1024xf32> -> vector<32x1024xf32>
    %34 = tpu.iota {dimensions = array<i32: 0>} : vector<32x1024xi32>
    %35 = tpu.iota {dimensions = array<i32: 1>} : vector<32x1024xi32>
    %c5_i32 = arith.constant 5 : i32
    %36 = vector.broadcast %c5_i32 : i32 to vector<32x1024xi32>
    %37 = arith.shrsi %35, %36 : vector<32x1024xi32>
    %38 = arith.cmpi eq, %37, %34 : vector<32x1024xi32>
    %cst_22 = arith.constant 0.000000e+00 : f32
    %39 = vector.broadcast %cst_22 : f32 to vector<32x1024xf32>
    %40 = arith.select %38, %33, %39 : vector<32x1024xi1>, vector<32x1024xf32>
    %cst_23 = arith.constant dense<0.000000e+00> : vector<1024xf32>
    %41 = vector.multi_reduction <add>, %40, %cst_23 [0] : vector<32x1024xf32> to vector<1024xf32>
    %42 = vector.shape_cast %41 : vector<1024xf32> to vector<1x1024xf32>
    %43 = vector.extract_strided_slice %42 {offsets = [0, 0], sizes = [1, 512], strides = [1, 1]} : vector<1x1024xf32> to vector<1x512xf32>
    %44 = vector.extract_strided_slice %42 {offsets = [0, 512], sizes = [1, 512], strides = [1, 1]} : vector<1x1024xf32> to vector<1x512xf32>
    %45 = arith.addf %43, %44 : vector<1x512xf32>
    %46 = vector.extract_strided_slice %45 {offsets = [0, 0], sizes = [1, 256], strides = [1, 1]} : vector<1x512xf32> to vector<1x256xf32>
    %47 = vector.extract_strided_slice %45 {offsets = [0, 256], sizes = [1, 256], strides = [1, 1]} : vector<1x512xf32> to vector<1x256xf32>
    %48 = arith.addf %46, %47 : vector<1x256xf32>
    %49 = vector.extract_strided_slice %48 {offsets = [0, 0], sizes = [1, 128], strides = [1, 1]} : vector<1x256xf32> to vector<1x128xf32>
    %50 = vector.extract_strided_slice %48 {offsets = [0, 128], sizes = [1, 128], strides = [1, 1]} : vector<1x256xf32> to vector<1x128xf32>
    %51 = arith.addf %49, %50 : vector<1x128xf32>
    %52 = vector.extract_strided_slice %51 {offsets = [0, 0], sizes = [1, 64], strides = [1, 1]} : vector<1x128xf32> to vector<1x64xf32>
    %53 = vector.extract_strided_slice %51 {offsets = [0, 64], sizes = [1, 64], strides = [1, 1]} : vector<1x128xf32> to vector<1x64xf32>
    %54 = arith.addf %52, %53 : vector<1x64xf32>
    %55 = vector.extract_strided_slice %54 {offsets = [0, 0], sizes = [1, 32], strides = [1, 1]} : vector<1x64xf32> to vector<1x32xf32>
    %56 = vector.extract_strided_slice %54 {offsets = [0, 32], sizes = [1, 32], strides = [1, 1]} : vector<1x64xf32> to vector<1x32xf32>
    %57 = arith.addf %55, %56 : vector<1x32xf32>
    %c0_24 = arith.constant 0 : index
    %c0_25 = arith.constant 0 : index
    %58 = vector.load %arg8[%c0_24, %c0_25] : memref<1x32xf32, #tpu.memory_space<vmem>>, vector<1x32xf32>
    %59 = arith.addf %57, %58 : vector<1x32xf32>
    %cst_26 = arith.constant 0.000000e+00 : f32
    %60 = vector.broadcast %cst_26 : f32 to vector<1x32xf32>
    %61 = arith.maximumf %59, %60 : vector<1x32xf32>
    %c0_27 = arith.constant 0 : index
    %c0_28 = arith.constant 0 : index
    %62 = vector.load %arg9[%c0_27, %c0_28] : memref<32x256xf32, #tpu.memory_space<vmem>>, vector<32x256xf32>
    %cst_29 = arith.constant dense<0.000000e+00> : vector<1x256xf32>
    %63 = tpu.matmul %61, %62, %cst_29 {dimension_numbers = #tpu.dot_dimension_numbers<[1], [0], [0], [1], [0, 0, 1, 1], [], []>} : vector<1x32xf32>, vector<32x256xf32>, vector<1x256xf32> -> vector<1x256xf32>
    %c0_30 = arith.constant 0 : index
    %c0_31 = arith.constant 0 : index
    %64 = vector.load %arg10[%c0_30, %c0_31] : memref<1x256xf32, #tpu.memory_space<vmem>>, vector<1x256xf32>
    %65 = arith.addf %63, %64 : vector<1x256xf32>
    %cst_32 = arith.constant dense<0xFF800000> : vector<1xf32>
    %66 = vector.multi_reduction <maximumf>, %65, %cst_32 [1] : vector<1x256xf32> to vector<1xf32>
    %67 = vector.shape_cast %66 : vector<1xf32> to vector<1x1xf32>
    %68 = vector.broadcast %67 : vector<1x1xf32> to vector<1x256xf32>
    %69 = arith.subf %65, %68 : vector<1x256xf32>
    %70 = math.exp %69 : vector<1x256xf32>
    %cst_33 = arith.constant dense<0.000000e+00> : vector<1xf32>
    %71 = vector.multi_reduction <add>, %70, %cst_33 [1] : vector<1x256xf32> to vector<1xf32>
    %72 = vector.shape_cast %71 : vector<1xf32> to vector<1x1xf32>
    %73 = tpu.reciprocal %72 {approx = true} : vector<1x1xf32> -> vector<1x1xf32>
    %74 = vector.broadcast %73 : vector<1x1xf32> to vector<1x256xf32>
    %75 = arith.mulf %70, %74 : vector<1x256xf32>
    %76 = tpu.transpose %75, [1, 0] : vector<1x256xf32> -> vector<256x1xf32>
    %77 = vector.broadcast %76 : vector<256x1xf32> to vector<256x32xf32>
    %78 = arith.mulf %77, %30 : vector<256x32xf32>
    %79 = arith.addf %78, %8 : vector<256x32xf32>
    %cst_34 = arith.constant dense<0.000000e+00> : vector<32xf32>
    %80 = vector.multi_reduction <add>, %79, %cst_34 [0] : vector<256x32xf32> to vector<32xf32>
    %81 = vector.shape_cast %80 : vector<32xf32> to vector<1x32xf32>
    %cst_35 = arith.constant 2.560000e+02 : f32
    %82 = vector.broadcast %cst_35 : f32 to vector<1x32xf32>
    %83 = arith.divf %81, %82 : vector<1x32xf32>
    %c0_36 = arith.constant 0 : index
    %c0_37 = arith.constant 0 : index
    %84 = vector.load %arg11[%c0_36, %c0_37] : memref<32x10xf32, #tpu.memory_space<vmem>>, vector<32x10xf32>
    %cst_38 = arith.constant dense<0.000000e+00> : vector<1x10xf32>
    %85 = tpu.matmul %83, %84, %cst_38 {dimension_numbers = #tpu.dot_dimension_numbers<[1], [0], [0], [1], [0, 0, 1, 1], [], []>} : vector<1x32xf32>, vector<32x10xf32>, vector<1x10xf32> -> vector<1x10xf32>
    %c0_39 = arith.constant 0 : index
    %c0_40 = arith.constant 0 : index
    %86 = vector.load %arg12[%c0_39, %c0_40] : memref<1x10xf32, #tpu.memory_space<vmem>>, vector<1x10xf32>
    %87 = arith.addf %85, %86 : vector<1x10xf32>
    %88 = vector.extract_strided_slice %79 {offsets = [0, 0], sizes = [64, 32], strides = [1, 1]} : vector<256x32xf32> to vector<64x32xf32>
    %89 = vector.extract_strided_slice %79 {offsets = [64, 0], sizes = [64, 32], strides = [1, 1]} : vector<256x32xf32> to vector<64x32xf32>
    %90 = vector.extract_strided_slice %79 {offsets = [128, 0], sizes = [64, 32], strides = [1, 1]} : vector<256x32xf32> to vector<64x32xf32>
    %91 = vector.extract_strided_slice %79 {offsets = [192, 0], sizes = [64, 32], strides = [1, 1]} : vector<256x32xf32> to vector<64x32xf32>
    %92 = vector.extract_strided_slice %8 {offsets = [0, 0], sizes = [64, 32], strides = [1, 1]} : vector<256x32xf32> to vector<64x32xf32>
    %93 = vector.extract_strided_slice %8 {offsets = [64, 0], sizes = [64, 32], strides = [1, 1]} : vector<256x32xf32> to vector<64x32xf32>
    %94 = vector.extract_strided_slice %8 {offsets = [128, 0], sizes = [64, 32], strides = [1, 1]} : vector<256x32xf32> to vector<64x32xf32>
    %95 = vector.extract_strided_slice %8 {offsets = [192, 0], sizes = [64, 32], strides = [1, 1]} : vector<256x32xf32> to vector<64x32xf32>
    %96 = tpu.concatenate %88, %89, %90, %91, %92, %93, %94, %95 in 1 : vector<64x32xf32>, vector<64x32xf32>, vector<64x32xf32>, vector<64x32xf32>, vector<64x32xf32>, vector<64x32xf32>, vector<64x32xf32>, vector<64x32xf32> -> vector<64x256xf32>
    %c0_41 = arith.constant 0 : index
    %c0_42 = arith.constant 0 : index
    %c0_43 = arith.constant 0 : index
    %97 = vector.load %arg14[%c0_41, %c0_42, %c0_43] : memref<1x64x256xf32, #tpu.memory_space<vmem>>, vector<1x64x256xf32>
    %98 = vector.shape_cast %97 : vector<1x64x256xf32> to vector<64x256xf32>
    %99 = vector.shape_cast %96 : vector<64x256xf32> to vector<1x64x256xf32>
    tpu.vector_store %arg14[%c0_41, %c0_42, %c0_43], %99 {strides = array<i32>} : memref<1x64x256xf32, #tpu.memory_space<vmem>>, vector<1x64x256xf32>,
    %cst_44 = arith.constant 0.000000e+00 : f32
    %100 = vector.broadcast %cst_44 : f32 to vector<1x118xf32>
    %cst_45 = arith.constant 0.000000e+00 : f32
    %101 = vector.broadcast %cst_45 : f32 to vector<1x96xf32>
    %102 = tpu.concatenate %87, %100, %83, %101, %75 in 1 : vector<1x10xf32>, vector<1x118xf32>, vector<1x32xf32>, vector<1x96xf32>, vector<1x256xf32> -> vector<1x512xf32>
    %c0_46 = arith.constant 0 : index
    %c0_47 = arith.constant 0 : index
    %c0_48 = arith.constant 0 : index
    %103 = vector.load %arg13[%c0_46, %c0_47, %c0_48] : memref<1x1x512xf32, #tpu.memory_space<vmem>>, vector<1x1x512xf32>
    %104 = vector.shape_cast %103 : vector<1x1x512xf32> to vector<1x512xf32>
    %105 = vector.shape_cast %102 : vector<1x512xf32> to vector<1x1x512xf32>
    tpu.vector_store %arg13[%c0_46, %c0_47, %c0_48], %105 {strides = array<i32>} : memref<1x1x512xf32, #tpu.memory_space<vmem>>, vector<1x1x512xf32>,
    return
  }
  func.func @transform_0(%arg0: i32) -> (i32, i32, i32) {
    %c0_i32 = arith.constant 0 : i32
    %c0_i32_0 = arith.constant 0 : i32
    %c0_i32_1 = arith.constant 0 : i32
    return %arg0, %c0_i32, %c0_i32_0 : i32, i32, i32
  }
  func.func @transform_1(%arg0: i32) -> (i32, i32) {
    %c0_i32 = arith.constant 0 : i32
    %c0_i32_0 = arith.constant 0 : i32
    %c0_i32_1 = arith.constant 0 : i32
    return %c0_i32, %c0_i32_0 : i32, i32
  }
  func.func @transform_2(%arg0: i32) -> (i32, i32) {
    %c0_i32 = arith.constant 0 : i32
    %c0_i32_0 = arith.constant 0 : i32
    %c0_i32_1 = arith.constant 0 : i32
    return %c0_i32, %c0_i32_0 : i32, i32
  }
  func.func @transform_3(%arg0: i32) -> (i32, i32) {
    %c0_i32 = arith.constant 0 : i32
    %c0_i32_0 = arith.constant 0 : i32
    %c0_i32_1 = arith.constant 0 : i32
    return %c0_i32, %c0_i32_0 : i32, i32
  }
  func.func @transform_4(%arg0: i32) -> (i32, i32) {
    %c0_i32 = arith.constant 0 : i32
    %c0_i32_0 = arith.constant 0 : i32
    %c0_i32_1 = arith.constant 0 : i32
    return %c0_i32, %c0_i32_0 : i32, i32
  }
  func.func @transform_5(%arg0: i32) -> (i32, i32) {
    %c0_i32 = arith.constant 0 : i32
    %c0_i32_0 = arith.constant 0 : i32
    %c0_i32_1 = arith.constant 0 : i32
    return %c0_i32, %c0_i32_0 : i32, i32
  }
  func.func @transform_6(%arg0: i32) -> (i32, i32) {
    %c0_i32 = arith.constant 0 : i32
    %c0_i32_0 = arith.constant 0 : i32
    %c0_i32_1 = arith.constant 0 : i32
    return %c0_i32, %c0_i32_0 : i32, i32
  }
  func.func @transform_7(%arg0: i32) -> (i32, i32) {
    %c0_i32 = arith.constant 0 : i32
    %c0_i32_0 = arith.constant 0 : i32
    %c0_i32_1 = arith.constant 0 : i32
    return %c0_i32, %c0_i32_0 : i32, i32
  }
  func.func @transform_8(%arg0: i32) -> (i32, i32) {
    %c0_i32 = arith.constant 0 : i32
    %c0_i32_0 = arith.constant 0 : i32
    %c0_i32_1 = arith.constant 0 : i32
    return %c0_i32, %c0_i32_0 : i32, i32
  }
  func.func @transform_9(%arg0: i32) -> (i32, i32) {
    %c0_i32 = arith.constant 0 : i32
    %c0_i32_0 = arith.constant 0 : i32
    %c0_i32_1 = arith.constant 0 : i32
    return %c0_i32, %c0_i32_0 : i32, i32
  }
  func.func @transform_10(%arg0: i32) -> (i32, i32) {
    %c0_i32 = arith.constant 0 : i32
    %c0_i32_0 = arith.constant 0 : i32
    %c0_i32_1 = arith.constant 0 : i32
    return %c0_i32, %c0_i32_0 : i32, i32
  }
  func.func @transform_11(%arg0: i32) -> (i32, i32) {
    %c0_i32 = arith.constant 0 : i32
    %c0_i32_0 = arith.constant 0 : i32
    %c0_i32_1 = arith.constant 0 : i32
    return %c0_i32, %c0_i32_0 : i32, i32
  }
  func.func @transform_12(%arg0: i32) -> (i32, i32, i32) {
    %c0_i32 = arith.constant 0 : i32
    %c0_i32_0 = arith.constant 0 : i32
    %c0_i32_1 = arith.constant 0 : i32
    return %arg0, %c0_i32, %c0_i32_0 : i32, i32, i32
  }
  func.func @transform_13(%arg0: i32) -> (i32, i32, i32) {
    %c0_i32 = arith.constant 0 : i32
    %c0_i32_0 = arith.constant 0 : i32
    %c0_i32_1 = arith.constant 0 : i32
    return %arg0, %c0_i32, %c0_i32_0 : i32, i32, i32
  }
}

</mosaic_0001>

<bundles_post_ra>
// kernel: network_forward.1
= control target key start
LH: loop header
LB: loop body
LE: loop exit
PB: predicated region body
PF: predicated region fallthrough
CT: control target
= control target key end

     0   :  { %19 = vsyncpa [#allocation3], 0  ;;  %s5928_s25 = smov 0   ;;  %s7759_s0 = inlined_call_operand.vmem [shape: f32[2,256,4], index: 0, kind: input, shape index: {}]   ;;  %s7760_s1 = inlined_call_operand.vmem [shape: f32[4,32], index: 1, kind: input, shape index: {}]   ;;  %s7761_s2 = inlined_call_operand.vmem [shape: f32[1,32], index: 2, kind: input, shape index: {}]   ;;  %s7762_s3 = inlined_call_operand.vmem [shape: f32[32,48], index: 3, kind: input, shape index: {}]   ;;  %s7763_s4 = inlined_call_operand.vmem [shape: f32[1,48], index: 4, kind: input, shape index: {}]   ;;  %s7764_s5 = inlined_call_operand.vmem [shape: f32[16,32], index: 5, kind: input, shape index: {}]   ;;  %s7765_s6 = inlined_call_operand.hbm [shape: bf16[256,1024], index: 6, kind: input, shape index: {}]   ;;  %s7766_s7 = inlined_call_operand.vmem [shape: f32[1,32], index: 7, kind: input, shape index: {}]   ;;  %s7767_s8 = inlined_call_operand.vmem [shape: f32[32,256], index: 8, kind: input, shape index: {}]   ;;  %s7768_s9 = inlined_call_operand.vmem [shape: f32[1,256], index: 9, kind: input, shape index: {}]   ;;  %s7769_s10 = inlined_call_operand.vmem [shape: f32[32,10], index: 10, kind: input, shape index: {}]   ;;  %s7770_s11 = inlined_call_operand.vmem [shape: f32[1,10], index: 11, kind: input, shape index: {}]   ;;  %s7771_s12 = inlined_call_operand.vmem [shape: f32[2,1,512], index: 12, kind: output, shape index: {0}]   ;;  %s7772_s13 = inlined_call_operand.vmem [shape: f32[2,64,256], index: 13, kind: output, shape index: {1}]  }
   0x1 LB: > { %s4898_s26 = sadd.s32 4294967295, %s5845_s25   ;;  %p4900_p0 = scmp.ge.s32.totalorder %s5845_s25, 1  ;;  %s5845_s25 = sphi %s5928_s25, %s25_s25  }
   0x2   : > { %p339_p1 = scmp.lt.s32.totalorder %s5845_s25, 3  ;;  %s5847_s27 = smov [#allocation2]  }
   0x3   : > { %s366_s28 = sshll.u32 %s5847_s27, 4  ;;  %p5588_p3 = scmp.eq.s32.totalorder %s4898_s26, 0  ;;  %s367_s28 = int_to_ptr.vmem [resolvable:$true] %s366_s28 }
   0x4   : > { %p5936_p2 = pnand %p4900_p0, %p339_p1  ;;  %s5820_s30 = scalar_lea.vmem %s367_s28, 16384 }
   0x5   : > { %p5821_p7 = scmp.ne.s32.totalorder %s367_s28, %s5820_s30  ;;  %p5828_p10 = scmp.lt.s32.totalorder %s367_s28, %s367_s28 }
   0x6   : > { %p5584_p4 = pneg %p5936_p2  ;;  %p5829_p11 = scmp.lt.s32.totalorder %s5820_s30, %s5820_s30 }
   0x8   : > { %p5585_p5 = pnand %p5588_p3, %p5584_p4  ;;  %p5830_p12 = por %p5829_p11, %p5828_p10 }
   0xa   : > { %p5811_p6 = pneg %p5585_p5 }
   0xc   : > { %p5823_p8 = pnand %p5821_p7, %p5811_p6 }
   0xe   : > { %p5824_p9 = pneg %p5823_p8 }
  0x10   : > { %p5831_p13 = pnand %p5830_p12, %p5824_p9 }
  0x12   : > { %5834 = shalt.err (!%p5831_p13)
}
  0x13   : > { %s5848_s14 = smov 512   ;;  %s5849_s15 = smov 32  }
  0x14   : > { %5587 = dma.hbm_to_vmem [thread:$0]  (!%p5585_p5), %s7765_s6, 16384, %s367_s28, [#allocation3], %s5848_s14, %s5848_s14, %s5849_s15  }
  0x15   : > { %405 = sbr.rel (%p5936_p2) target bundleno = 3114 (0xc2a), region = 68 }
  0x1a   : > { %5840 = dma.done.wait (%p5588_p3), [#allocation3], 16384  }
  0x1b   : > { %5842 = vsyncadd (%p5588_p3), [#allocation3], 4294950912  ;;  %p453_p0 = scmp.lt.s32.totalorder %s4898_s26, 1  ;;  %vm604_vm0 = vcmask 1043456   ;;  %vm507_vm1 = vcmask 31744   ;;  %v868_v33 = vld [vmem:[%s7762_s3 + $0x18] sm:$0xff] }
  0x1c   : > { %v499_v0 = vld [vmem:[%s7760_s1] sm:$0xf]  ;;  %5461 = vmatprep.subr.mxu1 %v868_v33  ;;  %v867_v34 = vld [vmem:[%s7762_s3 + $0x10] sm:$0xff]  ;;  %v866_v35 = vld [vmem:[%s7762_s3 + $0x8] sm:$0xff]  ;;  %vm876_vm2 = vcmask 261120   ;;  %s5852_s22 = smov 112  }
  0x1d   : > { %s8069_s26 = smov (!%p453_p0, %s4898_s26), 1  ;;  %5411 = vmatprep.subr.msk.mxu0 %vm604_vm0, %v499_v0  ;;  %5462 = vmatpush3.msra.mxu1 %v868_v33  ;;  %v865_v36 = vld [vmem:[%s7762_s3] sm:$0xff]  ;;  %vm1358_vm3 = vcmask 130048   ;;  %s5853_s27 = smov 64  }
  0x1e   : > { %s5205_s18 = sshll.u32 %s8069_s26, 8  ;;  %5412 = vmatpush3.msk.msra.mxu0 %vm604_vm0, %v499_v0  ;;  %5463 = vmatprep.subr.mxu1 %v867_v34  ;;  %v6040_v37 = vld [vmem:[%s7761_s2] ss:$0 sm:$0xff]  ;;  %s5855_s19 = smov 32  }
  0x1f   : > { %s5956_s21 = scalar_lea.vmem %s7759_s0, %s5205_s18  ;;  %5464 = vmatpush3.msra.mxu1 %v867_v34 }
  0x20   : > { %v467_v1 = vld [vmem:[%s5956_s21] sm:$0xff]  ;;  %v468_v2 = vld [vmem:[%s5956_s21 + $0x8] sm:$0xff]  ;;  %v469_v3 = vld [vmem:[%s5956_s21 + $0x10] sm:$0xff]  ;;  %5465 = vmatprep.subr.mxu1 %v866_v35 }
  0x21   : > { %5413 = vmatprep.mubr.msk.f32.mxu0 %vm507_vm1, %v467_v1  ;;  %v470_v4 = vld [vmem:[%s5956_s21 + $0x18] sm:$0xff]  ;;  %v471_v5 = vld [vmem:[%s5956_s21 + $0x20] sm:$0xff]  ;;  %v472_v6 = vld [vmem:[%s5956_s21 + $0x28] sm:$0xff]  ;;  %5466 = vmatpush3.msra.mxu1 %v866_v35 }
  0x22   : > { %5414 = vmatmul.mubr.msk.f32.vlgmr.msra.gmra.mxu0 %vm507_vm1, %v468_v2  ;;  %v473_v7 = vld [vmem:[%s5956_s21 + $0x30] sm:$0xff]  ;;  %v474_v8 = vld [vmem:[%s5956_s21 + $0x38] sm:$0xff]  ;;  %v475_v9 = vld [vmem:[%s5956_s21 + $0x40] sm:$0xff]  ;;  %5467 = vmatprep.subr.mxu1 %v865_v36 }
  0x23   : > { %5416 = vmatprep.mubr.msk.f32.mxu0 %vm507_vm1, %v469_v3  ;;  %v476_v10 = vld [vmem:[%s5956_s21 + $0x48] sm:$0xff]  ;;  %v477_v11 = vld [vmem:[%s5956_s21 + $0x50] sm:$0xff]  ;;  %v478_v12 = vld [vmem:[%s5956_s21 + $0x58] sm:$0xff]  ;;  %5468 = vmatpush3.msra.mxu1 %v865_v36 }
  0x24   : > { %v479_v13 = vld [vmem:[%s5956_s21 + $0x60] sm:$0xff]  ;;  %v480_v14 = vld [vmem:[%s5956_s21 + $0x68] sm:$0xff]  ;;  %v481_v15 = vld [vmem:[%s5956_s21 + $0x70] sm:$0xff] }
  0x25   : > { %v482_v16 = vld [vmem:[%s5956_s21 + $0x78] sm:$0xff]  ;;  %v483_v17 = vld [vmem:[%s5956_s21 + $0x80] sm:$0xff]  ;;  %v484_v18 = vld [vmem:[%s5956_s21 + $0x88] sm:$0xff] }
  0x26   : > { %5417 = vmatmul.mubr.msk.f32.gmra.mxu0 %vm507_vm1, %v470_v4  ;;  %v485_v19 = vld [vmem:[%s5956_s21 + $0x90] sm:$0xff]  ;;  %v486_v20 = vld [vmem:[%s5956_s21 + $0x98] sm:$0xff]  ;;  %v487_v21 = vld [vmem:[%s5956_s21 + $0xa0] sm:$0xff] }
  0x27   : > { %5419 = vmatprep.mubr.msk.f32.mxu0 %vm507_vm1, %v471_v5  ;;  %v488_v22 = vld [vmem:[%s5956_s21 + $0xa8] sm:$0xff]  ;;  %v489_v23 = vld [vmem:[%s5956_s21 + $0xb0] sm:$0xff]  ;;  %v490_v24 = vld [vmem:[%s5956_s21 + $0xb8] sm:$0xff] }
  0x28   : > { %v491_v25 = vld [vmem:[%s5956_s21 + $0xc0] sm:$0xff]  ;;  %v492_v26 = vld [vmem:[%s5956_s21 + $0xc8] sm:$0xff]  ;;  %v493_v27 = vld [vmem:[%s5956_s21 + $0xd0] sm:$0xff] }
  0x29   : > { %v494_v28 = vld [vmem:[%s5956_s21 + $0xd8] sm:$0xff]  ;;  %v495_v29 = vld [vmem:[%s5956_s21 + $0xe0] sm:$0xff]  ;;  %v496_v30 = vld [vmem:[%s5956_s21 + $0xe8] sm:$0xff] }
  0x2a   : > { %5420 = vmatmul.mubr.msk.f32.gmra.mxu0 %vm507_vm1, %v472_v6  ;;  %v497_v31 = vld [vmem:[%s5956_s21 + $0xf0] sm:$0xff]  ;;  %v498_v32 = vld [vmem:[%s5956_s21 + $0xf8] sm:$0xff]  ;;  %s5851_s21 = smov 96  }
  0x2b   : > { %5422 = vmatprep.mubr.msk.f32.mxu0 %vm507_vm1, %v473_v7 }
  0x2e   : > { %5423 = vmatmul.mubr.msk.f32.gmra.mxu0 %vm507_vm1, %v474_v8 }
  0x2f   : > { %5425 = vmatprep.mubr.msk.f32.mxu0 %vm507_vm1, %v475_v9 }
  0x32   : > { %5426 = vmatmul.mubr.msk.f32.gmra.mxu0 %vm507_vm1, %v476_v10 }
  0x33   : > { %5428 = vmatprep.mubr.msk.f32.mxu0 %vm507_vm1, %v477_v11 }
  0x36   : > { %5429 = vmatmul.mubr.msk.f32.gmra.mxu0 %vm507_vm1, %v478_v12 }
  0x37   : > { %5431 = vmatprep.mubr.msk.f32.mxu0 %vm507_vm1, %v479_v13 }
  0x3a   : > { %5432 = vmatmul.mubr.msk.f32.gmra.mxu0 %vm507_vm1, %v480_v14 }
  0x3b   : > { %5434 = vmatprep.mubr.msk.f32.mxu0 %vm507_vm1, %v481_v15 }
  0x3e   : > { %5435 = vmatmul.mubr.msk.f32.gmra.mxu0 %vm507_vm1, %v482_v16 }
  0x3f   : > { %5437 = vmatprep.mubr.msk.f32.mxu0 %vm507_vm1, %v483_v17 }
  0x42   : > { %5438 = vmatmul.mubr.msk.f32.gmra.mxu0 %vm507_vm1, %v484_v18 }
  0x43   : > { %5440 = vmatprep.mubr.msk.f32.mxu0 %vm507_vm1, %v485_v19 }
  0x46   : > { %5441 = vmatmul.mubr.msk.f32.gmra.mxu0 %vm507_vm1, %v486_v20 }
  0x47   : > { %5443 = vmatprep.mubr.msk.f32.mxu0 %vm507_vm1, %v487_v21 }
  0x4a   : > { %5444 = vmatmul.mubr.msk.f32.gmra.mxu0 %vm507_vm1, %v488_v22 }
  0x4b   : > { %5446 = vmatprep.mubr.msk.f32.mxu0 %vm507_vm1, %v489_v23 }
  0x4e   : > { %5447 = vmatmul.mubr.msk.f32.gmra.mxu0 %vm507_vm1, %v490_v24 }
  0x4f   : > { %5449 = vmatprep.mubr.msk.f32.mxu0 %vm507_vm1, %v491_v25 }
  0x52   : > { %5450 = vmatmul.mubr.msk.f32.gmra.mxu0 %vm507_vm1, %v492_v26 }
  0x53   : > { %5452 = vmatprep.mubr.msk.f32.mxu0 %vm507_vm1, %v493_v27 }
  0x56   : > { %5453 = vmatmul.mubr.msk.f32.gmra.mxu0 %vm507_vm1, %v494_v28 }
  0x57   : > { %5455 = vmatprep.mubr.msk.f32.mxu0 %vm507_vm1, %v495_v29 }
  0x5a   : > { %5456 = vmatmul.mubr.msk.f32.gmra.mxu0 %vm507_vm1, %v496_v30 }
  0x5b   : > { %5458 = vmatprep.mubr.msk.f32.mxu0 %vm507_vm1, %v497_v31 }
  0x5e   : > { %5459 = vmatmul.mubr.msk.f32.gmra.mxu0 %vm507_vm1, %v498_v32 }
  0xe2   : > { %v5415_v38 = vpop.f32.mrf.mxu0 }
  0xe3   : > { %v680_v39 = vadd.f32 %v5415_v38, %v6040_v37 }
  0xe4   : > { %v674_v40 = vpop.f32.mrf.mxu0 }
  0xe5   : > { %v675_v41 = vadd.f32 %v6040_v37, %v674_v40  ;;  %v6046_v44 = vmax.f32 %v680_v39, 0.0 }
  0xe6   : > { %v5418_v42 = vpop.f32.mrf.mxu0 }
  0xe7   : > { %v6044_v43 = vmax.f32 %v675_v41, 0.0  ;;  %7871 = vst [vmem:[#allocation6_spill] sm:$0xff] %v6046_v44  ;;  %v690_v45 = vadd.f32 %v5418_v42, %v6040_v37 }
  0xe8   : > { %v684_v46 = vpop.f32.mrf.mxu0 }
  0xe9   : > { %7870 = vst [vmem:[#allocation5_spill] sm:$0xff] %v6044_v43  ;;  %v685_v47 = vadd.f32 %v6040_v37, %v684_v46  ;;  %5469 = vmatprep.mubr.msk.f32.mxu1 %vm876_vm2, %v6044_v43  ;;  %v6056_v50 = vmax.f32 %v690_v45, 0.0 }
  0xea   : > { %v5421_v48 = vpop.f32.mrf.mxu0  ;;  %5470 = vmatmul.mubr.msk.f32.vlgmr.msra.gmra.mxu1 %vm876_vm2, %v6046_v44 }
  0xeb   : > { %v6054_v49 = vmax.f32 %v685_v47, 0.0  ;;  %7873 = vst [vmem:[#allocation8_spill] sm:$0xff] %v6056_v50  ;;  %v700_v51 = vadd.f32 %v5421_v48, %v6040_v37 }
  0xec   : > { %v694_v52 = vpop.f32.mrf.mxu0 }
  0xed   : > { %7872 = vst [vmem:[#allocation7_spill] sm:$0xff] %v6054_v49  ;;  %v695_v53 = vadd.f32 %v6040_v37, %v694_v52  ;;  %5472 = vmatprep.mubr.msk.f32.mxu1 %vm876_vm2, %v6054_v49  ;;  %v6066_v56 = vmax.f32 %v700_v51, 0.0 }
  0xee   : > { %v5424_v54 = vpop.f32.mrf.mxu0  ;;  %5473 = vmatmul.mubr.msk.f32.gmra.mxu1 %vm876_vm2, %v6056_v50 }
  0xef   : > { %v6064_v55 = vmax.f32 %v695_v53, 0.0  ;;  %7875 = vst [vmem:[#allocation10_spill] sm:$0xff] %v6066_v56  ;;  %v710_v57 = vadd.f32 %v5424_v54, %v6040_v37 }
  0xf0   : > { %v704_v58 = vpop.f32.mrf.mxu0 }
  0xf1   : > { %7874 = vst [vmem:[#allocation9_spill] sm:$0xff] %v6064_v55  ;;  %v705_v59 = vadd.f32 %v6040_v37, %v704_v58  ;;  %5475 = vmatprep.mubr.msk.f32.mxu1 %vm876_vm2, %v6064_v55  ;;  %v6076_v62 = vmax.f32 %v710_v57, 0.0 }
  0xf2   : > { %v5427_v60 = vpop.f32.mrf.mxu0  ;;  %5476 = vmatmul.mubr.msk.f32.gmra.mxu1 %vm876_vm2, %v6066_v56 }
  0xf3   : > { %v6074_v61 = vmax.f32 %v705_v59, 0.0  ;;  %7877 = vst [vmem:[#allocation12_spill] sm:$0xff] %v6076_v62  ;;  %v720_v63 = vadd.f32 %v5427_v60, %v6040_v37 }
  0xf4   : > { %v714_v0 = vpop.f32.mrf.mxu0 }
  0xf5   : > { %7876 = vst [vmem:[#allocation11_spill] sm:$0xff] %v6074_v61  ;;  %v715_v1 = vadd.f32 %v6040_v37, %v714_v0  ;;  %5478 = vmatprep.mubr.msk.f32.mxu1 %vm876_vm2, %v6074_v61  ;;  %v6086_v4 = vmax.f32 %v720_v63, 0.0 }
  0xf6   : > { %v5430_v2 = vpop.f32.mrf.mxu0  ;;  %5479 = vmatmul.mubr.msk.f32.gmra.mxu1 %vm876_vm2, %v6076_v62 }
  0xf7   : > { %v6084_v3 = vmax.f32 %v715_v1, 0.0  ;;  %7879 = vst [vmem:[#allocation14_spill] sm:$0xff] %v6086_v4  ;;  %v730_v5 = vadd.f32 %v5430_v2, %v6040_v37 }
  0xf8   : > { %v724_v6 = vpop.f32.mrf.mxu0 }
  0xf9   : > { %7878 = vst [vmem:[#allocation13_spill] sm:$0xff] %v6084_v3  ;;  %v725_v7 = vadd.f32 %v6040_v37, %v724_v6  ;;  %5481 = vmatprep.mubr.msk.f32.mxu1 %vm876_vm2, %v6084_v3  ;;  %v6096_v10 = vmax.f32 %v730_v5, 0.0 }
  0xfa   : > { %v5433_v8 = vpop.f32.mrf.mxu0  ;;  %5482 = vmatmul.mubr.msk.f32.gmra.mxu1 %vm876_vm2, %v6086_v4 }
  0xfb   : > { %v6094_v9 = vmax.f32 %v725_v7, 0.0  ;;  %7881 = vst [vmem:[#allocation16_spill] sm:$0xff] %v6096_v10  ;;  %v740_v11 = vadd.f32 %v5433_v8, %v6040_v37 }
  0xfc   : > { %v734_v12 = vpop.f32.mrf.mxu0 }
  0xfd   : > { %7880 = vst [vmem:[#allocation15_spill] sm:$0xff] %v6094_v9  ;;  %v735_v13 = vadd.f32 %v6040_v37, %v734_v12  ;;  %5484 = vmatprep.mubr.msk.f32.mxu1 %vm876_vm2, %v6094_v9  ;;  %v6106_v16 = vmax.f32 %v740_v11, 0.0 }
  0xfe   : > { %v5436_v14 = vpop.f32.mrf.mxu0  ;;  %5485 = vmatmul.mubr.msk.f32.gmra.mxu1 %vm876_vm2, %v6096_v10 }
  0xff   : > { %v6104_v15 = vmax.f32 %v735_v13, 0.0  ;;  %7883 = vst [vmem:[#allocation18_spill] sm:$0xff] %v6106_v16  ;;  %v750_v17 = vadd.f32 %v5436_v14, %v6040_v37 }
 0x100   : > { %v744_v18 = vpop.f32.mrf.mxu0 }
 0x101   : > { %7882 = vst [vmem:[#allocation17_spill] sm:$0xff] %v6104_v15  ;;  %v745_v19 = vadd.f32 %v6040_v37, %v744_v18  ;;  %5487 = vmatprep.mubr.msk.f32.mxu1 %vm876_vm2, %v6104_v15  ;;  %v6116_v22 = vmax.f32 %v750_v17, 0.0 }
 0x102   : > { %v5439_v20 = vpop.f32.mrf.mxu0  ;;  %5488 = vmatmul.mubr.msk.f32.gmra.mxu1 %vm876_vm2, %v6106_v16 }
 0x103   : > { %v6114_v21 = vmax.f32 %v745_v19, 0.0  ;;  %7885 = vst [vmem:[#allocation20_spill] sm:$0xff] %v6116_v22  ;;  %v760_v23 = vadd.f32 %v5439_v20, %v6040_v37 }
 0x104   : > { %v754_v24 = vpop.f32.mrf.mxu0 }
 0x105   : > { %7884 = vst [vmem:[#allocation19_spill] sm:$0xff] %v6114_v21  ;;  %v755_v25 = vadd.f32 %v6040_v37, %v754_v24  ;;  %5490 = vmatprep.mubr.msk.f32.mxu1 %vm876_vm2, %v6114_v21  ;;  %v6126_v28 = vmax.f32 %v760_v23, 0.0  ;;  %v7783_v23 = vmov 0.0  }
 0x106   : > { %v5442_v26 = vpop.f32.mrf.mxu0  ;;  %5491 = vmatmul.mubr.msk.f32.gmra.mxu1 %vm876_vm2, %v6116_v22  ;;  %2224 = vmatprep.subr.mxu1 %v7783_v23 }
 0x107   : > { %v6124_v27 = vmax.f32 %v755_v25, 0.0  ;;  %7887 = vst [vmem:[#allocation22_spill] sm:$0xff] %v6126_v28  ;;  %v770_v29 = vadd.f32 %v5442_v26, %v6040_v37 }
 0x108   : > { %v764_v30 = vpop.f32.mrf.mxu0 }
 0x109   : > { %7886 = vst [vmem:[#allocation21_spill] sm:$0xff] %v6124_v27  ;;  %v765_v31 = vadd.f32 %v6040_v37, %v764_v30  ;;  %5493 = vmatprep.mubr.msk.f32.mxu1 %vm876_vm2, %v6124_v27  ;;  %v6136_v34 = vmax.f32 %v770_v29, 0.0 }
 0x10a   : > { %v5445_v32 = vpop.f32.mrf.mxu0  ;;  %5494 = vmatmul.mubr.msk.f32.gmra.mxu1 %vm876_vm2, %v6126_v28 }
 0x10b   : > { %v6134_v33 = vmax.f32 %v765_v31, 0.0  ;;  %7889 = vst [vmem:[#allocation24_spill] sm:$0xff] %v6136_v34  ;;  %v780_v35 = vadd.f32 %v5445_v32, %v6040_v37 }
 0x10c   : > { %v774_v36 = vpop.f32.mrf.mxu0 }
 0x10d   : > { %7888 = vst [vmem:[#allocation23_spill] sm:$0xff] %v6134_v33  ;;  %v775_v38 = vadd.f32 %v6040_v37, %v774_v36  ;;  %5496 = vmatprep.mubr.msk.f32.mxu1 %vm876_vm2, %v6134_v33  ;;  %v6146_v41 = vmax.f32 %v780_v35, 0.0 }
 0x10e   : > { %v5448_v39 = vpop.f32.mrf.mxu0  ;;  %5497 = vmatmul.mubr.msk.f32.gmra.mxu1 %vm876_vm2, %v6136_v34 }
 0x10f   : > { %v6144_v40 = vmax.f32 %v775_v38, 0.0  ;;  %7891 = vst [vmem:[#allocation26_spill] sm:$0xff] %v6146_v41  ;;  %v790_v42 = vadd.f32 %v5448_v39, %v6040_v37 }
 0x110   : > { %v784_v45 = vpop.f32.mrf.mxu0 }
 0x111   : > { %7890 = vst [vmem:[#allocation25_spill] sm:$0xff] %v6144_v40  ;;  %v785_v46 = vadd.f32 %v6040_v37, %v784_v45  ;;  %5499 = vmatprep.mubr.msk.f32.mxu1 %vm876_vm2, %v6144_v40  ;;  %v6156_v51 = vmax.f32 %v790_v42, 0.0 }
 0x112   : > { %v5451_v47 = vpop.f32.mrf.mxu0  ;;  %5500 = vmatmul.mubr.msk.f32.gmra.mxu1 %vm876_vm2, %v6146_v41 }
 0x113   : > { %v6154_v48 = vmax.f32 %v785_v46, 0.0  ;;  %7893 = vst [vmem:[#allocation28_spill] sm:$0xff] %v6156_v51  ;;  %v800_v52 = vadd.f32 %v5451_v47, %v6040_v37  ;;  %v6212_v46 = vld [vmem:[%s7763_s4] ss:$0 sm:$0xff] }
 0x114   : > { %v794_v53 = vpop.f32.mrf.mxu0 }
 0x115   : > { %7892 = vst [vmem:[#allocation27_spill] sm:$0xff] %v6154_v48  ;;  %v795_v54 = vadd.f32 %v6040_v37, %v794_v53  ;;  %5502 = vmatprep.mubr.msk.f32.mxu1 %vm876_vm2, %v6154_v48  ;;  %v6166_v59 = vmax.f32 %v800_v52, 0.0 }
 0x116   : > { %v5454_v57 = vpop.f32.mrf.mxu0  ;;  %5503 = vmatmul.mubr.msk.f32.gmra.mxu1 %vm876_vm2, %v6156_v51 }
 0x117   : > { %v6164_v58 = vmax.f32 %v795_v54, 0.0  ;;  %7895 = vst [vmem:[#allocation30_spill] sm:$0xff] %v6166_v59  ;;  %v810_v60 = vadd.f32 %v5454_v57, %v6040_v37 }
 0x118   : > { %v804_v63 = vpop.f32.mrf.mxu0 }
 0x119   : > { %7894 = vst [vmem:[#allocation29_spill] sm:$0xff] %v6164_v58  ;;  %v805_v0 = vadd.f32 %v6040_v37, %v804_v63  ;;  %5505 = vmatprep.mubr.msk.f32.mxu1 %vm876_vm2, %v6164_v58  ;;  %v6176_v5 = vmax.f32 %v810_v60, 0.0 }
 0x11a   : > { %v5457_v1 = vpop.f32.mrf.mxu0  ;;  %5506 = vmatmul.mubr.msk.f32.gmra.mxu1 %vm876_vm2, %v6166_v59 }
 0x11b   : > { %v6174_v2 = vmax.f32 %v805_v0, 0.0  ;;  %7897 = vst [vmem:[#allocation32_spill] sm:$0xff] %v6176_v5  ;;  %v820_v6 = vadd.f32 %v5457_v1, %v6040_v37 }
 0x11c   : > { %v814_v7 = vpop.f32.mrf.mxu0 }
 0x11d   : > { %7896 = vst [vmem:[#allocation31_spill] sm:$0xff] %v6174_v2  ;;  %v815_v8 = vadd.f32 %v6040_v37, %v814_v7  ;;  %5508 = vmatprep.mubr.msk.f32.mxu1 %vm876_vm2, %v6174_v2  ;;  %v6186_v13 = vmax.f32 %v820_v6, 0.0 }
 0x11e   : > { %v5460_v11 = vpop.f32.mrf.mxu0  ;;  %5509 = vmatmul.mubr.msk.f32.gmra.mxu1 %vm876_vm2, %v6176_v5 }
 0x11f   : > { %v6184_v12 = vmax.f32 %v815_v8, 0.0  ;;  %7899 = vst [vmem:[#allocation34_spill] sm:$0xff] %v6186_v13  ;;  %v830_v14 = vadd.f32 %v5460_v11, %v6040_v37 }
 0x120   : > { %v824_v17 = vpop.f32.mrf.mxu0 }
 0x121   : > { %7898 = vst [vmem:[#allocation33_spill] sm:$0xff] %v6184_v12  ;;  %v825_v18 = vadd.f32 %v6040_v37, %v824_v17  ;;  %5511 = vmatprep.mubr.msk.f32.mxu1 %vm876_vm2, %v6184_v12  ;;  %v6196_v20 = vmax.f32 %v830_v14, 0.0 }
 0x122   : > { %5512 = vmatmul.mubr.msk.f32.gmra.mxu1 %vm876_vm2, %v6186_v13 }
 0x123   : > { %v6194_v19 = vmax.f32 %v825_v18, 0.0  ;;  %7901 = vst [vmem:[#allocation36_spill] sm:$0xff] %v6196_v20 }
 0x125   : > { %7900 = vst [vmem:[#allocation35_spill] sm:$0xff] %v6194_v19  ;;  %5514 = vmatprep.mubr.msk.f32.mxu1 %vm876_vm2, %v6194_v19 }
 0x126   : > { %5515 = vmatmul.mubr.msk.f32.gmra.mxu1 %vm876_vm2, %v6196_v20 }
 0x1aa   : > { %v6203_v37 = vpop.f32.mrf.mxu1 }
 0x1ab   : > { %v6301_v21 = vadd.f32 %v6203_v37, %v6212_v46 }
 0x1ac   : > { %v6205_v24 = vpop.f32.mrf.mxu1 }
 0x1ad   : > { %v6307_v16 = vadd.f32 %v6212_v46, %v6205_v24 }
 0x1ae   : > { %v5474_v25 = vpop.f32.mrf.mxu1 }
 0x1b0   : > { %v6207_v26 = vpop.f32.mrf.mxu1 }
 0x1b1   : > { %v6295_v22 = vadd.f32 %v6212_v46, %v6207_v26 }
 0x1b2   : > { %v5477_v29 = vpop.f32.mrf.mxu1 }
 0x1b4   : > { %v1059_v30 = vpop.f32.mrf.mxu1 }
 0x1b6   : > { %v5480_v31 = vpop.f32.mrf.mxu1 }
 0x1b8   : > { %v1069_v32 = vpop.f32.mrf.mxu1 }
 0x1ba   : > { %v5483_v35 = vpop.f32.mrf.mxu1 }
 0x1bb   : > { %v6253_v14 = vadd.f32 %v5483_v35, %v6212_v46 }
 0x1bc   : > { %v1079_v36 = vpop.f32.mrf.mxu1 }
 0x1bd   : > { %v6260_v18 = vadd.f32 %v6212_v46, %v1079_v36 }
 0x1be   : > { %v5486_v38 = vpop.f32.mrf.mxu1 }
 0x1bf   : > { %v6239_v6 = vadd.f32 %v5486_v38, %v6212_v46 }
 0x1c0   : > { %v1089_v39 = vpop.f32.mrf.mxu1 }
 0x1c1   : > { %v6246_v8 = vadd.f32 %v6212_v46, %v1089_v39  ;;  %v6267_v39 = vadd.f32 %v5480_v31, %v6212_v46 }
 0x1c2   : > { %v5489_v42 = vpop.f32.mrf.mxu1 }
 0x1c3   : > { %v6225_v60 = vadd.f32 %v5489_v42, %v6212_v46  ;;  %v6274_v42 = vadd.f32 %v6212_v46, %v1069_v32 }
 0x1c4   : > { %v1099_v45 = vpop.f32.mrf.mxu1 }
 0x1c5   : > { %v6232_v0 = vadd.f32 %v6212_v46, %v1099_v45  ;;  %v6279_v45 = vadd.f32 %v5477_v29, %v6212_v46 }
 0x1c6   : > { %v5492_v47 = vpop.f32.mrf.mxu1 }
 0x1c7   : > { %v6215_v52 = vadd.f32 %v5492_v47, %v6212_v46  ;;  %v6284_v47 = vadd.f32 %v6212_v46, %v1059_v30 }
 0x1c8   : > { %v1109_v53 = vpop.f32.mrf.mxu1 }
 0x1c9   : > { %v6218_v54 = vadd.f32 %v6212_v46, %v1109_v53  ;;  %2225 = vmatpush1.msra.mxu1 %v6215_v52  ;;  %v6289_v53 = vadd.f32 %v5474_v25, %v6212_v46 }
 0x1ca   : > { %v6221_v57 = vpop.f32.mrf.mxu1  ;;  %2226 = vmatprep.subr.mxu1 %v7783_v23 }
 0x1cb   : > { %2227 = vmatpush1.msra.mxu1 %v6218_v54 }
 0x1cc   : > { %v6228_v63 = vpop.f32.mrf.mxu1  ;;  %2228 = vmatprep.subr.mxu1 %v7783_v23 }
 0x1cd   : > { %2229 = vmatpush1.msra.mxu1 %v6225_v60 }
 0x1ce   : > { %v6235_v1 = vpop.f32.mrf.mxu1  ;;  %2230 = vmatprep.subr.mxu1 %v7783_v23 }
 0x1cf   : > { %2231 = vmatpush1.msra.mxu1 %v6232_v0 }
 0x1d0   : > { %v6242_v7 = vpop.f32.mrf.mxu1  ;;  %2232 = vmatprep.subr.mxu1 %v7783_v23 }
 0x1d1   : > { %2233 = vmatpush1.msra.mxu1 %v6239_v6 }
 0x1d2   : > { %v6249_v11 = vpop.f32.mrf.mxu1  ;;  %2234 = vmatprep.subr.mxu1 %v7783_v23 }
 0x1d3   : > { %2235 = vmatpush1.msra.mxu1 %v6246_v8 }
 0x1d4   : > { %v6256_v17 = vpop.f32.mrf.mxu1  ;;  %2236 = vmatprep.subr.mxu1 %v7783_v23 }
 0x1d5   : > { %2237 = vmatpush1.msra.mxu1 %v6253_v14 }
 0x1d6   : > { %v6263_v38 = vpop.f32.mrf.mxu1  ;;  %2238 = vmatprep.subr.mxu1 %v7783_v23 }
 0x1d7   : > { %2239 = vmatpush1.msra.mxu1 %v6260_v18 }
 0x1d8   : > { %v6270_v35 = vpop.f32.mrf.mxu1  ;;  %2240 = vmatprep.subr.mxu1 %v7783_v23 }
 0x1d9   : > { %2241 = vmatpush1.msra.mxu1 %v6267_v39 }
 0x1da   : > { %v5507_v36 = vpop.f32.mrf.mxu1  ;;  %2242 = vmatprep.subr.mxu1 %v7783_v23 }
 0x1db   : > { %2243 = vmatpush1.msra.mxu1 %v6274_v42 }
 0x1dc   : > { %v1159_v31 = vpop.f32.mrf.mxu1  ;;  %2244 = vmatprep.subr.mxu1 %v7783_v23 }
 0x1dd   : > { %2245 = vmatpush1.msra.mxu1 %v6279_v45 }
 0x1de   : > { %v5510_v32 = vpop.f32.mrf.mxu1  ;;  %2246 = vmatprep.subr.mxu1 %v7783_v23 }
 0x1df   : > { %2247 = vmatpush1.msra.mxu1 %v6284_v47 }
 0x1e0   : > { %v1169_v29 = vpop.f32.mrf.mxu1  ;;  %2248 = vmatprep.subr.mxu1 %v7783_v23 }
 0x1e1   : > { %2249 = vmatpush1.msra.mxu1 %v6289_v53 }
 0x1e2   : > { %v5513_v30 = vpop.f32.mrf.mxu1  ;;  %2250 = vmatprep.subr.mxu1 %v7783_v23 }
 0x1e3   : > { %2251 = vmatpush1.msra.mxu1 %v6295_v22  ;;  %v6324_v24 = vadd.f32 %v5513_v30, %v6212_v46  ;;  %v6338_v30 = vadd.f32 %v5510_v32, %v6212_v46  ;;  %v6352_v32 = vadd.f32 %v5507_v36, %v6212_v46  ;;  %v6367_v36 = vadd.f32 %v6263_v38, %v6212_v46 }
 0x1e4   : > { %v1179_v25 = vpop.f32.mrf.mxu1  ;;  %2252 = vmatprep.subr.mxu1 %v7783_v23  ;;  %v6383_v38 = vadd.f32 %v6249_v11, %v6212_v46  ;;  %v1135_v11 = vadd.f32 %v6235_v1, %v6212_v46  ;;  %v1120_v1 = vadd.f32 %v6212_v46, %v6228_v63 }
 0x1e5   : > { %2253 = vmatpush1.msra.mxu1 %v6301_v21 }
 0x1e6   : > { %v5516_v26 = vpop.f32.mrf.mxu1  ;;  %2254 = vmatprep.subr.mxu1 %v7783_v23 }
 0x1e7   : > { %v6312_v15 = vadd.f32 %v5516_v26, %v6212_v46  ;;  %2255 = vmatpush1.msra.mxu1 %v6307_v16  ;;  %v6331_v26 = vadd.f32 %v6212_v46, %v1179_v25  ;;  %v6345_v25 = vadd.f32 %v6212_v46, %v1169_v29  ;;  %v6359_v29 = vadd.f32 %v6212_v46, %v1159_v31 }
 0x1e8   : > { %v1189_v37 = vpop.f32.mrf.mxu1  ;;  %2256 = vmatprep.subr.mxu1 %v7783_v23  ;;  %v6375_v31 = vadd.f32 %v6212_v46, %v6270_v35  ;;  %v1140_v35 = vadd.f32 %v6212_v46, %v6256_v17  ;;  %v1125_v17 = vadd.f32 %v6221_v57, %v6212_v46 }
 0x1e9   : > { %v6317_v20 = vadd.f32 %v6212_v46, %v1189_v37  ;;  %1356 = vrot.lane.b32.xlu0 %v6312_v15, %s5851_s21  ;;  %2257 = vmatpush2.msra.mxu1 %v6312_v15  ;;  %v1130_v37 = vadd.f32 %v6212_v46, %v6242_v7 }
 0x1ea   : > { %2258 = vmatprep.subr.mxu1 %v7783_v23 }
 0x1eb   : > { %1354 = vrot.lane.b32.xlu1 %v6317_v20, %s5851_s21  ;;  %2259 = vmatpush2.msra.mxu1 %v6317_v20 }
 0x1ec   : > { %2260 = vmatprep.subr.mxu1 %v7783_v23 }
 0x1ed   : > { %1324 = vrot.lane.b32.xlu0 %v6215_v52, %s5851_s21  ;;  %2261 = vmatpush2.msra.mxu1 %v6324_v24 }
 0x1ee   : > { %2262 = vmatprep.subr.mxu1 %v7783_v23 }
 0x1ef   : > { %1322 = vrot.lane.b32.xlu1 %v6218_v54, %s5851_s21  ;;  %2263 = vmatpush2.msra.mxu1 %v6331_v26 }
 0x1f0   : > { %2264 = vmatprep.subr.mxu1 %v7783_v23 }
 0x1f1   : > { %1352 = vrot.lane.b32.xlu0 %v6324_v24, %s5851_s21  ;;  %2265 = vmatpush2.msra.mxu1 %v6338_v30 }
 0x1f2   : > { %2266 = vmatprep.subr.mxu1 %v7783_v23 }
 0x1f3   : > { %1320 = vrot.lane.b32.xlu1 %v6225_v60, %s5851_s21  ;;  %2267 = vmatpush2.msra.mxu1 %v6345_v25 }
 0x1f4   : > { %2268 = vmatprep.subr.mxu1 %v7783_v23 }
 0x1f5   : > { %1350 = vrot.lane.b32.xlu0 %v6331_v26, %s5851_s21  ;;  %2269 = vmatpush2.msra.mxu1 %v6352_v32 }
 0x1f6   : > { %2270 = vmatprep.subr.mxu1 %v7783_v23 }
 0x1f7   : > { %1318 = vrot.lane.b32.xlu1 %v6232_v0, %s5851_s21  ;;  %2271 = vmatpush2.msra.mxu1 %v6359_v29 }
 0x1f8   : > { %2272 = vmatprep.subr.mxu1 %v7783_v23 }
 0x1f9   : > { %1348 = vrot.lane.b32.xlu0 %v6338_v30, %s5851_s21  ;;  %2273 = vmatpush2.msra.mxu1 %v6367_v36 }
 0x1fa   : > { %2274 = vmatprep.subr.mxu1 %v7783_v23 }
 0x1fb   : > { %1316 = vrot.lane.b32.xlu1 %v6239_v6, %s5851_s21  ;;  %2275 = vmatpush2.msra.mxu1 %v6375_v31 }
 0x1fc   : > { %2276 = vmatprep.subr.mxu1 %v7783_v23 }
 0x1fd   : > { %1346 = vrot.lane.b32.xlu0 %v6345_v25, %s5851_s21  ;;  %2277 = vmatpush2.msra.mxu1 %v6383_v38 }
 0x1fe   : > { %2278 = vmatprep.subr.mxu1 %v7783_v23 }
 0x1ff   : > { %1314 = vrot.lane.b32.xlu1 %v6246_v8, %s5851_s21  ;;  %2279 = vmatpush2.msra.mxu1 %v1140_v35 }
 0x200   : > { %2280 = vmatprep.subr.mxu1 %v7783_v23 }
 0x201   : > { %1344 = vrot.lane.b32.xlu0 %v6352_v32, %s5851_s21  ;;  %2281 = vmatpush2.msra.mxu1 %v1135_v11 }
 0x202   : > { %2282 = vmatprep.subr.mxu1 %v7783_v23 }
 0x203   : > { %1312 = vrot.lane.b32.xlu1 %v6253_v14, %s5851_s21  ;;  %2283 = vmatpush2.msra.mxu1 %v1130_v37 }
 0x204   : > { %2284 = vmatprep.subr.mxu1 %v7783_v23 }
 0x205   : > { %1342 = vrot.lane.b32.xlu0 %v6359_v29, %s5851_s21  ;;  %2285 = vmatpush2.msra.mxu1 %v1125_v17 }
 0x206   : > { %2286 = vmatprep.subr.mxu1 %v7783_v23 }
 0x207   : > { %1310 = vrot.lane.b32.xlu1 %v6260_v18, %s5851_s21  ;;  %2287 = vmatpush2.msra.mxu1 %v1120_v1 }
 0x209   : > { %1340 = vrot.lane.b32.xlu0 %v6367_v36, %s5851_s21 }
 0x20b   : > { %1308 = vrot.lane.b32.xlu1 %v6267_v39, %s5851_s21 }
 0x20d   : > { %1338 = vrot.lane.b32.xlu0 %v6375_v31, %s5851_s21 }
 0x20f   : > { %1306 = vrot.lane.b32.xlu1 %v6274_v42, %s5851_s21 }
 0x211   : > { %1336 = vrot.lane.b32.xlu0 %v6383_v38, %s5851_s21 }
 0x213   : > { %1304 = vrot.lane.b32.xlu1 %v6279_v45, %s5851_s21 }
 0x215   : > { %1334 = vrot.lane.b32.xlu0 %v1140_v35, %s5851_s21 }
 0x217   : > { %1302 = vrot.lane.b32.xlu1 %v6284_v47, %s5851_s21 }
 0x219   : > { %1332 = vrot.lane.b32.xlu0 %v1135_v11, %s5851_s21 }
 0x21b   : > { %1300 = vrot.lane.b32.xlu1 %v6289_v53, %s5851_s21 }
 0x21d   : > { %1330 = vrot.lane.b32.xlu0 %v1130_v37, %s5851_s21 }
 0x21f   : > { %1298 = vrot.lane.b32.xlu1 %v6295_v22, %s5851_s21 }
 0x221   : > { %1328 = vrot.lane.b32.xlu0 %v1125_v17, %s5851_s21 }
 0x223   : > { %1296 = vrot.lane.b32.xlu1 %v6301_v21, %s5851_s21 }
 0x225   : > { %1326 = vrot.lane.b32.xlu0 %v1120_v1, %s5851_s21 }
 0x227   : > { %1294 = vrot.lane.b32.xlu1 %v6307_v16, %s5851_s21 }
 0x229   : > { %1230 = vrot.lane.b32.xlu0 %v6307_v16, %s5852_s22 }
 0x22b   : > { %1232 = vrot.lane.b32.xlu1 %v6301_v21, %s5852_s22 }
 0x22d   : > { %1234 = vrot.lane.b32.xlu0 %v6295_v22, %s5852_s22 }
 0x22f   : > { %1236 = vrot.lane.b32.xlu1 %v6289_v53, %s5852_s22 }
 0x231   : > { %1238 = vrot.lane.b32.xlu0 %v6284_v47, %s5852_s22 }
 0x233   : > { %1240 = vrot.lane.b32.xlu1 %v6279_v45, %s5852_s22 }
 0x235   : > { %1242 = vrot.lane.b32.xlu0 %v6274_v42, %s5852_s22 }
 0x237   : > { %1244 = vrot.lane.b32.xlu1 %v6267_v39, %s5852_s22 }
 0x239   : > { %1246 = vrot.lane.b32.xlu0 %v6260_v18, %s5852_s22 }
 0x23b   : > { %1248 = vrot.lane.b32.xlu1 %v6253_v14, %s5852_s22 }
 0x23d   : > { %1250 = vrot.lane.b32.xlu0 %v6246_v8, %s5852_s22 }
 0x23f   : > { %1252 = vrot.lane.b32.xlu1 %v6239_v6, %s5852_s22 }
 0x241   : > { %1254 = vrot.lane.b32.xlu0 %v6232_v0, %s5852_s22 }
 0x243   : > { %1256 = vrot.lane.b32.xlu1 %v6225_v60, %s5852_s22 }
 0x245   : > { %1258 = vrot.lane.b32.xlu0 %v6218_v54, %s5852_s22 }
 0x247   : > { %1260 = vrot.lane.b32.xlu1 %v6215_v52, %s5852_s22 }
 0x249   : > { %1262 = vrot.lane.b32.xlu0 %v1120_v1, %s5852_s22 }
 0x24b   : > { %1264 = vrot.lane.b32.xlu1 %v1125_v17, %s5852_s22 }
 0x24d   : > { %1266 = vrot.lane.b32.xlu0 %v1130_v37, %s5852_s22 }
 0x24f   : > { %1268 = vrot.lane.b32.xlu1 %v1135_v11, %s5852_s22 }
 0x251   : > { %1270 = vrot.lane.b32.xlu0 %v1140_v35, %s5852_s22 }
 0x253   : > { %1272 = vrot.lane.b32.xlu1 %v6383_v38, %s5852_s22 }
 0x255   : > { %1274 = vrot.lane.b32.xlu0 %v6375_v31, %s5852_s22 }
 0x257   : > { %1276 = vrot.lane.b32.xlu1 %v6367_v36, %s5852_s22 }
 0x259   : > { %1278 = vrot.lane.b32.xlu0 %v6359_v29, %s5852_s22 }
 0x25b   : > { %v1357_v16 = vpop.permute.xlu0 %1356  ;;  %1280 = vrot.lane.b32.xlu1 %v6352_v32, %s5852_s22 }
 0x25c   : > { %5276 = vmatprep.subr.msk.mxu0 %vm1358_vm3, %v1357_v16 }
 0x25d   : > { %v1355_v21 = vpop.permute.xlu1 %1354  ;;  %1282 = vrot.lane.b32.xlu0 %v6345_v25, %s5852_s22 }
 0x25f   : > { %v1325_v22 = vpop.permute.xlu0 %1324  ;;  %1284 = vrot.lane.b32.xlu1 %v6338_v30, %s5852_s22 }
 0x260   : > { %5277 = vmatpush3.xpose.msk.msra.mxu0 %vm1358_vm3, %v1325_v22 }
 0x261   : > { %5278 = vmatprep.subr.msk.mxu0 %vm1358_vm3, %v1355_v21  ;;  %v1323_v46 = vpop.permute.xlu1 %1322  ;;  %1286 = vrot.lane.b32.xlu0 %v6331_v26, %s5852_s22 }
 0x263   : > { %v1353_v52 = vpop.permute.xlu0 %1352  ;;  %1288 = vrot.lane.b32.xlu1 %v6324_v24, %s5852_s22 }
 0x264   : > { %5279 = vmatpush3.xpose.msk.msra.mxu0 %vm1358_vm3, %v1323_v46 }
 0x265   : > { %5280 = vmatprep.subr.msk.mxu0 %vm1358_vm3, %v1353_v52  ;;  %v1321_v54 = vpop.permute.xlu1 %1320  ;;  %1290 = vrot.lane.b32.xlu0 %v6317_v20, %s5852_s22 }
 0x267   : > { %v1351_v57 = vpop.permute.xlu0 %1350  ;;  %1292 = vrot.lane.b32.xlu1 %v6312_v15, %s5852_s22 }
 0x268   : > { %5281 = vmatpush3.xpose.msk.msra.mxu0 %vm1358_vm3, %v1321_v54 }
 0x269   : > { %5282 = vmatprep.subr.msk.mxu0 %vm1358_vm3, %v1351_v57  ;;  %v1319_v60 = vpop.permute.xlu1 %1318 }
 0x26b   : > { %v1349_v63 = vpop.permute.xlu0 %1348 }
 0x26c   : > { %5283 = vmatpush3.xpose.msk.msra.mxu0 %vm1358_vm3, %v1319_v60 }
 0x26d   : > { %5284 = vmatprep.subr.msk.mxu0 %vm1358_vm3, %v1349_v63  ;;  %v1317_v0 = vpop.permute.xlu1 %1316 }
 0x26f   : > { %v1347_v6 = vpop.permute.xlu0 %1346 }
 0x270   : > { %5285 = vmatpush3.xpose.msk.msra.mxu0 %vm1358_vm3, %v1317_v0 }
 0x271   : > { %5286 = vmatprep.subr.msk.mxu0 %vm1358_vm3, %v1347_v6  ;;  %v1315_v20 = vpop.permute.xlu1 %1314 }
 0x273   : > { %v1345_v7 = vpop.permute.xlu0 %1344 }
 0x274   : > { %5287 = vmatpush3.xpose.msk.msra.mxu0 %vm1358_vm3, %v1315_v20 }
 0x275   : > { %5288 = vmatprep.subr.msk.mxu0 %vm1358_vm3, %v1345_v7  ;;  %v1313_v15 = vpop.permute.xlu1 %1312 }
 0x277   : > { %v1343_v8 = vpop.permute.xlu0 %1342 }
 0x278   : > { %5289 = vmatpush3.xpose.msk.msra.mxu0 %vm1358_vm3, %v1313_v15 }
 0x279   : > { %5290 = vmatprep.subr.msk.mxu0 %vm1358_vm3, %v1343_v8  ;;  %v1311_v14 = vpop.permute.xlu1 %1310 }
 0x27b   : > { %v1341_v18 = vpop.permute.xlu0 %1340 }
 0x27c   : > { %5291 = vmatpush3.xpose.msk.msra.mxu0 %vm1358_vm3, %v1311_v14 }
 0x27d   : > { %5292 = vmatprep.subr.msk.mxu0 %vm1358_vm3, %v1341_v18  ;;  %v1309_v39 = vpop.permute.xlu1 %1308 }
 0x27f   : > { %v1339_v42 = vpop.permute.xlu0 %1338 }
 0x280   : > { %5293 = vmatpush3.xpose.msk.msra.mxu0 %vm1358_vm3, %v1309_v39 }
 0x281   : > { %5294 = vmatprep.subr.msk.mxu0 %vm1358_vm3, %v1339_v42  ;;  %v1307_v45 = vpop.permute.xlu1 %1306 }
 0x283   : > { %v1337_v47 = vpop.permute.xlu0 %1336 }
 0x284   : > { %5295 = vmatpush3.xpose.msk.msra.mxu0 %vm1358_vm3, %v1307_v45 }
 0x285   : > { %5296 = vmatprep.subr.msk.mxu0 %vm1358_vm3, %v1337_v47  ;;  %v1305_v53 = vpop.permute.xlu1 %1304 }
 0x287   : > { %v1335_v24 = vpop.permute.xlu0 %1334 }
 0x288   : > { %5297 = vmatpush3.xpose.msk.msra.mxu0 %vm1358_vm3, %v1305_v53 }
 0x289   : > { %5298 = vmatprep.subr.msk.mxu0 %vm1358_vm3, %v1335_v24  ;;  %v1303_v26 = vpop.permute.xlu1 %1302 }
 0x28b   : > { %v1333_v30 = vpop.permute.xlu0 %1332 }
 0x28c   : > { %5299 = vmatpush3.xpose.msk.msra.mxu0 %vm1358_vm3, %v1303_v26 }
 0x28d   : > { %5300 = vmatprep.subr.msk.mxu0 %vm1358_vm3, %v1333_v30  ;;  %v1301_v25 = vpop.permute.xlu1 %1300 }
 0x28f   : > { %v1331_v32 = vpop.permute.xlu0 %1330 }
 0x290   : > { %5301 = vmatpush3.xpose.msk.msra.mxu0 %vm1358_vm3, %v1301_v25 }
 0x291   : > { %5302 = vmatprep.subr.msk.mxu0 %vm1358_vm3, %v1331_v32  ;;  %v1299_v29 = vpop.permute.xlu1 %1298 }
 0x293   : > { %v1329_v36 = vpop.permute.xlu0 %1328 }
 0x294   : > { %5303 = vmatpush3.xpose.msk.msra.mxu0 %vm1358_vm3, %v1299_v29 }
 0x295   : > { %5304 = vmatprep.subr.msk.mxu0 %vm1358_vm3, %v1329_v36  ;;  %v1297_v31 = vpop.permute.xlu1 %1296 }
 0x297   : > { %v1327_v38 = vpop.permute.xlu0 %1326 }
 0x298   : > { %5305 = vmatpush3.xpose.msk.msra.mxu0 %vm1358_vm3, %v1297_v31 }
 0x299   : > { %5306 = vmatprep.subr.msk.mxu0 %vm1358_vm3, %v1327_v38  ;;  %v1295_v35 = vpop.permute.xlu1 %1294 }
 0x29b   : > { %v1231_v11 = vpop.permute.xlu0 %1230 }
 0x29c   : > { %5307 = vmatpush3.xpose.msk.msra.mxu0 %vm1358_vm3, %v1295_v35  ;;  %5308 = vmatprep.mubr.msk.f32.mxu0 %vm1358_vm3, %v1231_v11 }
 0x29d   : > { %v1233_v37 = vpop.permute.xlu1 %1232 }
 0x29f   : > { %5309 = vmatmul.mubr.msk.f32.vlgmr.msra.gmra.mxu0 %vm1358_vm3, %v1231_v11  ;;  %v1235_v17 = vpop.permute.xlu0 %1234 }
 0x2a0   : > { %5310 = vmatprep.mubr.msk.f32.mxu0 %vm1358_vm3, %v1233_v37 }
 0x2a1   : > { %v1237_v1 = vpop.permute.xlu1 %1236 }
 0x2a3   : > { %5311 = vmatmul.mubr.msk.f32.gmra.mxu0 %vm1358_vm3, %v1233_v37  ;;  %v1239_v16 = vpop.permute.xlu0 %1238 }
 0x2a4   : > { %5312 = vmatprep.mubr.msk.f32.mxu0 %vm1358_vm3, %v1235_v17 }
 0x2a5   : > { %v1241_v21 = vpop.permute.xlu1 %1240 }
 0x2a7   : > { %5313 = vmatmul.mubr.msk.f32.gmra.mxu0 %vm1358_vm3, %v1235_v17  ;;  %v1243_v22 = vpop.permute.xlu0 %1242 }
 0x2a8   : > { %5314 = vmatprep.mubr.msk.f32.mxu0 %vm1358_vm3, %v1237_v1 }
 0x2a9   : > { %v1245_v46 = vpop.permute.xlu1 %1244 }
 0x2ab   : > { %5315 = vmatmul.mubr.msk.f32.gmra.mxu0 %vm1358_vm3, %v1237_v1  ;;  %v1247_v52 = vpop.permute.xlu0 %1246 }
 0x2ac   : > { %5316 = vmatprep.mubr.msk.f32.mxu0 %vm1358_vm3, %v1239_v16 }
 0x2ad   : > { %v1249_v54 = vpop.permute.xlu1 %1248 }
 0x2af   : > { %5317 = vmatmul.mubr.msk.f32.gmra.mxu0 %vm1358_vm3, %v1239_v16  ;;  %v1251_v57 = vpop.permute.xlu0 %1250 }
 0x2b0   : > { %5318 = vmatprep.mubr.msk.f32.mxu0 %vm1358_vm3, %v1241_v21 }
 0x2b1   : > { %v1253_v60 = vpop.permute.xlu1 %1252 }
 0x2b3   : > { %5319 = vmatmul.mubr.msk.f32.gmra.mxu0 %vm1358_vm3, %v1241_v21  ;;  %v1255_v63 = vpop.permute.xlu0 %1254 }
 0x2b4   : > { %5320 = vmatprep.mubr.msk.f32.mxu0 %vm1358_vm3, %v1243_v22 }
 0x2b5   : > { %v1257_v0 = vpop.permute.xlu1 %1256 }
 0x2b7   : > { %5321 = vmatmul.mubr.msk.f32.gmra.mxu0 %vm1358_vm3, %v1243_v22  ;;  %v1259_v6 = vpop.permute.xlu0 %1258 }
 0x2b8   : > { %5322 = vmatprep.mubr.msk.f32.mxu0 %vm1358_vm3, %v1245_v46 }
 0x2b9   : > { %v1261_v20 = vpop.permute.xlu1 %1260 }
 0x2bb   : > { %5323 = vmatmul.mubr.msk.f32.gmra.mxu0 %vm1358_vm3, %v1245_v46  ;;  %v1263_v7 = vpop.permute.xlu0 %1262 }
 0x2bc   : > { %5324 = vmatprep.mubr.msk.f32.mxu0 %vm1358_vm3, %v1247_v52 }
 0x2bd   : > { %v1265_v15 = vpop.permute.xlu1 %1264 }
 0x2bf   : > { %5325 = vmatmul.mubr.msk.f32.gmra.mxu0 %vm1358_vm3, %v1247_v52  ;;  %v1267_v8 = vpop.permute.xlu0 %1266 }
 0x2c0   : > { %5326 = vmatprep.mubr.msk.f32.mxu0 %vm1358_vm3, %v1249_v54 }
 0x2c1   : > { %v1269_v14 = vpop.permute.xlu1 %1268 }
 0x2c3   : > { %5327 = vmatmul.mubr.msk.f32.gmra.mxu0 %vm1358_vm3, %v1249_v54  ;;  %v1271_v18 = vpop.permute.xlu0 %1270 }
 0x2c4   : > { %5328 = vmatprep.mubr.msk.f32.mxu0 %vm1358_vm3, %v1251_v57 }
 0x2c5   : > { %v1273_v39 = vpop.permute.xlu1 %1272 }
 0x2c7   : > { %5329 = vmatmul.mubr.msk.f32.gmra.mxu0 %vm1358_vm3, %v1251_v57  ;;  %v1275_v42 = vpop.permute.xlu0 %1274 }
 0x2c8   : > { %5330 = vmatprep.mubr.msk.f32.mxu0 %vm1358_vm3, %v1253_v60 }
 0x2c9   : > { %v1277_v45 = vpop.permute.xlu1 %1276 }
 0x2cb   : > { %5331 = vmatmul.mubr.msk.f32.gmra.mxu0 %vm1358_vm3, %v1253_v60  ;;  %v1279_v47 = vpop.permute.xlu0 %1278 }
 0x2cc   : > { %5332 = vmatprep.mubr.msk.f32.mxu0 %vm1358_vm3, %v1255_v63 }
 0x2cd   : > { %v1281_v53 = vpop.permute.xlu1 %1280 }
 0x2cf   : > { %5333 = vmatmul.mubr.msk.f32.gmra.mxu0 %vm1358_vm3, %v1255_v63  ;;  %v1283_v24 = vpop.permute.xlu0 %1282 }
 0x2d0   : > { %5334 = vmatprep.mubr.msk.f32.mxu0 %vm1358_vm3, %v1257_v0 }
 0x2d1   : > { %v1285_v26 = vpop.permute.xlu1 %1284 }
 0x2d3   : > { %5335 = vmatmul.mubr.msk.f32.gmra.mxu0 %vm1358_vm3, %v1257_v0  ;;  %v1287_v30 = vpop.permute.xlu0 %1286 }
 0x2d4   : > { %5336 = vmatprep.mubr.msk.f32.mxu0 %vm1358_vm3, %v1259_v6 }
 0x2d5   : > { %v1289_v25 = vpop.permute.xlu1 %1288 }
 0x2d7   : > { %5337 = vmatmul.mubr.msk.f32.gmra.mxu0 %vm1358_vm3, %v1259_v6  ;;  %v1291_v32 = vpop.permute.xlu0 %1290 }
 0x2d8   : > { %5338 = vmatprep.mubr.msk.f32.mxu0 %vm1358_vm3, %v1261_v20 }
 0x2d9   : > { %v1293_v29 = vpop.permute.xlu1 %1292 }
 0x2db   : > { %5339 = vmatmul.mubr.msk.f32.gmra.mxu0 %vm1358_vm3, %v1261_v20 }
 0x2dc   : > { %5340 = vmatprep.mubr.msk.f32.mxu0 %vm1358_vm3, %v1263_v7 }
 0x2df   : > { %5341 = vmatmul.mubr.msk.f32.gmra.mxu0 %vm1358_vm3, %v1263_v7 }
 0x2e0   : > { %5342 = vmatprep.mubr.msk.f32.mxu0 %vm1358_vm3, %v1265_v15 }
 0x2e3   : > { %5343 = vmatmul.mubr.msk.f32.gmra.mxu0 %vm1358_vm3, %v1265_v15 }
 0x2e4   : > { %5344 = vmatprep.mubr.msk.f32.mxu0 %vm1358_vm3, %v1267_v8 }
 0x2e7   : > { %5345 = vmatmul.mubr.msk.f32.gmra.mxu0 %vm1358_vm3, %v1267_v8 }
 0x2e8   : > { %5346 = vmatprep.mubr.msk.f32.mxu0 %vm1358_vm3, %v1269_v14 }
 0x2eb   : > { %5347 = vmatmul.mubr.msk.f32.gmra.mxu0 %vm1358_vm3, %v1269_v14 }
 0x2ec   : > { %5348 = vmatprep.mubr.msk.f32.mxu0 %vm1358_vm3, %v1271_v18 }
 0x2ef   : > { %5349 = vmatmul.mubr.msk.f32.gmra.mxu0 %vm1358_vm3, %v1271_v18 }
 0x2f0   : > { %5350 = vmatprep.mubr.msk.f32.mxu0 %vm1358_vm3, %v1273_v39 }
 0x2f3   : > { %5351 = vmatmul.mubr.msk.f32.gmra.mxu0 %vm1358_vm3, %v1273_v39 }
 0x2f4   : > { %5352 = vmatprep.mubr.msk.f32.mxu0 %vm1358_vm3, %v1275_v42 }
 0x2f7   : > { %5353 = vmatmul.mubr.msk.f32.gmra.mxu0 %vm1358_vm3, %v1275_v42 }
 0x2f8   : > { %5354 = vmatprep.mubr.msk.f32.mxu0 %vm1358_vm3, %v1277_v45 }
 0x2fb   : > { %5355 = vmatmul.mubr.msk.f32.gmra.mxu0 %vm1358_vm3, %v1277_v45 }
 0x2fc   : > { %5356 = vmatprep.mubr.msk.f32.mxu0 %vm1358_vm3, %v1279_v47 }
 0x2ff   : > { %5357 = vmatmul.mubr.msk.f32.gmra.mxu0 %vm1358_vm3, %v1279_v47 }
 0x300   : > { %5358 = vmatprep.mubr.msk.f32.mxu0 %vm1358_vm3, %v1281_v53 }
 0x303   : > { %5359 = vmatmul.mubr.msk.f32.gmra.mxu0 %vm1358_vm3, %v1281_v53 }
 0x304   : > { %5360 = vmatprep.mubr.msk.f32.mxu0 %vm1358_vm3, %v1283_v24 }
 0x307   : > { %5361 = vmatmul.mubr.msk.f32.gmra.mxu0 %vm1358_vm3, %v1283_v24 }
 0x308   : > { %5362 = vmatprep.mubr.msk.f32.mxu0 %vm1358_vm3, %v1285_v26 }
 0x30b   : > { %5363 = vmatmul.mubr.msk.f32.gmra.mxu0 %vm1358_vm3, %v1285_v26 }
 0x30c   : > { %5364 = vmatprep.mubr.msk.f32.mxu0 %vm1358_vm3, %v1287_v30 }
 0x30f   : > { %5365 = vmatmul.mubr.msk.f32.gmra.mxu0 %vm1358_vm3, %v1287_v30 }
 0x310   : > { %5366 = vmatprep.mubr.msk.f32.mxu0 %vm1358_vm3, %v1289_v25 }
 0x313   : > { %5367 = vmatmul.mubr.msk.f32.gmra.mxu0 %vm1358_vm3, %v1289_v25 }
 0x314   : > { %5368 = vmatprep.mubr.msk.f32.mxu0 %vm1358_vm3, %v1291_v32 }
 0x317   : > { %5369 = vmatmul.mubr.msk.f32.gmra.mxu0 %vm1358_vm3, %v1291_v32 }
 0x318   : > { %5370 = vmatprep.mubr.msk.f32.mxu0 %vm1358_vm3, %v1293_v29 }
 0x31b   : > { %5371 = vmatmul.mubr.msk.f32.gmra.mxu0 %vm1358_vm3, %v1293_v29 }
 0x35f   : > { %v6599_v36 = vpop.f32.mrf.mxu0 }
 0x361   : > { %v6601_v31 = vpop.f32.mrf.mxu0 }
 0x362   : > { %v1744_v38 = vmax.f32 %v6599_v36, %v6601_v31 }
 0x363   : > { %v6605_v35 = vpop.f32.mrf.mxu0 }
 0x364   : > { %1745 = vmax.xlane.f32.xlu0 %v1744_v38 }
 0x365   : > { %v6607_v11 = vpop.f32.mrf.mxu0 }
 0x366   : > { %v1747_v37 = vmax.f32 %v6605_v35, %v6607_v11 }
 0x367   : > { %v6611_v17 = vpop.f32.mrf.mxu0 }
 0x368   : > { %1748 = vmax.xlane.f32.xlu1 %v1747_v37 }
 0x369   : > { %v6613_v1 = vpop.f32.mrf.mxu0 }
 0x36a   : > { %v1750_v16 = vmax.f32 %v6611_v17, %v6613_v1 }
 0x36b   : > { %v6617_v21 = vpop.f32.mrf.mxu0 }
 0x36c   : > { %1751 = vmax.xlane.f32.xlu0 %v1750_v16 }
 0x36d   : > { %v6619_v22 = vpop.f32.mrf.mxu0 }
 0x36e   : > { %v1753_v46 = vmax.f32 %v6617_v21, %v6619_v22 }
 0x36f   : > { %v6623_v52 = vpop.f32.mrf.mxu0 }
 0x370   : > { %1754 = vmax.xlane.f32.xlu0 %v1753_v46 }
 0x371   : > { %v6625_v54 = vpop.f32.mrf.mxu0 }
 0x372   : > { %v1756_v57 = vmax.f32 %v6623_v52, %v6625_v54 }
 0x373   : > { %v6629_v60 = vpop.f32.mrf.mxu0 }
 0x374   : > { %1757 = vmax.xlane.f32.xlu1 %v1756_v57 }
 0x375   : > { %v6631_v63 = vpop.f32.mrf.mxu0 }
 0x376   : > { %v1759_v0 = vmax.f32 %v6629_v60, %v6631_v63 }
 0x377   : > { %v6635_v6 = vpop.f32.mrf.mxu0 }
 0x378   : > { %1760 = vmax.xlane.f32.xlu0 %v1759_v0 }
 0x379   : > { %v6637_v20 = vpop.f32.mrf.mxu0 }
 0x37a   : > { %v1762_v7 = vmax.f32 %v6635_v6, %v6637_v20 }
 0x37b   : > { %v6641_v15 = vpop.f32.mrf.mxu0 }
 0x37c   : > { %1763 = vmax.xlane.f32.xlu1 %v1762_v7 }
 0x37d   : > { %v6643_v8 = vpop.f32.mrf.mxu0 }
 0x37e   : > { %v1765_v14 = vmax.f32 %v6641_v15, %v6643_v8 }
 0x37f   : > { %v6647_v18 = vpop.f32.mrf.mxu0 }
 0x380   : > { %1766 = vmax.xlane.f32.xlu0 %v1765_v14 }
 0x381   : > { %v6649_v39 = vpop.f32.mrf.mxu0 }
 0x382   : > { %v1768_v42 = vmax.f32 %v6647_v18, %v6649_v39 }
 0x383   : > { %v6653_v45 = vpop.f32.mrf.mxu0 }
 0x384   : > { %1769 = vmax.xlane.f32.xlu1 %v1768_v42 }
 0x385   : > { %v6655_v47 = vpop.f32.mrf.mxu0 }
 0x386   : > { %v1771_v53 = vmax.f32 %v6653_v45, %v6655_v47 }
 0x387   : > { %v6659_v24 = vpop.f32.mrf.mxu0 }
 0x388   : > { %1772 = vmax.xlane.f32.xlu0 %v1771_v53 }
 0x389   : > { %v6661_v26 = vpop.f32.mrf.mxu0 }
 0x38a   : > { %v1774_v30 = vmax.f32 %v6659_v24, %v6661_v26 }
 0x38b   : > { %v6665_v25 = vpop.f32.mrf.mxu0 }
 0x38c   : > { %1775 = vmax.xlane.f32.xlu1 %v1774_v30 }
 0x38d   : > { %v6667_v32 = vpop.f32.mrf.mxu0 }
 0x38e   : > { %v1777_v29 = vmax.f32 %v6665_v25, %v6667_v32 }
 0x38f   : > { %v6671_v38 = vpop.f32.mrf.mxu0 }
 0x390   : > { %1778 = vmax.xlane.f32.xlu0 %v1777_v29 }
 0x391   : > { %v6673_v37 = vpop.f32.mrf.mxu0 }
 0x392   : > { %v1780_v16 = vmax.f32 %v6671_v38, %v6673_v37 }
 0x393   : > { %v6677_v46 = vpop.f32.mrf.mxu0 }
 0x394   : > { %1781 = vmax.xlane.f32.xlu1 %v1780_v16 }
 0x395   : > { %v6679_v57 = vpop.f32.mrf.mxu0 }
 0x396   : > { %v1783_v0 = vmax.f32 %v6677_v46, %v6679_v57 }
 0x397   : > { %v6683_v7 = vpop.f32.mrf.mxu0 }
 0x398   : > { %1784 = vmax.xlane.f32.xlu0 %v1783_v0 }
 0x399   : > { %v6685_v14 = vpop.f32.mrf.mxu0 }
 0x39a   : > { %v1786_v42 = vmax.f32 %v6683_v7, %v6685_v14 }
 0x39b   : > { %v6689_v53 = vpop.f32.mrf.mxu0 }
 0x39c   : > { %1787 = vmax.xlane.f32.xlu1 %v1786_v42 }
 0x39d   : > { %v6691_v30 = vpop.f32.mrf.mxu0 }
 0x39e   : > { %v1789_v29 = vmax.f32 %v6689_v53, %v6691_v30 }
 0x39f   : > { %v6695_v16 = vpop.f32.mrf.mxu0 }
 0x3a0   : > { %1790 = vmax.xlane.f32.xlu0 %v1789_v29 }
 0x3a1   : > { %v6697_v23 = vpop.f32.mrf.mxu0 }
 0x3a2   : > { %v1792_v0 = vmax.f32 %v6695_v16, %v6697_v23 }
 0x3a3   : > { %v6701_v19 = vpop.f32.mrf.mxu0 }
 0x3a4   : > { %1793 = vmax.xlane.f32.xlu1 %v1792_v0 }
 0x3a5   : > { %v6703_v10 = vpop.f32.mrf.mxu0 }
 0x3a6   : > { %v1795_v42 = vmax.f32 %v6701_v19, %v6703_v10 }
 0x3a7   : > { %v6707_v9 = vpop.f32.mrf.mxu0 }
 0x3a8   : > { %1796 = vmax.xlane.f32.xlu0 %v1795_v42 }
 0x3a9   : > { %v6709_v13 = vpop.f32.mrf.mxu0 }
 0x3aa   : > { %v1798_v29 = vmax.f32 %v6707_v9, %v6709_v13 }
 0x3ab   : > { %v6713_v12 = vpop.f32.mrf.mxu0 }
 0x3ac   : > { %1799 = vmax.xlane.f32.xlu1 %v1798_v29 }
 0x3ad   : > { %v6715_v4 = vpop.f32.mrf.mxu0 }
 0x3ae   : > { %v1801_v0 = vmax.f32 %v6713_v12, %v6715_v4 }
 0x3af   : > { %v6719_v3 = vpop.f32.mrf.mxu0 }
 0x3b0   : > { %1802 = vmax.xlane.f32.xlu0 %v1801_v0 }
 0x3b1   : > { %v6721_v5 = vpop.f32.mrf.mxu0 }
 0x3b2   : > { %v1804_v42 = vmax.f32 %v6719_v3, %v6721_v5 }
 0x3b3   : > { %v6725_v2 = vpop.f32.mrf.mxu0 }
 0x3b4   : > { %1805 = vmax.xlane.f32.xlu1 %v1804_v42 }
 0x3b5   : > { %v6727_v62 = vpop.f32.mrf.mxu0 }
 0x3b6   : > { %v1807_v29 = vmax.f32 %v6725_v2, %v6727_v62 }
 0x3b7   : > { %v6731_v61 = vpop.f32.mrf.mxu0 }
 0x3b8   : > { %1808 = vmax.xlane.f32.xlu0 %v1807_v29 }
 0x3b9   : > { %v6733_v59 = vpop.f32.mrf.mxu0 }
 0x3ba   : > { %v1810_v0 = vmax.f32 %v6731_v61, %v6733_v59 }
 0x3bb   : > { %v6737_v58 = vpop.f32.mrf.mxu0 }
 0x3bc   : > { %1811 = vmax.xlane.f32.xlu1 %v1810_v0 }
 0x3bd   : > { %v6739_v56 = vpop.f32.mrf.mxu0 }
 0x3be   : > { %v1813_v42 = vmax.f32 %v6737_v58, %v6739_v56 }
 0x3bf   : > { %v6743_v55 = vpop.f32.mrf.mxu0 }
 0x3c0   : > { %1814 = vmax.xlane.f32.xlu1 %v1813_v42 }
 0x3c1   : > { %v6745_v51 = vpop.f32.mrf.mxu0 }
 0x3c2   : > { %v1816_v29 = vmax.f32 %v6743_v55, %v6745_v51 }
 0x3c3   : > { %v6749_v48 = vpop.f32.mrf.mxu0 }
 0x3c4   : > { %7902 = vst [vmem:[#allocation37_spill] sm:$0xff] %v6749_v48  ;;  %1817 = vmax.xlane.f32.xlu1 %v1816_v29 }
 0x3c5   : > { %v6751_v50 = vpop.f32.mrf.mxu0 }
 0x3c6   : > { %7903 = vst [vmem:[#allocation38_spill] sm:$0xff] %v6751_v50  ;;  %v1819_v0 = vmax.f32 %v6749_v48, %v6751_v50 }
 0x3c7   : > { %v6755_v49 = vpop.f32.mrf.mxu0 }
 0x3c8   : > { %7904 = vst [vmem:[#allocation39_spill] sm:$0xff] %v6755_v49  ;;  %1820 = vmax.xlane.f32.xlu1 %v1819_v0 }
 0x3c9   : > { %v6757_v41 = vpop.f32.mrf.mxu0 }
 0x3ca   : > { %7905 = vst [vmem:[#allocation40_spill] sm:$0xff] %v6757_v41  ;;  %v1822_v42 = vmax.f32 %v6755_v49, %v6757_v41 }
 0x3cb   : > { %v6761_v40 = vpop.f32.mrf.mxu0 }
 0x3cc   : > { %7906 = vst [vmem:[#allocation41_spill] sm:$0xff] %v6761_v40  ;;  %1823 = vmax.xlane.f32.xlu1 %v1822_v42 }
 0x3cd   : > { %v6763_v44 = vpop.f32.mrf.mxu0 }
 0x3ce   : > { %7907 = vst [vmem:[#allocation42_spill] sm:$0xff] %v6763_v44  ;;  %v1825_v29 = vmax.f32 %v6761_v40, %v6763_v44 }
 0x3cf   : > { %v6767_v43 = vpop.f32.mrf.mxu0 }
 0x3d0   : > { %7908 = vst [vmem:[#allocation43_spill] sm:$0xff] %v6767_v43  ;;  %1826 = vmax.xlane.f32.xlu1 %v1825_v29 }
 0x3d1   : > { %v6769_v34 = vpop.f32.mrf.mxu0 }
 0x3d2   : > { %7909 = vst [vmem:[#allocation44_spill] sm:$0xff] %v6769_v34  ;;  %v1828_v0 = vmax.f32 %v6767_v43, %v6769_v34 }
 0x3d3   : > { %v6773_v33 = vpop.f32.mrf.mxu0 }
 0x3d4   : > { %7910 = vst [vmem:[#allocation45_spill] sm:$0xff] %v6773_v33  ;;  %1829 = vmax.xlane.f32.xlu1 %v1828_v0 }
 0x3d5   : > { %v6775_v28 = vpop.f32.mrf.mxu0 }
 0x3d6   : > { %7911 = vst [vmem:[#allocation46_spill] sm:$0xff] %v6775_v28  ;;  %v1831_v42 = vmax.f32 %v6773_v33, %v6775_v28 }
 0x3d7   : > { %v6779_v27 = vpop.f32.mrf.mxu0 }
 0x3d8   : > { %7912 = vst [vmem:[#allocation47_spill] sm:$0xff] %v6779_v27  ;;  %1832 = vmax.xlane.f32.xlu1 %v1831_v42 }
 0x3d9   : > { %v6781_v44 = vpop.f32.mrf.mxu0 }
 0x3da   : > { %7913 = vst [vmem:[#allocation48_spill] sm:$0xff] %v6781_v44  ;;  %v1834_v29 = vmax.f32 %v6779_v27, %v6781_v44 }
 0x3db   : > { %v6785_v40 = vpop.f32.mrf.mxu0 }
 0x3dc   : > { %1835 = vmax.xlane.f32.xlu1 %v1834_v29 }
 0x3dd   : > { %v6787_v34 = vpop.f32.mrf.mxu0 }
 0x3de   : > { %7914 = vst [vmem:[#allocation49_spill] sm:$0xff] %v6787_v34  ;;  %v1837_v0 = vmax.f32 %v6785_v40, %v6787_v34 }
 0x3e0   : > { %1838 = vmax.xlane.f32.xlu1 %v1837_v0 }
 0x3ed   : > { %v1746_v43 = vpop.xlane.xlu0 %1745 }
 0x3ee   : > { %v1840_v28 = vsub.f32 %v6599_v36, %v1746_v43  ;;  %v1841_v33 = vsub.f32 %v6601_v31, %v1746_v43 }
 0x3f0   : > { %v1904_v42 = vmul.f32 1.442695, %v1840_v28  ;;  %v1906_v41 = vmul.f32 1.442695, %v1841_v33 }
 0x3f1   : > { %v1749_v49 = vpop.xlane.xlu1 %1748 }
 0x3f2   : > { %5611 = vpow2.f32 %v1904_v42  ;;  %v1842_v44 = vsub.f32 %v6605_v35, %v1749_v49  ;;  %v1843_v27 = vsub.f32 %v6607_v11, %v1749_v49 }
 0x3f3   : > { %5613 = vpow2.f32 %v1906_v41 }
 0x3f4   : > { %v1908_v29 = vmul.f32 1.442695, %v1842_v44  ;;  %v1910_v50 = vmul.f32 1.442695, %v1843_v27 }
 0x3f5   : > { %v1752_v48 = vpop.xlane.xlu0 %1751 }
 0x3f6   : > { %5615 = vpow2.f32 %v1908_v29  ;;  %v1844_v0 = vsub.f32 %v6611_v17, %v1752_v48  ;;  %v1845_v34 = vsub.f32 %v6613_v1, %v1752_v48 }
 0x3f7   : > { %5617 = vpow2.f32 %v1910_v50 }
 0x3f8   : > { %v1912_v36 = vmul.f32 1.442695, %v1844_v0  ;;  %v1914_v43 = vmul.f32 1.442695, %v1845_v34 }
 0x3f9   : > { %v1755_v28 = vpop.xlane.xlu0 %1754 }
 0x3fa   : > { %5619 = vpow2.f32 %v1912_v36  ;;  %v1846_v33 = vsub.f32 %v6617_v21, %v1755_v28  ;;  %v1847_v31 = vsub.f32 %v6619_v22, %v1755_v28 }
 0x3fb   : > { %5621 = vpow2.f32 %v1914_v43 }
 0x3fc   : > { %v1916_v49 = vmul.f32 1.442695, %v1846_v33  ;;  %v1918_v41 = vmul.f32 1.442695, %v1847_v31 }
 0x3fd   : > { %v1758_v44 = vpop.xlane.xlu1 %1757 }
 0x3fe   : > { %5623 = vpow2.f32 %v1916_v49  ;;  %v1848_v27 = vsub.f32 %v6623_v52, %v1758_v44  ;;  %v1849_v35 = vsub.f32 %v6625_v54, %v1758_v44 }
 0x3ff   : > { %v6801_v11 = vpop.eup %5611  ;;  %5625 = vpow2.f32 %v1918_v41 }
 0x400   : > { %v6803_v50 = vpop.eup %5613  ;;  %v1920_v34 = vmul.f32 1.442695, %v1848_v27  ;;  %v1922_v48 = vmul.f32 1.442695, %v1849_v35 }
 0x401   : > { %v1761_v17 = vpop.xlane.xlu0 %1760  ;;  %v2032_v1 = vadd.f32 %v6803_v50, %v6801_v11 }
 0x402   : > { %5627 = vpow2.f32 %v1920_v34  ;;  %v1850_v21 = vsub.f32 %v6629_v60, %v1761_v17  ;;  %v1851_v22 = vsub.f32 %v6631_v63, %v1761_v17 }
 0x403   : > { %v6809_v42 = vpop.eup %5615  ;;  %5629 = vpow2.f32 %v1922_v48  ;;  %2033 = vadd.xlane.f32.xlu0 %v2032_v1 }
 0x404   : > { %v6811_v52 = vpop.eup %5617  ;;  %v1924_v54 = vmul.f32 1.442695, %v1850_v21  ;;  %v1926_v29 = vmul.f32 1.442695, %v1851_v22 }
 0x405   : > { %v1764_v0 = vpop.xlane.xlu1 %1763  ;;  %v2035_v36 = vadd.f32 %v6811_v52, %v6809_v42 }
 0x406   : > { %5631 = vpow2.f32 %v1924_v54  ;;  %v1852_v43 = vsub.f32 %v6635_v6, %v1764_v0  ;;  %v1853_v28 = vsub.f32 %v6637_v20, %v1764_v0 }
 0x407   : > { %v6817_v60 = vpop.eup %5619  ;;  %5633 = vpow2.f32 %v1926_v29  ;;  %2036 = vadd.xlane.f32.xlu0 %v2035_v36 }
 0x408   : > { %v6819_v63 = vpop.eup %5621  ;;  %v1928_v33 = vmul.f32 1.442695, %v1852_v43  ;;  %v1930_v31 = vmul.f32 1.442695, %v1853_v28 }
 0x409   : > { %v1767_v49 = vpop.xlane.xlu0 %1766  ;;  %v2038_v41 = vadd.f32 %v6819_v63, %v6817_v60 }
 0x40a   : > { %5635 = vpow2.f32 %v1928_v33  ;;  %v1854_v44 = vsub.f32 %v6641_v15, %v1767_v49  ;;  %v1855_v27 = vsub.f32 %v6643_v8, %v1767_v49 }
 0x40b   : > { %v6825_v6 = vpop.eup %5623  ;;  %5637 = vpow2.f32 %v1930_v31  ;;  %2039 = vadd.xlane.f32.xlu0 %v2038_v41 }
 0x40c   : > { %v6827_v20 = vpop.eup %5625  ;;  %v1932_v35 = vmul.f32 1.442695, %v1854_v44  ;;  %v1934_v34 = vmul.f32 1.442695, %v1855_v27 }
 0x40d   : > { %v1770_v48 = vpop.xlane.xlu1 %1769  ;;  %v2041_v17 = vadd.f32 %v6827_v20, %v6825_v6 }
 0x40e   : > { %5639 = vpow2.f32 %v1932_v35  ;;  %v1856_v1 = vsub.f32 %v6647_v18, %v1770_v48  ;;  %v1857_v21 = vsub.f32 %v6649_v39, %v1770_v48 }
 0x40f   : > { %v6833_v15 = vpop.eup %5627  ;;  %5641 = vpow2.f32 %v1934_v34  ;;  %2042 = vadd.xlane.f32.xlu0 %v2041_v17 }
 0x410   : > { %v6835_v8 = vpop.eup %5629  ;;  %v1936_v22 = vmul.f32 1.442695, %v1856_v1  ;;  %v1938_v54 = vmul.f32 1.442695, %v1857_v21 }
 0x411   : > { %v1773_v29 = vpop.xlane.xlu0 %1772  ;;  %v2044_v0 = vadd.f32 %v6835_v8, %v6833_v15 }
 0x412   : > { %5643 = vpow2.f32 %v1936_v22  ;;  %v1858_v36 = vsub.f32 %v6653_v45, %v1773_v29  ;;  %v1859_v43 = vsub.f32 %v6655_v47, %v1773_v29 }
 0x413   : > { %v6841_v18 = vpop.eup %5631  ;;  %5645 = vpow2.f32 %v1938_v54  ;;  %2045 = vadd.xlane.f32.xlu0 %v2044_v0 }
 0x414   : > { %v6843_v39 = vpop.eup %5633  ;;  %v1940_v28 = vmul.f32 1.442695, %v1858_v36  ;;  %v1942_v33 = vmul.f32 1.442695, %v1859_v43 }
 0x415   : > { %v1776_v31 = vpop.xlane.xlu1 %1775  ;;  %v2047_v49 = vadd.f32 %v6843_v39, %v6841_v18 }
 0x416   : > { %5647 = vpow2.f32 %v1940_v28  ;;  %v1860_v41 = vsub.f32 %v6659_v24, %v1776_v31  ;;  %v1861_v44 = vsub.f32 %v6661_v26, %v1776_v31 }
 0x417   : > { %v6849_v45 = vpop.eup %5635  ;;  %5649 = vpow2.f32 %v1942_v33  ;;  %2048 = vadd.xlane.f32.xlu0 %v2047_v49 }
 0x418   : > { %v6851_v47 = vpop.eup %5637  ;;  %v1944_v27 = vmul.f32 1.442695, %v1860_v41  ;;  %v1946_v35 = vmul.f32 1.442695, %v1861_v44 }
 0x419   : > { %v1779_v34 = vpop.xlane.xlu0 %1778  ;;  %v2050_v48 = vadd.f32 %v6851_v47, %v6849_v45 }
 0x41a   : > { %5651 = vpow2.f32 %v1944_v27  ;;  %v1862_v17 = vsub.f32 %v6665_v25, %v1779_v34  ;;  %v1863_v1 = vsub.f32 %v6667_v32, %v1779_v34 }
 0x41b   : > { %v6857_v24 = vpop.eup %5639  ;;  %5653 = vpow2.f32 %v1946_v35  ;;  %2051 = vadd.xlane.f32.xlu0 %v2050_v48 }
 0x41c   : > { %v6859_v26 = vpop.eup %5641  ;;  %v1948_v21 = vmul.f32 1.442695, %v1862_v17  ;;  %v1950_v22 = vmul.f32 1.442695, %v1863_v1 }
 0x41d   : > { %v1782_v54 = vpop.xlane.xlu1 %1781  ;;  %v2053_v29 = vadd.f32 %v6859_v26, %v6857_v24 }
 0x41e   : > { %5655 = vpow2.f32 %v1948_v21  ;;  %v1864_v0 = vsub.f32 %v6671_v38, %v1782_v54  ;;  %v1865_v36 = vsub.f32 %v6673_v37, %v1782_v54 }
 0x41f   : > { %v6865_v25 = vpop.eup %5643  ;;  %5657 = vpow2.f32 %v1950_v22  ;;  %2054 = vadd.xlane.f32.xlu0 %v2053_v29 }
 0x420   : > { %v6867_v32 = vpop.eup %5645  ;;  %v1952_v43 = vmul.f32 1.442695, %v1864_v0  ;;  %v1954_v28 = vmul.f32 1.442695, %v1865_v36 }
 0x421   : > { %v1785_v33 = vpop.xlane.xlu0 %1784  ;;  %v2056_v31 = vadd.f32 %v6867_v32, %v6865_v25 }
 0x422   : > { %5659 = vpow2.f32 %v1952_v43  ;;  %v1866_v49 = vsub.f32 %v6677_v46, %v1785_v33  ;;  %v1867_v41 = vsub.f32 %v6679_v57, %v1785_v33 }
 0x423   : > { %v6873_v38 = vpop.eup %5647  ;;  %5661 = vpow2.f32 %v1954_v28  ;;  %2057 = vadd.xlane.f32.xlu0 %v2056_v31 }
 0x424   : > { %v6875_v37 = vpop.eup %5649  ;;  %v1956_v44 = vmul.f32 1.442695, %v1866_v49  ;;  %v1958_v27 = vmul.f32 1.442695, %v1867_v41 }
 0x425   : > { %v1788_v35 = vpop.xlane.xlu1 %1787  ;;  %v2059_v34 = vadd.f32 %v6875_v37, %v6873_v38 }
 0x426   : > { %5663 = vpow2.f32 %v1956_v44  ;;  %v1868_v48 = vsub.f32 %v6683_v7, %v1788_v35  ;;  %v1869_v17 = vsub.f32 %v6685_v14, %v1788_v35 }
 0x427   : > { %v6881_v46 = vpop.eup %5651  ;;  %5665 = vpow2.f32 %v1958_v27  ;;  %2060 = vadd.xlane.f32.xlu0 %v2059_v34 }
 0x428   : > { %v6883_v57 = vpop.eup %5653  ;;  %v1960_v1 = vmul.f32 1.442695, %v1868_v48  ;;  %v1962_v21 = vmul.f32 1.442695, %v1869_v17 }
 0x429   : > { %v1791_v22 = vpop.xlane.xlu0 %1790  ;;  %v2062_v54 = vadd.f32 %v6883_v57, %v6881_v46 }
 0x42a   : > { %5667 = vpow2.f32 %v1960_v1  ;;  %v1870_v29 = vsub.f32 %v6689_v53, %v1791_v22  ;;  %v1871_v0 = vsub.f32 %v6691_v30, %v1791_v22 }
 0x42b   : > { %v6889_v7 = vpop.eup %5655  ;;  %5669 = vpow2.f32 %v1962_v21  ;;  %2063 = vadd.xlane.f32.xlu1 %v2062_v54 }
 0x42c   : > { %v6891_v14 = vpop.eup %5657  ;;  %v1964_v36 = vmul.f32 1.442695, %v1870_v29  ;;  %v1966_v43 = vmul.f32 1.442695, %v1871_v0 }
 0x42d   : > { %v1794_v28 = vpop.xlane.xlu1 %1793  ;;  %v2065_v33 = vadd.f32 %v6891_v14, %v6889_v7 }
 0x42e   : > { %5671 = vpow2.f32 %v1964_v36  ;;  %v1872_v31 = vsub.f32 %v6695_v16, %v1794_v28  ;;  %v1873_v49 = vsub.f32 %v6697_v23, %v1794_v28 }
 0x42f   : > { %v6897_v53 = vpop.eup %5659  ;;  %5673 = vpow2.f32 %v1966_v43  ;;  %2066 = vadd.xlane.f32.xlu0 %v2065_v33 }
 0x430   : > { %v6899_v30 = vpop.eup %5661  ;;  %v1968_v41 = vmul.f32 1.442695, %v1872_v31  ;;  %v1970_v44 = vmul.f32 1.442695, %v1873_v49 }
 0x431   : > { %v1797_v27 = vpop.xlane.xlu0 %1796  ;;  %v2068_v35 = vadd.f32 %v6899_v30, %v6897_v53 }
 0x432   : > { %5675 = vpow2.f32 %v1968_v41  ;;  %v1874_v34 = vsub.f32 %v6701_v19, %v1797_v27  ;;  %v1875_v48 = vsub.f32 %v6703_v10, %v1797_v27 }
 0x433   : > { %v6905_v16 = vpop.eup %5663  ;;  %5677 = vpow2.f32 %v1970_v44  ;;  %2069 = vadd.xlane.f32.xlu1 %v2068_v35 }
 0x434   : > { %v6907_v23 = vpop.eup %5665  ;;  %v1972_v17 = vmul.f32 1.442695, %v1874_v34  ;;  %v1974_v1 = vmul.f32 1.442695, %v1875_v48 }
 0x435   : > { %v1800_v21 = vpop.xlane.xlu1 %1799  ;;  %v2071_v22 = vadd.f32 %v6907_v23, %v6905_v16 }
 0x436   : > { %5679 = vpow2.f32 %v1972_v17  ;;  %v1876_v54 = vsub.f32 %v6707_v9, %v1800_v21  ;;  %v1877_v29 = vsub.f32 %v6709_v13, %v1800_v21 }
 0x437   : > { %v6913_v19 = vpop.eup %5667  ;;  %5681 = vpow2.f32 %v1974_v1  ;;  %2072 = vadd.xlane.f32.xlu0 %v2071_v22 }
 0x438   : > { %v6915_v10 = vpop.eup %5669  ;;  %v1976_v0 = vmul.f32 1.442695, %v1876_v54  ;;  %v1978_v36 = vmul.f32 1.442695, %v1877_v29 }
 0x439   : > { %v1803_v43 = vpop.xlane.xlu0 %1802  ;;  %v2074_v28 = vadd.f32 %v6915_v10, %v6913_v19 }
 0x43a   : > { %5683 = vpow2.f32 %v1976_v0  ;;  %v1878_v33 = vsub.f32 %v6713_v12, %v1803_v43  ;;  %v1879_v31 = vsub.f32 %v6715_v4, %v1803_v43 }
 0x43b   : > { %v6921_v9 = vpop.eup %5671  ;;  %5685 = vpow2.f32 %v1978_v36  ;;  %2075 = vadd.xlane.f32.xlu1 %v2074_v28 }
 0x43c   : > { %v6923_v13 = vpop.eup %5673  ;;  %v1980_v49 = vmul.f32 1.442695, %v1878_v33  ;;  %v1982_v41 = vmul.f32 1.442695, %v1879_v31 }
 0x43d   : > { %v1806_v44 = vpop.xlane.xlu1 %1805  ;;  %v2077_v27 = vadd.f32 %v6923_v13, %v6921_v9 }
 0x43e   : > { %5687 = vpow2.f32 %v1980_v49  ;;  %v1880_v35 = vsub.f32 %v6719_v3, %v1806_v44  ;;  %v1881_v34 = vsub.f32 %v6721_v5, %v1806_v44 }
 0x43f   : > { %v6929_v12 = vpop.eup %5675  ;;  %5689 = vpow2.f32 %v1982_v41  ;;  %2078 = vadd.xlane.f32.xlu0 %v2077_v27 }
 0x440   : > { %v6931_v4 = vpop.eup %5677  ;;  %v1984_v48 = vmul.f32 1.442695, %v1880_v35  ;;  %v1986_v17 = vmul.f32 1.442695, %v1881_v34 }
 0x441   : > { %v1809_v1 = vpop.xlane.xlu0 %1808  ;;  %v2080_v21 = vadd.f32 %v6931_v4, %v6929_v12 }
 0x442   : > { %5691 = vpow2.f32 %v1984_v48  ;;  %v1882_v22 = vsub.f32 %v6725_v2, %v1809_v1  ;;  %v1883_v54 = vsub.f32 %v6727_v62, %v1809_v1 }
 0x443   : > { %v6937_v3 = vpop.eup %5679  ;;  %5693 = vpow2.f32 %v1986_v17  ;;  %2081 = vadd.xlane.f32.xlu1 %v2080_v21 }
 0x444   : > { %v6939_v5 = vpop.eup %5681  ;;  %v1988_v29 = vmul.f32 1.442695, %v1882_v22  ;;  %v1990_v0 = vmul.f32 1.442695, %v1883_v54 }
 0x445   : > { %v1812_v36 = vpop.xlane.xlu1 %1811  ;;  %v2083_v43 = vadd.f32 %v6939_v5, %v6937_v3 }
 0x446   : > { %5695 = vpow2.f32 %v1988_v29  ;;  %v1884_v28 = vsub.f32 %v6731_v61, %v1812_v36  ;;  %v1885_v33 = vsub.f32 %v6733_v59, %v1812_v36 }
 0x447   : > { %v6945_v2 = vpop.eup %5683  ;;  %5697 = vpow2.f32 %v1990_v0  ;;  %2084 = vadd.xlane.f32.xlu0 %v2083_v43  ;;  %v7915_v43 = vld [vmem:[#allocation37_spill] sm:$0xff] }
 0x448   : > { %v6947_v62 = vpop.eup %5685  ;;  %v1992_v31 = vmul.f32 1.442695, %v1884_v28  ;;  %v1994_v49 = vmul.f32 1.442695, %v1885_v33  ;;  %v7916_v33 = vld [vmem:[#allocation38_spill] sm:$0xff] }
 0x449   : > { %v1815_v41 = vpop.xlane.xlu1 %1814  ;;  %v2086_v44 = vadd.f32 %v6947_v62, %v6945_v2 }
 0x44a   : > { %5699 = vpow2.f32 %v1992_v31  ;;  %v1886_v27 = vsub.f32 %v6737_v58, %v1815_v41  ;;  %v1887_v35 = vsub.f32 %v6739_v56, %v1815_v41 }
 0x44b   : > { %v6953_v61 = vpop.eup %5687  ;;  %5701 = vpow2.f32 %v1994_v49  ;;  %2087 = vadd.xlane.f32.xlu1 %v2086_v44 }
 0x44c   : > { %v6955_v59 = vpop.eup %5689  ;;  %v1996_v34 = vmul.f32 1.442695, %v1886_v27  ;;  %v1998_v48 = vmul.f32 1.442695, %v1887_v35  ;;  %v7917_v35 = vld [vmem:[#allocation39_spill] sm:$0xff] }
 0x44d   : > { %v1818_v17 = vpop.xlane.xlu1 %1817  ;;  %v2089_v1 = vadd.f32 %v6955_v59, %v6953_v61 }
 0x44e   : > { %5703 = vpow2.f32 %v1996_v34  ;;  %v1888_v21 = vsub.f32 %v6743_v55, %v1818_v17  ;;  %v1889_v22 = vsub.f32 %v6745_v51, %v1818_v17 }
 0x44f   : > { %v6961_v58 = vpop.eup %5691  ;;  %5705 = vpow2.f32 %v1998_v48  ;;  %2090 = vadd.xlane.f32.xlu0 %v2089_v1  ;;  %v7918_v48 = vld [vmem:[#allocation40_spill] sm:$0xff] }
 0x450   : > { %v6963_v56 = vpop.eup %5693  ;;  %v2000_v54 = vmul.f32 1.442695, %v1888_v21  ;;  %v2002_v29 = vmul.f32 1.442695, %v1889_v22 }
 0x451   : > { %v1821_v0 = vpop.xlane.xlu1 %1820  ;;  %v2092_v36 = vadd.f32 %v6963_v56, %v6961_v58 }
 0x452   : > { %5707 = vpow2.f32 %v2000_v54  ;;  %v1890_v28 = vsub.f32 %v7915_v43, %v1821_v0  ;;  %v1891_v31 = vsub.f32 %v7916_v33, %v1821_v0 }
 0x453   : > { %v6969_v55 = vpop.eup %5695  ;;  %5709 = vpow2.f32 %v2002_v29  ;;  %2093 = vadd.xlane.f32.xlu1 %v2092_v36  ;;  %v7919_v36 = vld [vmem:[#allocation41_spill] sm:$0xff] }
 0x454   : > { %v6971_v51 = vpop.eup %5697  ;;  %v2004_v49 = vmul.f32 1.442695, %v1890_v28  ;;  %v2006_v41 = vmul.f32 1.442695, %v1891_v31  ;;  %v7920_v28 = vld [vmem:[#allocation42_spill] sm:$0xff] }
 0x455   : > { %v1824_v44 = vpop.xlane.xlu1 %1823  ;;  %v2095_v27 = vadd.f32 %v6971_v51, %v6969_v55 }
 0x456   : > { %5711 = vpow2.f32 %v2004_v49  ;;  %v1892_v34 = vsub.f32 %v7917_v35, %v1824_v44  ;;  %v1893_v17 = vsub.f32 %v7918_v48, %v1824_v44 }
 0x457   : > { %v6977_v1 = vpop.eup %5699  ;;  %5713 = vpow2.f32 %v2006_v41  ;;  %2096 = vadd.xlane.f32.xlu0 %v2095_v27 }
 0x458   : > { %v6979_v21 = vpop.eup %5701  ;;  %v2008_v22 = vmul.f32 1.442695, %v1892_v34  ;;  %v2010_v54 = vmul.f32 1.442695, %v1893_v17  ;;  %v7923_v34 = vld [vmem:[#allocation43_spill] sm:$0xff]  ;;  %v7924_v17 = vld [vmem:[#allocation44_spill] sm:$0xff] }
 0x459   : > { %v1827_v29 = vpop.xlane.xlu1 %1826  ;;  %v2098_v0 = vadd.f32 %v6979_v21, %v6977_v1 }
 0x45a   : > { %5715 = vpow2.f32 %v2008_v22  ;;  %v1894_v43 = vsub.f32 %v7919_v36, %v1827_v29  ;;  %v1895_v33 = vsub.f32 %v7920_v28, %v1827_v29 }
 0x45b   : > { %v6985_v31 = vpop.eup %5703  ;;  %5717 = vpow2.f32 %v2010_v54  ;;  %2099 = vadd.xlane.f32.xlu1 %v2098_v0 }
 0x45c   : > { %7921 = vst [vmem:[#allocation37_spill] sm:$0xff] %v6985_v31  ;;  %v6987_v49 = vpop.eup %5705  ;;  %v2012_v41 = vmul.f32 1.442695, %v1894_v43  ;;  %v2014_v44 = vmul.f32 1.442695, %v1895_v33  ;;  %v7927_v33 = vld [vmem:[#allocation45_spill] sm:$0xff] }
 0x45d   : > { %7922 = vst [vmem:[#allocation38_spill] sm:$0xff] %v6987_v49  ;;  %v1830_v27 = vpop.xlane.xlu1 %1829  ;;  %v2101_v35 = vadd.f32 %v6987_v49, %v6985_v31 }
 0x45e   : > { %5719 = vpow2.f32 %v2012_v41  ;;  %v1896_v48 = vsub.f32 %v7923_v34, %v1830_v27  ;;  %v1897_v22 = vsub.f32 %v7924_v17, %v1830_v27  ;;  %v7928_v41 = vld [vmem:[#allocation46_spill] sm:$0xff] }
 0x45f   : > { %v6993_v36 = vpop.eup %5707  ;;  %5721 = vpow2.f32 %v2014_v44  ;;  %2102 = vadd.xlane.f32.xlu0 %v2101_v35 }
 0x460   : > { %7925 = vst [vmem:[#allocation39_spill] sm:$0xff] %v6993_v36  ;;  %v6995_v29 = vpop.eup %5709  ;;  %v2016_v54 = vmul.f32 1.442695, %v1896_v48  ;;  %v2018_v0 = vmul.f32 1.442695, %v1897_v22  ;;  %v7930_v22 = vld [vmem:[#allocation47_spill] sm:$0xff] }
 0x461   : > { %7926 = vst [vmem:[#allocation40_spill] sm:$0xff] %v6995_v29  ;;  %v1833_v28 = vpop.xlane.xlu1 %1832  ;;  %v2104_v43 = vadd.f32 %v6995_v29, %v6993_v36 }
 0x462   : > { %5723 = vpow2.f32 %v2016_v54  ;;  %v1898_v31 = vsub.f32 %v7927_v33, %v1833_v28  ;;  %v1899_v49 = vsub.f32 %v7928_v41, %v1833_v28  ;;  %v7931_v54 = vld [vmem:[#allocation48_spill] sm:$0xff] }
 0x463   : > { %v7001_v34 = vpop.eup %5711  ;;  %5725 = vpow2.f32 %v2018_v0  ;;  %2105 = vadd.xlane.f32.xlu1 %v2104_v43 }
 0x464   : > { %7929 = vst [vmem:[#allocation41_spill] sm:$0xff] %v7001_v34  ;;  %v7003_v27 = vpop.eup %5713  ;;  %v2020_v44 = vmul.f32 1.442695, %v1898_v31  ;;  %v2022_v35 = vmul.f32 1.442695, %v1899_v49 }
 0x465   : > { %v1836_v17 = vpop.xlane.xlu1 %1835  ;;  %v2107_v48 = vadd.f32 %v7003_v27, %v7001_v34 }
 0x466   : > { %5727 = vpow2.f32 %v2020_v44  ;;  %v1900_v36 = vsub.f32 %v7930_v22, %v1836_v17  ;;  %v1901_v29 = vsub.f32 %v7931_v54, %v1836_v17  ;;  %v7933_v44 = vld [vmem:[#allocation49_spill] sm:$0xff] }
 0x467   : > { %v7009_v33 = vpop.eup %5715  ;;  %5729 = vpow2.f32 %v2022_v35  ;;  %2108 = vadd.xlane.f32.xlu0 %v2107_v48 }
 0x468   : > { %7932 = vst [vmem:[#allocation42_spill] sm:$0xff] %v7009_v33  ;;  %v7011_v28 = vpop.eup %5717  ;;  %v2024_v0 = vmul.f32 1.442695, %v1900_v36  ;;  %v2026_v43 = vmul.f32 1.442695, %v1901_v29 }
 0x469   : > { %v1839_v41 = vpop.xlane.xlu1 %1838  ;;  %v2110_v31 = vadd.f32 %v7011_v28, %v7009_v33 }
 0x46a   : > { %5731 = vpow2.f32 %v2024_v0  ;;  %v1902_v49 = vsub.f32 %v6785_v40, %v1839_v41  ;;  %v1903_v34 = vsub.f32 %v7933_v44, %v1839_v41 }
 0x46b   : > { %v7017_v22 = vpop.eup %5719  ;;  %5733 = vpow2.f32 %v2026_v43  ;;  %2111 = vadd.xlane.f32.xlu1 %v2110_v31 }
 0x46c   : > { %7934 = vst [vmem:[#allocation43_spill] sm:$0xff] %v7017_v22  ;;  %v7019_v17 = vpop.eup %5721  ;;  %v2028_v35 = vmul.f32 1.442695, %v1902_v49  ;;  %v2030_v48 = vmul.f32 1.442695, %v1903_v34 }
 0x46d   : > { %7935 = vst [vmem:[#allocation44_spill] sm:$0xff] %v7019_v17  ;;  %v2113_v36 = vadd.f32 %v7019_v17, %v7017_v22  ;;  %v2832_v22 = vld [vmem:[#allocation2 + $0x160] sm:$0xff] }
 0x46e   : > { %5735 = vpow2.f32 %v2028_v35 }
 0x46f   : > { %v7023_v29 = vpop.eup %5723  ;;  %5737 = vpow2.f32 %v2030_v48  ;;  %2114 = vadd.xlane.f32.xlu0 %v2113_v36 }
 0x470   : > { %7936 = vst [vmem:[#allocation45_spill] sm:$0xff] %v7023_v29  ;;  %v7025_v54 = vpop.eup %5725 }
 0x471   : > { %7937 = vst [vmem:[#allocation46_spill] sm:$0xff] %v7025_v54  ;;  %v2116_v40 = vadd.f32 %v7025_v54, %v7023_v29 }
 0x473   : > { %v7029_v0 = vpop.eup %5727  ;;  %2117 = vadd.xlane.f32.xlu1 %v2116_v40 }
 0x474   : > { %7938 = vst [vmem:[#allocation47_spill] sm:$0xff] %v7029_v0  ;;  %v7031_v43 = vpop.eup %5729 }
 0x475   : > { %7939 = vst [vmem:[#allocation48_spill] sm:$0xff] %v7031_v43  ;;  %v2119_v34 = vadd.f32 %v7031_v43, %v7029_v0 }
 0x477   : > { %v7035_v41 = vpop.eup %5731  ;;  %2120 = vadd.xlane.f32.xlu0 %v2119_v34 }
 0x478   : > { %7940 = vst [vmem:[#allocation49_spill] sm:$0xff] %v7035_v41  ;;  %v7037_v31 = vpop.eup %5733 }
 0x479   : > { %7941 = vst [vmem:[#allocation50_spill] sm:$0xff] %v7037_v31  ;;  %v2122_v49 = vadd.f32 %v7037_v31, %v7035_v41  ;;  %v2450_v41 = vld [vmem:[%s7764_s5 + $0x8] sm:$0xff]  ;;  %v2848_v31 = vld [vmem:[#allocation2 + $0x1e0] sm:$0xff] }
 0x47a   : > { %5517 = vmatprep.subr.mxu0 %v2450_v41 }
 0x47b   : > { %v7041_v44 = vpop.eup %5735  ;;  %2123 = vadd.xlane.f32.xlu1 %v2122_v49  ;;  %v2844_v49 = vld [vmem:[#allocation2 + $0x1c0] sm:$0xff]  ;;  %5518 = vmatpush3.msra.mxu0 %v2450_v41 }
 0x47c   : > { %7942 = vst [vmem:[#allocation51_spill] sm:$0xff] %v7041_v44  ;;  %v7043_v35 = vpop.eup %5737  ;;  %v2820_v41 = vld [vmem:[#allocation2 + $0x100] sm:$0xff] }
 0x47d   : > { %7943 = vst [vmem:[#allocation52_spill] sm:$0xff] %v7043_v35  ;;  %v2125_v48 = vadd.f32 %v7043_v35, %v7041_v44  ;;  %v2836_v35 = vld [vmem:[#allocation2 + $0x180] sm:$0xff] }
 0x47f   : > { %2126 = vadd.xlane.f32.xlu0 %v2125_v48  ;;  %v5129_v48 = vcombine.low %v2844_v49, %v2848_v31 }
 0x48c   : > { %v2034_v36 = vpop.xlane.xlu0 %2033 }
 0x48d   : > { %5739 = vrcp.f32 %v2034_v36  ;;  %v5130_v36 = vcombine.high %v2844_v49, %v2848_v31  ;;  %v2824_v49 = vld [vmem:[#allocation2 + $0x120] sm:$0xff] }
 0x48f   : > { %3588 = vmatprep.subr.bf16.mxu1 %v5130_v36 }
 0x490   : > { %v2037_v40 = vpop.xlane.xlu0 %2036 }
 0x491   : > { %5741 = vrcp.f32 %v2037_v40  ;;  %v2840_v40 = vld [vmem:[#allocation2 + $0x1a0] sm:$0xff] }
 0x494   : > { %v2040_v0 = vpop.xlane.xlu0 %2039 }
 0x495   : > { %5743 = vrcp.f32 %v2040_v0  ;;  %v5122_v0 = vcombine.high %v2836_v35, %v2840_v40 }
 0x498   : > { %v2043_v34 = vpop.xlane.xlu0 %2042 }
 0x499   : > { %5745 = vrcp.f32 %v2043_v34  ;;  %v2828_v34 = vld [vmem:[#allocation2 + $0x140] sm:$0xff] }
 0x49a   : > { %v5740_v43 = vpop.eup %5739  ;;  %v5114_v31 = vcombine.high %v2828_v34, %v2832_v22 }
 0x49b   : > { %v2161_v29 = vmul.f32 %v5740_v43, %v6803_v50  ;;  %v2160_v44 = vmul.f32 %v5740_v43, %v6801_v11  ;;  %v5121_v11 = vcombine.low %v2836_v35, %v2840_v40  ;;  %v7944_v35 = vld [vmem:[#allocation21_spill] sm:$0xff] }
 0x49c   : > { %v2046_v54 = vpop.xlane.xlu0 %2045 }
 0x49d   : > { %5747 = vrcp.f32 %v2046_v54  ;;  %2288 = vmatprep.mubr.f32.mxu1 %v2161_v29 }
 0x49e   : > { %v5742_v17 = vpop.eup %5741  ;;  %2289 = vmatmul.mubr.f32.vlgmr.msra.gmra.mxu1 %v2160_v44  ;;  %v5113_v44 = vcombine.low %v2828_v34, %v2832_v22  ;;  %v7946_v22 = vld [vmem:[#allocation23_spill] sm:$0xff]  ;;  %v7947_v34 = vld [vmem:[#allocation24_spill] sm:$0xff] }
 0x49f   : > { %v2163_v33 = vmul.f32 %v5742_v17, %v6811_v52  ;;  %v2162_v50 = vmul.f32 %v5742_v17, %v6809_v42  ;;  %3589 = vmatpush1.bf16.msra.mxu1 %v5129_v48  ;;  %v5106_v42 = vcombine.high %v2820_v41, %v2824_v49  ;;  %v7945_v48 = vld [vmem:[#allocation22_spill] sm:$0xff] }
 0x4a0   : > { %v2049_v43 = vpop.xlane.xlu0 %2048  ;;  %3590 = vmatprep.subr.bf16.mxu1 %v5122_v0 }
 0x4a1   : > { %5749 = vrcp.f32 %v2049_v43  ;;  %2293 = vmatprep.mubr.f32.mxu1 %v2163_v33  ;;  %v2780_v33 = vpack.c.bf16 %v7945_v48, %v7944_v35  ;;  %v7948_v43 = vld [vmem:[#allocation5_spill] sm:$0xff] }
 0x4a2   : > { %v5744_v54 = vpop.eup %5743  ;;  %2294 = vmatmul.mubr.f32.gmra.mxu1 %v2162_v50 }
 0x4a3   : > { %v2165_v29 = vmul.f32 %v5744_v54, %v6819_v63  ;;  %v2164_v36 = vmul.f32 %v5744_v54, %v6817_v60  ;;  %3591 = vmatpush1.bf16.msra.mxu1 %v5121_v11  ;;  %v5105_v63 = vcombine.low %v2820_v41, %v2824_v49  ;;  %v2781_v11 = vpack.c.bf16 %v7947_v34, %v7946_v22  ;;  %v7950_v49 = vld [vmem:[#allocation25_spill] sm:$0xff] }
 0x4a4   : > { %v2052_v52 = vpop.xlane.xlu0 %2051  ;;  %3592 = vmatprep.subr.bf16.mxu1 %v5114_v31  ;;  %v7949_v31 = vld [vmem:[#allocation6_spill] sm:$0xff] }
 0x4a5   : > { %5751 = vrcp.f32 %v2052_v52  ;;  %2298 = vmatprep.mubr.f32.mxu1 %v2165_v29  ;;  %v2772_v54 = vpack.c.bf16 %v7949_v31, %v7948_v43  ;;  %v7952_v52 = vld [vmem:[#allocation7_spill] sm:$0xff] }
 0x4a6   : > { %v5746_v17 = vpop.eup %5745  ;;  %2299 = vmatmul.mubr.f32.gmra.mxu1 %v2164_v36  ;;  %v7951_v36 = vld [vmem:[#allocation26_spill] sm:$0xff] }
 0x4a7   : > { %v2167_v40 = vmul.f32 %v5746_v17, %v6827_v20  ;;  %v2166_v0 = vmul.f32 %v5746_v17, %v6825_v6  ;;  %3593 = vmatpush1.bf16.msra.mxu1 %v5113_v44  ;;  %v2782_v44 = vpack.c.bf16 %v7951_v36, %v7950_v49 }
 0x4a8   : > { %v2055_v50 = vpop.xlane.xlu0 %2054  ;;  %2932 = vxpose.xlu1.c.b16.start [1/8] (narrow) %v2780_v33, 32  ;;  %3594 = vmatprep.subr.bf16.mxu1 %v5106_v42  ;;  %v7953_v42 = vld [vmem:[#allocation8_spill] sm:$0xff] }
 0x4a9   : > { %5753 = vrcp.f32 %v2055_v50  ;;  %2303 = vmatprep.mubr.f32.mxu1 %v2167_v40  ;;  %v2773_v17 = vpack.c.bf16 %v7953_v42, %v7952_v52 }
 0x4aa   : > { %v5748_v60 = vpop.eup %5747  ;;  %2304 = vmatmul.mubr.f32.gmra.mxu1 %v2166_v0  ;;  %v7954_v0 = vld [vmem:[#allocation27_spill] sm:$0xff] }
 0x4ab   : > { %v2169_v29 = vmul.f32 %v5748_v60, %v6835_v8  ;;  %v2168_v20 = vmul.f32 %v5748_v60, %v6833_v15  ;;  %3595 = vmatpush1.bf16.msra.mxu1 %v5105_v63  ;;  %v7955_v63 = vld [vmem:[#allocation28_spill] sm:$0xff]  ;;  %v7956_v60 = vld [vmem:[#allocation9_spill] sm:$0xff] }
 0x4ac   : > { %v2058_v6 = vpop.xlane.xlu0 %2057  ;;  %2933 = vxpose.xlu1.c.b16.cont [2/8] (narrow) %v2781_v11, 32  ;;  %2916 = vxpose.xlu0.c.b16.start [1/8] (narrow) %v2772_v54, 32  ;;  %v2783_v50 = vpack.c.bf16 %v7955_v63, %v7954_v0  ;;  %v7957_v11 = vld [vmem:[#allocation10_spill] sm:$0xff] }
 0x4ad   : > { %5755 = vrcp.f32 %v2058_v6  ;;  %2308 = vmatprep.mubr.f32.mxu1 %v2169_v29  ;;  %v2774_v54 = vpack.c.bf16 %v7957_v11, %v7956_v60  ;;  %v7958_v6 = vld [vmem:[#allocation29_spill] sm:$0xff] }
 0x4ae   : > { %v5750_v41 = vpop.eup %5749  ;;  %2309 = vmatmul.mubr.f32.gmra.mxu1 %v2168_v20 }
 0x4af   : > { %v2171_v33 = vmul.f32 %v5750_v41, %v6843_v39  ;;  %v2170_v8 = vmul.f32 %v5750_v41, %v6841_v18  ;;  %v7959_v41 = vld [vmem:[#allocation30_spill] sm:$0xff] }
 0x4b0   : > { %v2061_v40 = vpop.xlane.xlu0 %2060  ;;  %2934 = vxpose.xlu1.c.b16.cont [3/8] (narrow) %v2782_v44, 32  ;;  %2917 = vxpose.xlu0.c.b16.cont [2/8] (narrow) %v2773_v17, 32  ;;  %v2784_v44 = vpack.c.bf16 %v7959_v41, %v7958_v6  ;;  %v7960_v17 = vld [vmem:[#allocation11_spill] sm:$0xff] }
 0x4b1   : > { %5757 = vrcp.f32 %v2061_v40  ;;  %2313 = vmatprep.mubr.f32.mxu1 %v2171_v33  ;;  %v7961_v33 = vld [vmem:[#allocation12_spill] sm:$0xff] }
 0x4b2   : > { %v5752_v15 = vpop.eup %5751  ;;  %2314 = vmatmul.mubr.f32.gmra.mxu1 %v2170_v8  ;;  %v2775_v8 = vpack.c.bf16 %v7961_v33, %v7960_v17 }
 0x4b3   : > { %v2173_v29 = vmul.f32 %v5752_v15, %v6851_v47  ;;  %v2172_v20 = vmul.f32 %v5752_v15, %v6849_v45  ;;  %v7962_v15 = vld [vmem:[#allocation31_spill] sm:$0xff] }
 0x4b4   : > { %2935 = vxpose.xlu1.c.b16.cont [4/8] (narrow) %v2783_v50, 32  ;;  %2918 = vxpose.xlu0.c.b16.cont [3/8] (narrow) %v2774_v54, 32  ;;  %v2064_v18 = vpop.xlane.xlu1 %2063  ;;  %v7963_v50 = vld [vmem:[#allocation32_spill] sm:$0xff] }
 0x4b5   : > { %5759 = vrcp.f32 %v2064_v18  ;;  %2318 = vmatprep.mubr.f32.mxu1 %v2173_v29  ;;  %v2785_v54 = vpack.c.bf16 %v7963_v50, %v7962_v15  ;;  %v7964_v29 = vld [vmem:[#allocation13_spill] sm:$0xff] }
 0x4b6   : > { %v5754_v39 = vpop.eup %5753  ;;  %2319 = vmatmul.mubr.f32.gmra.mxu1 %v2172_v20  ;;  %v7965_v20 = vld [vmem:[#allocation14_spill] sm:$0xff] }
 0x4b7   : > { %v2175_v40 = vmul.f32 %v5754_v39, %v6859_v26  ;;  %v2174_v11 = vmul.f32 %v5754_v39, %v6857_v24  ;;  %v2776_v18 = vpack.c.bf16 %v7965_v20, %v7964_v29  ;;  %v7966_v39 = vld [vmem:[#allocation33_spill] sm:$0xff] }
 0x4b8   : > { %v2067_v47 = vpop.xlane.xlu0 %2066  ;;  %2936 = vxpose.xlu1.c.b16.cont [5/8] (narrow) %v2784_v44, 32  ;;  %2919 = vxpose.xlu0.c.b16.cont [4/8] (narrow) %v2775_v8, 32  ;;  %v7967_v44 = vld [vmem:[#allocation34_spill] sm:$0xff]  ;;  %v7968_v8 = vld [vmem:[#allocation15_spill] sm:$0xff] }
 0x4b9   : > { %5761 = vrcp.f32 %v2067_v47  ;;  %2323 = vmatprep.mubr.f32.mxu1 %v2175_v40  ;;  %v7969_v40 = vld [vmem:[#allocation16_spill] sm:$0xff] }
 0x4ba   : > { %v5756_v45 = vpop.eup %5755  ;;  %2324 = vmatmul.mubr.f32.gmra.mxu1 %v2174_v11  ;;  %v2786_v11 = vpack.c.bf16 %v7967_v44, %v7966_v39  ;;  %v2777_v47 = vpack.c.bf16 %v7969_v40, %v7968_v8 }
 0x4bb   : > { %v2177_v60 = vmul.f32 %v5756_v45, %v6867_v32  ;;  %v2176_v33 = vmul.f32 %v5756_v45, %v6865_v25  ;;  %v7971_v45 = vld [vmem:[#allocation36_spill] sm:$0xff] }
 0x4bc   : > { %2937 = vxpose.xlu1.c.b16.cont [6/8] (narrow) %v2785_v54, 32  ;;  %2920 = vxpose.xlu0.c.b16.cont [5/8] (narrow) %v2776_v18, 32  ;;  %v2070_v24 = vpop.xlane.xlu1 %2069  ;;  %v7972_v54 = vld [vmem:[#allocation17_spill] sm:$0xff]  ;;  %v7973_v18 = vld [vmem:[#allocation18_spill] sm:$0xff] }
 0x4bd   : > { %5763 = vrcp.f32 %v2070_v24  ;;  %2328 = vmatprep.mubr.f32.mxu1 %v2177_v60  ;;  %v7970_v60 = vld [vmem:[#allocation35_spill] sm:$0xff]  ;;  %v2778_v24 = vpack.c.bf16 %v7973_v18, %v7972_v54 }
 0x4be   : > { %v5758_v26 = vpop.eup %5757  ;;  %2329 = vmatmul.mubr.f32.gmra.mxu1 %v2176_v33  ;;  %v2787_v33 = vpack.c.bf16 %v7971_v45, %v7970_v60  ;;  %v7868_v60 = vlaneseq }
 0x4bf   : > { %v2179_v17 = vmul.f32 %v5758_v26, %v6875_v37  ;;  %v2178_v42 = vmul.f32 %v5758_v26, %v6873_v38  ;;  %v7975_v26 = vld [vmem:[#allocation20_spill] sm:$0xff] }
 0x4c0   : > { %v2073_v32 = vpop.xlane.xlu0 %2072  ;;  %2938 = vxpose.xlu1.c.b16.cont [7/8] (narrow) %v2786_v11, 32  ;;  %2921 = vxpose.xlu0.c.b16.cont [6/8] (narrow) %v2777_v47, 32 }
 0x4c1   : > { %5765 = vrcp.f32 %v2073_v32  ;;  %2333 = vmatprep.mubr.f32.mxu1 %v2179_v17  ;;  %v7974_v17 = vld [vmem:[#allocation19_spill] sm:$0xff] }
 0x4c2   : > { %v5760_v25 = vpop.eup %5759  ;;  %2334 = vmatmul.mubr.f32.gmra.mxu1 %v2178_v42  ;;  %v2779_v42 = vpack.c.bf16 %v7975_v26, %v7974_v17 }
 0x4c3   : > { %v2181_v52 = vmul.f32 %v5760_v25, %v6883_v57  ;;  %v2180_v43 = vmul.f32 %v5760_v25, %v6881_v46 }
 0x4c4   : > { %2939 = vxpose.xlu1.c.b16.end [8/8] (narrow) %v2787_v33, 32  ;;  %2922 = vxpose.xlu0.c.b16.cont [7/8] (narrow) %v2778_v24, 32  ;;  %v2076_v38 = vpop.xlane.xlu1 %2075 }
 0x4c5   : > { %5767 = vrcp.f32 %v2076_v38  ;;  %2338 = vmatprep.mubr.f32.mxu1 %v2181_v52 }
 0x4c6   : > { %v5762_v37 = vpop.eup %5761  ;;  %2339 = vmatmul.mubr.f32.gmra.mxu1 %v2180_v43 }
 0x4c7   : > { %v2183_v11 = vmul.f32 %v5762_v37, %v6891_v14  ;;  %v2182_v47 = vmul.f32 %v5762_v37, %v6889_v7 }
 0x4c8   : > { %v2079_v32 = vpop.xlane.xlu0 %2078  ;;  %2923 = vxpose.xlu0.c.b16.end [8/8] (narrow) %v2779_v42, 32 }
 0x4c9   : > { %5769 = vrcp.f32 %v2079_v32  ;;  %2343 = vmatprep.mubr.f32.mxu1 %v2183_v11 }
 0x4ca   : > { %v5764_v57 = vpop.eup %5763  ;;  %2344 = vmatmul.mubr.f32.gmra.mxu1 %v2182_v47 }
 0x4cb   : > { %v2185_v46 = vmul.f32 %v5764_v57, %v6899_v30  ;;  %v2184_v25 = vmul.f32 %v5764_v57, %v6897_v53  ;;  %v2816_v57 = vld [vmem:[#allocation2 + $0xe0] sm:$0xff] }
 0x4cc   : > { %v2082_v52 = vpop.xlane.xlu1 %2081 }
 0x4cd   : > { %5771 = vrcp.f32 %v2082_v52  ;;  %2348 = vmatprep.mubr.f32.mxu1 %v2185_v46 }
 0x4ce   : > { %v5766_v43 = vpop.eup %5765  ;;  %2349 = vmatmul.mubr.f32.gmra.mxu1 %v2184_v25 }
 0x4cf   : > { %v2187_v33 = vmul.f32 %v5766_v43, %v6907_v23  ;;  %v2186_v14 = vmul.f32 %v5766_v43, %v6905_v16 }
 0x4d0   : > { %v2085_v7 = vpop.xlane.xlu0 %2084 }
 0x4d1   : > { %5773 = vrcp.f32 %v2085_v7  ;;  %2353 = vmatprep.mubr.f32.mxu1 %v2187_v33  ;;  %v2808_v33 = vld [vmem:[#allocation2 + $0xa0] sm:$0xff] }
 0x4d2   : > { %v5768_v24 = vpop.eup %5767  ;;  %2354 = vmatmul.mubr.f32.gmra.mxu1 %v2186_v14 }
 0x4d3   : > { %v2189_v38 = vmul.f32 %v5768_v24, %v6915_v10  ;;  %v2188_v30 = vmul.f32 %v5768_v24, %v6913_v19  ;;  %v2812_v19 = vld [vmem:[#allocation2 + $0xc0] sm:$0xff] }
 0x4d4   : > { %v2088_v37 = vpop.xlane.xlu1 %2087  ;;  %v5098_v46 = vcombine.high %v2812_v19, %v2816_v57 }
 0x4d5   : > { %5775 = vrcp.f32 %v2088_v37  ;;  %2358 = vmatprep.mubr.f32.mxu1 %v2189_v38  ;;  %v2800_v37 = vld [vmem:[#allocation2 + $0x60] sm:$0xff] }
 0x4d6   : > { %v5770_v53 = vpop.eup %5769  ;;  %2359 = vmatmul.mubr.f32.gmra.mxu1 %v2188_v30  ;;  %3596 = vmatprep.subr.bf16.mxu1 %v5098_v46 }
 0x4d7   : > { %v2191_v42 = vmul.f32 %v5770_v53, %v6923_v13  ;;  %v2190_v23 = vmul.f32 %v5770_v53, %v6921_v9  ;;  %v2449_v9 = vld [vmem:[%s7764_s5] sm:$0xff]  ;;  %v5097_v13 = vcombine.low %v2812_v19, %v2816_v57 }
 0x4d8   : > { %v2091_v11 = vpop.xlane.xlu0 %2090  ;;  %5519 = vmatprep.subr.mxu0 %v2449_v9 }
 0x4d9   : > { %5777 = vrcp.f32 %v2091_v11  ;;  %2363 = vmatprep.mubr.f32.mxu1 %v2191_v42  ;;  %5520 = vmatpush3.msra.mxu0 %v2449_v9 }
 0x4da   : > { %v5772_v16 = vpop.eup %5771  ;;  %2364 = vmatmul.mubr.f32.gmra.mxu1 %v2190_v23 }
 0x4db   : > { %v2193_v47 = vmul.f32 %v5772_v16, %v6931_v4  ;;  %v2192_v10 = vmul.f32 %v5772_v16, %v6929_v12  ;;  %3597 = vmatpush1.bf16.msra.mxu1 %v5097_v13  ;;  %v2804_v4 = vld [vmem:[#allocation2 + $0x80] sm:$0xff] }
 0x4dc   : > { %v2094_v32 = vpop.xlane.xlu1 %2093  ;;  %v5090_v14 = vcombine.high %v2804_v4, %v2808_v33  ;;  %v5089_v24 = vcombine.low %v2804_v4, %v2808_v33 }
 0x4dd   : > { %5779 = vrcp.f32 %v2094_v32  ;;  %2368 = vmatprep.mubr.f32.mxu1 %v2193_v47 }
 0x4de   : > { %v5774_v25 = vpop.eup %5773  ;;  %2369 = vmatmul.mubr.f32.gmra.mxu1 %v2192_v10  ;;  %3598 = vmatprep.subr.bf16.mxu1 %v5090_v14 }
 0x4df   : > { %v2195_v52 = vmul.f32 %v5774_v25, %v6939_v5  ;;  %v2194_v43 = vmul.f32 %v5774_v25, %v6937_v3  ;;  %3599 = vmatpush1.bf16.msra.mxu1 %v5089_v24  ;;  %v2796_v3 = vld [vmem:[#allocation2 + $0x40] sm:$0xff] }
 0x4e0   : > { %v2097_v12 = vpop.xlane.xlu0 %2096  ;;  %v5082_v53 = vcombine.high %v2796_v3, %v2800_v37  ;;  %v5081_v23 = vcombine.low %v2796_v3, %v2800_v37 }
 0x4e1   : > { %5781 = vrcp.f32 %v2097_v12  ;;  %2373 = vmatprep.mubr.f32.mxu1 %v2195_v52 }
 0x4e2   : > { %v5776_v7 = vpop.eup %5775  ;;  %2374 = vmatmul.mubr.f32.gmra.mxu1 %v2194_v43  ;;  %3600 = vmatprep.subr.bf16.mxu1 %v5082_v53  ;;  %v7976_v53 = vld [vmem:[#allocation38_spill] sm:$0xff] }
 0x4e3   : > { %v2197_v38 = vmul.f32 %v5776_v7, %v6947_v62  ;;  %v2196_v30 = vmul.f32 %v5776_v7, %v6945_v2  ;;  %3601 = vmatpush1.bf16.msra.mxu1 %v5081_v23  ;;  %v2788_v62 = vld [vmem:[#allocation2] sm:$0xff] }
 0x4e4   : > { %v2100_v5 = vpop.xlane.xlu1 %2099  ;;  %v2792_v2 = vld [vmem:[#allocation2 + $0x20] sm:$0xff] }
 0x4e5   : > { %5783 = vrcp.f32 %v2100_v5  ;;  %2378 = vmatprep.mubr.f32.mxu1 %v2197_v38  ;;  %v5074_v10 = vcombine.high %v2788_v62, %v2792_v2  ;;  %v5073_v19 = vcombine.low %v2788_v62, %v2792_v2  ;;  %v7977_v23 = vld [vmem:[#allocation37_spill] sm:$0xff] }
 0x4e6   : > { %v5778_v42 = vpop.eup %5777  ;;  %2379 = vmatmul.mubr.f32.gmra.mxu1 %v2196_v30 }
 0x4e7   : > { %v2199_v11 = vmul.f32 %v5778_v42, %v6955_v59  ;;  %v2198_v16 = vmul.f32 %v5778_v42, %v6953_v61  ;;  %3602 = vmatprep.subr.bf16.mxu1 %v5074_v10  ;;  %v2908_v59 = vld [vmem:[#allocation2 + $0x3c0] sm:$0xff]  ;;  %v7978_v10 = vld [vmem:[#allocation40_spill] sm:$0xff] }
 0x4e8   : > { %v2103_v47 = vpop.xlane.xlu0 %2102  ;;  %3603 = vmatpush1.bf16.msra.mxu1 %v5073_v19  ;;  %v2912_v61 = vld [vmem:[#allocation2 + $0x3e0] sm:$0xff]  ;;  %v7979_v19 = vld [vmem:[#allocation39_spill] sm:$0xff] }
 0x4e9   : > { %5785 = vrcp.f32 %v2103_v47  ;;  %2383 = vmatprep.mubr.f32.mxu1 %v2199_v11  ;;  %v5194_v9 = vcombine.high %v2908_v59, %v2912_v61  ;;  %v5193_v52 = vcombine.low %v2908_v59, %v2912_v61  ;;  %v2880_v59 = vld [vmem:[#allocation2 + $0x2e0] sm:$0xff] }
 0x4ea   : > { %v5780_v32 = vpop.eup %5779  ;;  %2384 = vmatmul.mubr.f32.gmra.mxu1 %v2198_v16 }
 0x4eb   : > { %v2201_v57 = vmul.f32 %v5780_v32, %v6963_v56  ;;  %v2200_v46 = vmul.f32 %v5780_v32, %v6961_v58  ;;  %3604 = vmatprep.subr.bf16.mxu1 %v5194_v9  ;;  %v2900_v56 = vld [vmem:[#allocation2 + $0x380] sm:$0xff] }
 0x4ec   : > { %v2106_v25 = vpop.xlane.xlu1 %2105  ;;  %3605 = vmatpush2.bf16.msra.mxu1 %v5193_v52  ;;  %v2904_v58 = vld [vmem:[#allocation2 + $0x3a0] sm:$0xff] }
 0x4ed   : > { %5787 = vrcp.f32 %v2106_v25  ;;  %2388 = vmatprep.mubr.f32.mxu1 %v2201_v57  ;;  %v5186_v33 = vcombine.high %v2900_v56, %v2904_v58  ;;  %v5185_v7 = vcombine.low %v2900_v56, %v2904_v58  ;;  %v2876_v25 = vld [vmem:[#allocation2 + $0x2c0] sm:$0xff] }
 0x4ee   : > { %v5782_v13 = vpop.eup %5781  ;;  %2389 = vmatmul.mubr.f32.gmra.mxu1 %v2200_v46  ;;  %v5162_v61 = vcombine.high %v2876_v25, %v2880_v59  ;;  %v2868_v56 = vld [vmem:[#allocation2 + $0x280] sm:$0xff] }
 0x4ef   : > { %v2203_v43 = vmul.f32 %v5782_v13, %v6971_v51  ;;  %v2202_v12 = vmul.f32 %v5782_v13, %v6969_v55  ;;  %3606 = vmatprep.subr.bf16.mxu1 %v5186_v33  ;;  %v2892_v51 = vld [vmem:[#allocation2 + $0x340] sm:$0xff]  ;;  %v5161_v13 = vcombine.low %v2876_v25, %v2880_v59 }
 0x4f0   : > { %v2109_v4 = vpop.xlane.xlu0 %2108  ;;  %3607 = vmatpush2.bf16.msra.mxu1 %v5185_v7  ;;  %v2896_v55 = vld [vmem:[#allocation2 + $0x360] sm:$0xff] }
 0x4f1   : > { %5789 = vrcp.f32 %v2109_v4  ;;  %2393 = vmatprep.mubr.f32.mxu1 %v2203_v43  ;;  %v5178_v5 = vcombine.high %v2892_v51, %v2896_v55  ;;  %v5177_v37 = vcombine.low %v2892_v51, %v2896_v55  ;;  %v7980_v43 = vld [vmem:[#allocation41_spill] sm:$0xff] }
 0x4f2   : > { %v5784_v14 = vpop.eup %5783  ;;  %2394 = vmatmul.mubr.f32.gmra.mxu1 %v2202_v12  ;;  %v2872_v58 = vld [vmem:[#allocation2 + $0x2a0] sm:$0xff] }
 0x4f3   : > { %v2205_v24 = vmul.f32 %v5784_v14, %v6979_v21  ;;  %v2204_v38 = vmul.f32 %v5784_v14, %v6977_v1  ;;  %3608 = vmatprep.subr.bf16.mxu1 %v5178_v5  ;;  %v2884_v21 = vld [vmem:[#allocation2 + $0x300] sm:$0xff]  ;;  %v5154_v33 = vcombine.high %v2868_v56, %v2872_v58  ;;  %v5153_v7 = vcombine.low %v2868_v56, %v2872_v58 }
 0x4f4   : > { %v2112_v30 = vpop.xlane.xlu1 %2111  ;;  %3609 = vmatpush2.bf16.msra.mxu1 %v5177_v37  ;;  %v2888_v1 = vld [vmem:[#allocation2 + $0x320] sm:$0xff] }
 0x4f5   : > { %5791 = vrcp.f32 %v2112_v30  ;;  %2398 = vmatprep.mubr.f32.mxu1 %v2205_v24  ;;  %v5170_v47 = vcombine.high %v2884_v21, %v2888_v1  ;;  %v5169_v2 = vcombine.low %v2884_v21, %v2888_v1  ;;  %v2864_v55 = vld [vmem:[#allocation2 + $0x260] sm:$0xff] }
 0x4f6   : > { %v5786_v3 = vpop.eup %5785  ;;  %2399 = vmatmul.mubr.f32.gmra.mxu1 %v2204_v38  ;;  %v7981_v38 = vld [vmem:[#allocation42_spill] sm:$0xff]  ;;  %v2856_v21 = vld [vmem:[#allocation2 + $0x220] sm:$0xff] }
 0x4f7   : > { %v2207_v42 = vmul.f32 %v5786_v3, %v7976_v53  ;;  %v2206_v11 = vmul.f32 %v5786_v3, %v7977_v23  ;;  %3610 = vmatprep.subr.bf16.mxu1 %v5170_v47  ;;  %v7982_v53 = vld [vmem:[#allocation44_spill] sm:$0xff]  ;;  %v7983_v23 = vld [vmem:[#allocation43_spill] sm:$0xff]  ;;  %v7989_v56 = vld [vmem:[#allocation49_spill] sm:$0xff] }
 0x4f8   : > { %v2115_v16 = vpop.xlane.xlu0 %2114  ;;  %3611 = vmatpush2.bf16.msra.mxu1 %v5169_v2  ;;  %v7984_v2 = vld [vmem:[#allocation46_spill] sm:$0xff] }
 0x4f9   : > { %5793 = vrcp.f32 %v2115_v16  ;;  %2403 = vmatprep.mubr.f32.mxu1 %v2207_v42  ;;  %3612 = vmatprep.subr.bf16.mxu1 %v5162_v61  ;;  %v7986_v61 = vld [vmem:[#allocation48_spill] sm:$0xff] }
 0x4fa   : > { %v5788_v62 = vpop.eup %5787  ;;  %2404 = vmatmul.mubr.f32.gmra.mxu1 %v2206_v11 }
 0x4fb   : > { %v2209_v32 = vmul.f32 %v5788_v62, %v7978_v10  ;;  %v2208_v57 = vmul.f32 %v5788_v62, %v7979_v19 }
 0x4fc   : > { %v2118_v46 = vpop.xlane.xlu1 %2117  ;;  %3613 = vmatpush2.bf16.msra.mxu1 %v5161_v13  ;;  %v7987_v13 = vld [vmem:[#allocation47_spill] sm:$0xff] }
 0x4fd   : > { %5795 = vrcp.f32 %v2118_v46  ;;  %2408 = vmatprep.mubr.f32.mxu1 %v2209_v32  ;;  %3614 = vmatprep.subr.bf16.mxu1 %v5154_v33  ;;  %v7985_v32 = vld [vmem:[#allocation45_spill] sm:$0xff]  ;;  %v2850_v46 = vld [vmem:[#allocation2 + $0x1f0] sm:$0xff] }
 0x4fe   : > { %v5790_v9 = vpop.eup %5789  ;;  %2409 = vmatmul.mubr.f32.gmra.mxu1 %v2208_v57  ;;  %v2846_v57 = vld [vmem:[#allocation2 + $0x1d0] sm:$0xff] }
 0x4ff   : > { %v2211_v52 = vmul.f32 %v5790_v9, %v7003_v27  ;;  %v2210_v12 = vmul.f32 %v5790_v9, %v7980_v43  ;;  %v2860_v27 = vld [vmem:[#allocation2 + $0x240] sm:$0xff]  ;;  %v5134_v25 = vcombine.high %v2846_v57, %v2850_v46 }
 0x500   : > { %v2121_v4 = vpop.xlane.xlu0 %2120  ;;  %3615 = vmatpush2.bf16.msra.mxu1 %v5153_v7  ;;  %v5146_v5 = vcombine.high %v2860_v27, %v2864_v55  ;;  %v5145_v37 = vcombine.low %v2860_v27, %v2864_v55  ;;  %v2842_v27 = vld [vmem:[#allocation2 + $0x1b0] sm:$0xff] }
 0x501   : > { %5797 = vrcp.f32 %v2121_v4  ;;  %2413 = vmatprep.mubr.f32.mxu1 %v2211_v52 }
 0x502   : > { %v5792_v14 = vpop.eup %5791  ;;  %2414 = vmatmul.mubr.f32.gmra.mxu1 %v2210_v12  ;;  %3616 = vmatprep.subr.bf16.mxu1 %v5146_v5  ;;  %v7988_v12 = vld [vmem:[#allocation50_spill] sm:$0xff]  ;;  %v5133_v5 = vcombine.low %v2846_v57, %v2850_v46  ;;  %v2806_v46 = vld [vmem:[#allocation2 + $0x90] sm:$0xff] }
 0x503   : > { %v2213_v24 = vmul.f32 %v5792_v14, %v7011_v28  ;;  %v2212_v30 = vmul.f32 %v5792_v14, %v7981_v38  ;;  %v2852_v28 = vld [vmem:[#allocation2 + $0x200] sm:$0xff]  ;;  %v7990_v14 = vld [vmem:[#allocation52_spill] sm:$0xff] }
 0x504   : > { %v2124_v51 = vpop.xlane.xlu1 %2123  ;;  %3617 = vmatpush2.bf16.msra.mxu1 %v5145_v37  ;;  %v5138_v1 = vcombine.high %v2852_v28, %v2856_v21  ;;  %v5137_v62 = vcombine.low %v2852_v28, %v2856_v21  ;;  %v7156_v37 = vld [vmem:[#allocation2 + $0x1e8] sm:$0xff] }
 0x505   : > { %5799 = vrcp.f32 %v2124_v51  ;;  %2418 = vmatprep.mubr.f32.mxu1 %v2213_v24  ;;  %v7991_v24 = vld [vmem:[#allocation51_spill] sm:$0xff] }
 0x506   : > { %v5794_v3 = vpop.eup %5793  ;;  %2419 = vmatmul.mubr.f32.gmra.mxu1 %v2212_v30  ;;  %3618 = vmatprep.subr.bf16.mxu1 %v5138_v1  ;;  %v2838_v51 = vld [vmem:[#allocation2 + $0x190] sm:$0xff] }
 0x507   : > { %v2215_v42 = vmul.f32 %v5794_v3, %v7982_v53  ;;  %v2214_v11 = vmul.f32 %v5794_v3, %v7983_v23  ;;  %v7154_v3 = vld [vmem:[#allocation2 + $0x1c8] sm:$0xff]  ;;  %v5126_v53 = vcombine.high %v2838_v51, %v2842_v27  ;;  %v2830_v23 = vld [vmem:[#allocation2 + $0x150] sm:$0xff]  ;;  %v5125_v28 = vcombine.low %v2838_v51, %v2842_v27 }
 0x508   : > { %v2127_v16 = vpop.xlane.xlu0 %2126  ;;  %3619 = vmatpush2.bf16.msra.mxu1 %v5137_v62  ;;  %v2822_v1 = vld [vmem:[#allocation2 + $0x110] sm:$0xff] }
 0x509   : > { %5801 = vrcp.f32 %v2127_v16  ;;  %2423 = vmatprep.mubr.f32.mxu1 %v2215_v42  ;;  %3694 = vmatprep.subr.bf16.mxu1 %v5134_v25  ;;  %v5132_v42 = vcombine.high %v7154_v3, %v7156_v37  ;;  %v5131_v16 = vcombine.low %v7154_v3, %v7156_v37  ;;  %v2810_v25 = vld [vmem:[#allocation2 + $0xb0] sm:$0xff]  ;;  %v2813_v3 = vld [vmem:[#allocation2 + $0xc8] sm:$0xff] }
 0x50a   : > { %v5796_v47 = vpop.eup %5795  ;;  %2424 = vmatmul.mubr.f32.gmra.mxu1 %v2214_v11  ;;  %v7149_v30 = vpop.trf.xlu1  ;;  %v2834_v11 = vld [vmem:[#allocation2 + $0x170] sm:$0xff]  ;;  %v2817_v37 = vld [vmem:[#allocation2 + $0xe8] sm:$0xff] }
 0x50b   : > { %v2217_v10 = vmul.f32 %v5796_v47, %v7984_v2  ;;  %v2216_v19 = vmul.f32 %v5796_v47, %v7985_v32  ;;  %3641 = vmatprep.subr.bf16.mxu0 %v5132_v42  ;;  %v5118_v21 = vcombine.high %v2830_v23, %v2834_v11  ;;  %v2826_v47 = vld [vmem:[#allocation2 + $0x130] sm:$0xff]  ;;  %v5117_v62 = vcombine.low %v2830_v23, %v2834_v11 }
 0x50c   : > { %v5110_v2 = vcombine.high %v2822_v1, %v2826_v47  ;;  %v2818_v32 = vld [vmem:[#allocation2 + $0xf0] sm:$0xff] }
 0x50d   : > { %2428 = vmatprep.mubr.f32.mxu1 %v2217_v10  ;;  %v2814_v10 = vld [vmem:[#allocation2 + $0xd0] sm:$0xff] }
 0x50e   : > { %v5798_v59 = vpop.eup %5797  ;;  %2429 = vmatmul.mubr.f32.gmra.mxu1 %v2216_v19  ;;  %v7151_v55 = vpop.trf.xlu0  ;;  %v5109_v19 = vcombine.low %v2822_v1, %v2826_v47  ;;  %v5102_v57 = vcombine.high %v2814_v10, %v2818_v32  ;;  %v2906_v51 = vld [vmem:[#allocation2 + $0x3b0] sm:$0xff] }
 0x50f   : > { %v2219_v9 = vmul.f32 %v5798_v59, %v7986_v61  ;;  %v2218_v52 = vmul.f32 %v5798_v59, %v7987_v13  ;;  %v5101_v59 = vcombine.low %v2814_v10, %v2818_v32  ;;  %v5094_v61 = vcombine.high %v2806_v46, %v2810_v25  ;;  %v2802_v13 = vld [vmem:[#allocation2 + $0x70] sm:$0xff] }
 0x510   : > { %v2898_v42 = vld [vmem:[#allocation2 + $0x370] sm:$0xff] }
 0x511   : > { %2433 = vmatprep.mubr.f32.mxu1 %v2219_v9  ;;  %v2798_v9 = vld [vmem:[#allocation2 + $0x50] sm:$0xff] }
 0x512   : > { %v5800_v43 = vpop.eup %5799  ;;  %2434 = vmatmul.mubr.f32.gmra.mxu1 %v2218_v52  ;;  %v5093_v52 = vcombine.low %v2806_v46, %v2810_v25  ;;  %v2882_v10 = vld [vmem:[#allocation2 + $0x2f0] sm:$0xff]  ;;  %v7166_v32 = vpop.trf.xlu0 }
 0x513   : > { %v2221_v4 = vmul.f32 %v5800_v43, %v7988_v12  ;;  %v2220_v58 = vmul.f32 %v5800_v43, %v7989_v56  ;;  %v5086_v43 = vcombine.high %v2798_v9, %v2802_v13  ;;  %v2790_v12 = vld [vmem:[#allocation2 + $0x10] sm:$0xff]  ;;  %v5085_v56 = vcombine.low %v2798_v9, %v2802_v13 }
 0x514   : > { %v2870_v46 = vld [vmem:[#allocation2 + $0x290] sm:$0xff] }
 0x515   : > { %2438 = vmatprep.mubr.f32.mxu1 %v2221_v4  ;;  %v2794_v4 = vld [vmem:[#allocation2 + $0x30] sm:$0xff] }
 0x516   : > { %v5802_v33 = vpop.eup %5801  ;;  %2439 = vmatmul.mubr.f32.gmra.mxu1 %v2220_v58  ;;  %v5078_v58 = vcombine.high %v2790_v12, %v2794_v4  ;;  %v2874_v25 = vld [vmem:[#allocation2 + $0x2b0] sm:$0xff] }
 0x517   : > { %v2223_v7 = vmul.f32 %v5802_v33, %v7990_v14  ;;  %v2222_v38 = vmul.f32 %v5802_v33, %v7991_v24  ;;  %v2910_v33 = vld [vmem:[#allocation2 + $0x3d0] sm:$0xff] }
 0x518   : > { %v2914_v14 = vld [vmem:[#allocation2 + $0x3f0] sm:$0xff] }
 0x519   : > { %2443 = vmatprep.mubr.f32.mxu1 %v2223_v7  ;;  %v5077_v7 = vcombine.low %v2790_v12, %v2794_v4  ;;  %v5198_v24 = vcombine.high %v2910_v33, %v2914_v14  ;;  %v5197_v27 = vcombine.low %v2910_v33, %v2914_v14  ;;  %v2862_v9 = vld [vmem:[#allocation2 + $0x250] sm:$0xff] }
 0x51a   : > { %2444 = vmatmul.mubr.f32.gmra.mxu1 %v2222_v38  ;;  %v2902_v38 = vld [vmem:[#allocation2 + $0x390] sm:$0xff] }
 0x51b   : > { %3620 = vmatprep.mubr.bf16.mxu1 %v7149_v30  ;;  %v5189_v23 = vcombine.low %v2902_v38, %v2906_v51  ;;  %v2866_v13 = vld [vmem:[#allocation2 + $0x270] sm:$0xff] }
 0x51c   : > { %v2854_v12 = vld [vmem:[#allocation2 + $0x210] sm:$0xff] }
 0x51d   : > { %v2858_v4 = vld [vmem:[#allocation2 + $0x230] sm:$0xff] }
 0x51e   : > { %3621 = vmatmul.mubr.bf16.vlgmr.msra.gmra.mxu1 %v7151_v55  ;;  %v5141_v33 = vcombine.low %v2854_v12, %v2858_v4 }
 0x51f   : > { %3695 = vmatpush1.bf16.msra.mxu1 %v5133_v5  ;;  %v5190_v5 = vcombine.high %v2902_v38, %v2906_v51 }
 0x520   : > { %3696 = vmatprep.subr.bf16.mxu1 %v5126_v53  ;;  %v2894_v53 = vld [vmem:[#allocation2 + $0x350] sm:$0xff] }
 0x521   : > { %v5182_v11 = vcombine.high %v2894_v53, %v2898_v42  ;;  %v5181_v1 = vcombine.low %v2894_v53, %v2898_v42  ;;  %v2833_v53 = vld [vmem:[#allocation2 + $0x168] sm:$0xff] }
 0x523   : > { %3697 = vmatpush1.bf16.msra.mxu1 %v5125_v28  ;;  %v2886_v28 = vld [vmem:[#allocation2 + $0x310] sm:$0xff] }
 0x524   : > { %3698 = vmatprep.subr.bf16.mxu1 %v5118_v21  ;;  %v2890_v21 = vld [vmem:[#allocation2 + $0x330] sm:$0xff] }
 0x525   : > { %v5174_v47 = vcombine.high %v2886_v28, %v2890_v21 }
 0x527   : > { %3699 = vmatpush1.bf16.msra.mxu1 %v5117_v62  ;;  %v7163_v62 = vpop.trf.xlu1 }
 0x528   : > { %3700 = vmatprep.subr.bf16.mxu1 %v5110_v2  ;;  %v2878_v2 = vld [vmem:[#allocation2 + $0x2d0] sm:$0xff]  ;;  %3630 = vmatprep.mubr.bf16.mxu1 %v7163_v62 }
 0x529   : > { %3631 = vmatmul.mubr.bf16.gmra.mxu1 %v7166_v32 }
 0x52a   : > { %3726 = vmatprep.mubr.bf16.mxu1 %v7149_v30 }
 0x52b   : > { %3701 = vmatpush1.bf16.msra.mxu1 %v5109_v19  ;;  %v5173_v19 = vcombine.low %v2886_v28, %v2890_v21  ;;  %v2821_v21 = vld [vmem:[#allocation2 + $0x108] sm:$0xff] }
 0x52c   : > { %3702 = vmatprep.subr.bf16.mxu1 %v5102_v57  ;;  %v5166_v57 = vcombine.high %v2878_v2, %v2882_v10 }
 0x52f   : > { %3703 = vmatpush1.bf16.msra.mxu1 %v5101_v59  ;;  %v5165_v59 = vcombine.low %v2878_v2, %v2882_v10 }
 0x530   : > { %3704 = vmatprep.subr.bf16.mxu1 %v5094_v61  ;;  %v5158_v61 = vcombine.high %v2870_v46, %v2874_v25 }
 0x533   : > { %3705 = vmatpush1.bf16.msra.mxu1 %v5093_v52  ;;  %v5157_v52 = vcombine.low %v2870_v46, %v2874_v25  ;;  %v5100_v25 = vcombine.high %v2813_v3, %v2817_v37 }
 0x534   : > { %3706 = vmatprep.subr.bf16.mxu1 %v5086_v43  ;;  %v5150_v43 = vcombine.high %v2862_v9, %v2866_v13 }
 0x537   : > { %3707 = vmatpush1.bf16.msra.mxu1 %v5085_v56  ;;  %v5149_v56 = vcombine.low %v2862_v9, %v2866_v13  ;;  %v2809_v9 = vld [vmem:[#allocation2 + $0xa8] sm:$0xff] }
 0x538   : > { %3708 = vmatprep.subr.bf16.mxu1 %v5078_v58  ;;  %v5142_v58 = vcombine.high %v2854_v12, %v2858_v4  ;;  %v2797_v4 = vld [vmem:[#allocation2 + $0x48] sm:$0xff] }
 0x53b   : > { %3709 = vmatpush1.bf16.msra.mxu1 %v5077_v7  ;;  %v2837_v7 = vld [vmem:[#allocation2 + $0x188] sm:$0xff] }
 0x53c   : > { %3710 = vmatprep.subr.bf16.mxu1 %v5198_v24  ;;  %v2841_v24 = vld [vmem:[#allocation2 + $0x1a8] sm:$0xff] }
 0x53d   : > { %v5124_v51 = vcombine.high %v2837_v7, %v2841_v24 }
 0x53f   : > { %3711 = vmatpush2.bf16.msra.mxu1 %v5197_v27 }
 0x540   : > { %3712 = vmatprep.subr.bf16.mxu1 %v5190_v5  ;;  %v2829_v5 = vld [vmem:[#allocation2 + $0x148] sm:$0xff] }
 0x541   : > { %v5115_v10 = vcombine.low %v2829_v5, %v2833_v53 }
 0x543   : > { %3713 = vmatpush2.bf16.msra.mxu1 %v5189_v23  ;;  %v5123_v23 = vcombine.low %v2837_v7, %v2841_v24  ;;  %v2789_v24 = vld [vmem:[#allocation2 + $0x8] sm:$0xff] }
 0x544   : > { %3714 = vmatprep.subr.bf16.mxu1 %v5182_v11  ;;  %v5116_v11 = vcombine.high %v2829_v5, %v2833_v53 }
 0x547   : > { %3715 = vmatpush2.bf16.msra.mxu1 %v5181_v1  ;;  %v2825_v1 = vld [vmem:[#allocation2 + $0x128] sm:$0xff] }
 0x548   : > { %3716 = vmatprep.subr.bf16.mxu1 %v5174_v47  ;;  %v7992_v47 = vmov 0.0   ;;  %v5107_v46 = vcombine.low %v2821_v21, %v2825_v1 }
 0x54b   : > { %3717 = vmatpush2.bf16.msra.mxu1 %v5173_v19  ;;  %v5108_v19 = vcombine.high %v2821_v21, %v2825_v1 }
 0x54c   : > { %3718 = vmatprep.subr.bf16.mxu1 %v5166_v57 }
 0x54f   : > { %3719 = vmatpush2.bf16.msra.mxu1 %v5165_v59 }
 0x550   : > { %3720 = vmatprep.subr.bf16.mxu1 %v5158_v61  ;;  %v2805_v61 = vld [vmem:[#allocation2 + $0x88] sm:$0xff] }
 0x553   : > { %3721 = vmatpush2.bf16.msra.mxu1 %v5157_v52  ;;  %v5099_v52 = vcombine.low %v2813_v3, %v2817_v37 }
 0x554   : > { %3722 = vmatprep.subr.bf16.mxu1 %v5150_v43  ;;  %v5092_v43 = vcombine.high %v2805_v61, %v2809_v9 }
 0x557   : > { %3723 = vmatpush2.bf16.msra.mxu1 %v5149_v56  ;;  %v2801_v56 = vld [vmem:[#allocation2 + $0x68] sm:$0xff] }
 0x558   : > { %3724 = vmatprep.subr.bf16.mxu1 %v5142_v58 }
 0x55b   : > { %3725 = vmatpush2.bf16.msra.mxu1 %v5141_v33  ;;  %v5091_v33 = vcombine.low %v2805_v61, %v2809_v9 }
 0x55e   : > { %v2290_v14 = vpop.f32.mrf.mxu1  ;;  %3727 = vmatmul.mubr.bf16.vlgmr.msra.gmra.mxu1 %v7151_v55 }
 0x55f   : > { %5521 = vmatprep.mubr.msk.f32.mxu0 %vm1358_vm3, %v2290_v14  ;;  %3736 = vmatprep.mubr.bf16.mxu1 %v7163_v62  ;;  %v5084_v14 = vcombine.high %v2797_v4, %v2801_v56 }
 0x560   : > { %v2292_v38 = vpop.f32.mrf.mxu1 }
 0x561   : > { %v2793_v38 = vld [vmem:[#allocation2 + $0x28] sm:$0xff] }
 0x562   : > { %v2295_v27 = vpop.f32.mrf.mxu1  ;;  %v5076_v5 = vcombine.high %v2789_v24, %v2793_v38 }
 0x563   : > { %5522 = vmatmul.mubr.msk.f32.vlgmr.msra.gmra.mxu0 %vm1358_vm3, %v2295_v27  ;;  %v5083_v27 = vcombine.low %v2797_v4, %v2801_v56 }
 0x564   : > { %v2297_v42 = vpop.f32.mrf.mxu1  ;;  %3642 = vmatpush1.bf16.msra.mxu0 %v5131_v16 }
 0x565   : > { %3643 = vmatprep.subr.bf16.mxu0 %v5124_v51  ;;  %v2909_v42 = vld [vmem:[#allocation2 + $0x3c8] sm:$0xff] }
 0x566   : > { %v2300_v28 = vpop.f32.mrf.mxu1  ;;  %3737 = vmatmul.mubr.bf16.gmra.mxu1 %v7166_v32 }
 0x567   : > { %5524 = vmatprep.mubr.msk.f32.mxu0 %vm1358_vm3, %v2300_v28  ;;  %4065 = vmatprep.mubr.f32.mxu1 %v7992_v47  ;;  %v5075_v28 = vcombine.low %v2789_v24, %v2793_v38 }
 0x568   : > { %v2302_v2 = vpop.f32.mrf.mxu1  ;;  %3644 = vmatpush1.bf16.msra.mxu0 %v5123_v23  ;;  %v2913_v23 = vld [vmem:[#allocation2 + $0x3e8] sm:$0xff] }
 0x569   : > { %3645 = vmatprep.subr.bf16.mxu0 %v5116_v11  ;;  %v5196_v21 = vcombine.high %v2909_v42, %v2913_v23  ;;  %v2901_v2 = vld [vmem:[#allocation2 + $0x388] sm:$0xff] }
 0x56a   : > { %v2305_v57 = vpop.f32.mrf.mxu1 }
 0x56b   : > { %5525 = vmatmul.mubr.msk.f32.gmra.mxu0 %vm1358_vm3, %v2305_v57  ;;  %v5195_v57 = vcombine.low %v2909_v42, %v2913_v23 }
 0x56c   : > { %v2307_v16 = vpop.f32.mrf.mxu1  ;;  %3646 = vmatpush1.bf16.msra.mxu0 %v5115_v10  ;;  %v2905_v10 = vld [vmem:[#allocation2 + $0x3a8] sm:$0xff] }
 0x56d   : > { %3647 = vmatprep.subr.bf16.mxu0 %v5108_v19  ;;  %v5188_v3 = vcombine.high %v2901_v2, %v2905_v10  ;;  %v2893_v16 = vld [vmem:[#allocation2 + $0x348] sm:$0xff] }
 0x56e   : > { %v2310_v59 = vpop.f32.mrf.mxu1 }
 0x56f   : > { %5527 = vmatprep.mubr.msk.f32.mxu0 %vm1358_vm3, %v2310_v59  ;;  %v5187_v59 = vcombine.low %v2901_v2, %v2905_v10 }
 0x570   : > { %v2312_v13 = vpop.f32.mrf.mxu1  ;;  %3648 = vmatpush1.bf16.msra.mxu0 %v5107_v46  ;;  %v2897_v46 = vld [vmem:[#allocation2 + $0x368] sm:$0xff] }
 0x571   : > { %3649 = vmatprep.subr.bf16.mxu0 %v5100_v25  ;;  %v5180_v61 = vcombine.high %v2893_v16, %v2897_v46  ;;  %v2885_v13 = vld [vmem:[#allocation2 + $0x308] sm:$0xff] }
 0x572   : > { %v2315_v12 = vpop.f32.mrf.mxu1 }
 0x573   : > { %5528 = vmatmul.mubr.msk.f32.gmra.mxu0 %vm1358_vm3, %v2315_v12  ;;  %v5179_v12 = vcombine.low %v2893_v16, %v2897_v46 }
 0x574   : > { %v2317_v58 = vpop.f32.mrf.mxu1  ;;  %3650 = vmatpush1.bf16.msra.mxu0 %v5099_v52  ;;  %v2889_v52 = vld [vmem:[#allocation2 + $0x328] sm:$0xff] }
 0x575   : > { %3651 = vmatprep.subr.bf16.mxu0 %v5092_v43  ;;  %v5172_v4 = vcombine.high %v2885_v13, %v2889_v52  ;;  %v2877_v58 = vld [vmem:[#allocation2 + $0x2c8] sm:$0xff] }
 0x576   : > { %v2320_v7 = vpop.f32.mrf.mxu1 }
 0x577   : > { %5530 = vmatprep.mubr.msk.f32.mxu0 %vm1358_vm3, %v2320_v7  ;;  %v5171_v7 = vcombine.low %v2885_v13, %v2889_v52 }
 0x578   : > { %v2322_v51 = vpop.f32.mrf.mxu1  ;;  %3652 = vmatpush1.bf16.msra.mxu0 %v5091_v33  ;;  %v2881_v33 = vld [vmem:[#allocation2 + $0x2e8] sm:$0xff] }
 0x579   : > { %3653 = vmatprep.subr.bf16.mxu0 %v5084_v14  ;;  %v5164_v24 = vcombine.high %v2877_v58, %v2881_v33  ;;  %v2869_v51 = vld [vmem:[#allocation2 + $0x288] sm:$0xff] }
 0x57a   : > { %v2325_v53 = vpop.f32.mrf.mxu1 }
 0x57b   : > { %5531 = vmatmul.mubr.msk.f32.gmra.mxu0 %vm1358_vm3, %v2325_v53  ;;  %v5163_v53 = vcombine.low %v2877_v58, %v2881_v33 }
 0x57c   : > { %v2327_v11 = vpop.f32.mrf.mxu1  ;;  %3654 = vmatpush1.bf16.msra.mxu0 %v5083_v27  ;;  %v2873_v27 = vld [vmem:[#allocation2 + $0x2a8] sm:$0xff] }
 0x57d   : > { %3655 = vmatprep.subr.bf16.mxu0 %v5076_v5  ;;  %v5156_v42 = vcombine.high %v2869_v51, %v2873_v27  ;;  %v2861_v11 = vld [vmem:[#allocation2 + $0x248] sm:$0xff] }
 0x57e   : > { %v2330_v1 = vpop.f32.mrf.mxu1 }
 0x57f   : > { %5533 = vmatprep.mubr.msk.f32.mxu0 %vm1358_vm3, %v2330_v1  ;;  %v5155_v1 = vcombine.low %v2869_v51, %v2873_v27 }
 0x580   : > { %v2332_v19 = vpop.f32.mrf.mxu1  ;;  %3656 = vmatpush1.bf16.msra.mxu0 %v5075_v28  ;;  %v2865_v28 = vld [vmem:[#allocation2 + $0x268] sm:$0xff] }
 0x581   : > { %3657 = vmatprep.subr.bf16.mxu0 %v5196_v21  ;;  %v5148_v2 = vcombine.high %v2861_v11, %v2865_v28  ;;  %v2853_v19 = vld [vmem:[#allocation2 + $0x208] sm:$0xff] }
 0x582   : > { %v2335_v37 = vpop.f32.mrf.mxu1 }
 0x583   : > { %5534 = vmatmul.mubr.msk.f32.gmra.mxu0 %vm1358_vm3, %v2335_v37  ;;  %v5147_v37 = vcombine.low %v2861_v11, %v2865_v28 }
 0x584   : > { %v2337_v25 = vpop.f32.mrf.mxu1  ;;  %3658 = vmatpush2.bf16.msra.mxu0 %v5195_v57  ;;  %v2857_v57 = vld [vmem:[#allocation2 + $0x228] sm:$0xff] }
 0x585   : > { %3659 = vmatprep.subr.bf16.mxu0 %v5188_v3  ;;  %v5140_v16 = vcombine.high %v2853_v19, %v2857_v57  ;;  %v7192_v25 = vld [vmem:[#allocation2 + $0x1d8] sm:$0xff] }
 0x586   : > { %v2340_v9 = vpop.f32.mrf.mxu1 }
 0x587   : > { %5536 = vmatprep.mubr.msk.f32.mxu0 %vm1358_vm3, %v2340_v9  ;;  %v5139_v9 = vcombine.low %v2853_v19, %v2857_v57 }
 0x588   : > { %v2342_v43 = vpop.f32.mrf.mxu1  ;;  %3660 = vmatpush2.bf16.msra.mxu0 %v5187_v59  ;;  %v7194_v59 = vld [vmem:[#allocation2 + $0x1f8] sm:$0xff] }
 0x589   : > { %3661 = vmatprep.subr.bf16.mxu0 %v5180_v61  ;;  %v5136_v13 = vcombine.high %v7192_v25, %v7194_v59 }
 0x58a   : > { %v2345_v56 = vpop.f32.mrf.mxu1 }
 0x58b   : > { %5537 = vmatmul.mubr.msk.f32.gmra.mxu0 %vm1358_vm3, %v2345_v56 }
 0x58c   : > { %v2347_v14 = vpop.f32.mrf.mxu1  ;;  %3662 = vmatpush2.bf16.msra.mxu0 %v5179_v12 }
 0x58d   : > { %3663 = vmatprep.subr.bf16.mxu0 %v5172_v4 }
 0x58e   : > { %v2350_v38 = vpop.f32.mrf.mxu1 }
 0x58f   : > { %5539 = vmatprep.mubr.msk.f32.mxu0 %vm1358_vm3, %v2350_v38 }
 0x590   : > { %v2352_v5 = vpop.f32.mrf.mxu1  ;;  %3664 = vmatpush2.bf16.msra.mxu0 %v5171_v7 }
 0x591   : > { %3665 = vmatprep.subr.bf16.mxu0 %v5164_v24 }
 0x592   : > { %v2355_v23 = vpop.f32.mrf.mxu1 }
 0x593   : > { %5540 = vmatmul.mubr.msk.f32.gmra.mxu0 %vm1358_vm3, %v2355_v23 }
 0x594   : > { %v2357_v21 = vpop.f32.mrf.mxu1  ;;  %3666 = vmatpush2.bf16.msra.mxu0 %v5163_v53 }
 0x595   : > { %3667 = vmatprep.subr.bf16.mxu0 %v5156_v42 }
 0x596   : > { %v2360_v10 = vpop.f32.mrf.mxu1 }
 0x597   : > { %5542 = vmatprep.mubr.msk.f32.mxu0 %vm1358_vm3, %v2360_v10 }
 0x598   : > { %v2362_v3 = vpop.f32.mrf.mxu1  ;;  %3668 = vmatpush2.bf16.msra.mxu0 %v5155_v1 }
 0x599   : > { %3669 = vmatprep.subr.bf16.mxu0 %v5148_v2 }
 0x59a   : > { %v2365_v46 = vpop.f32.mrf.mxu1 }
 0x59b   : > { %5543 = vmatmul.mubr.msk.f32.gmra.mxu0 %vm1358_vm3, %v2365_v46 }
 0x59c   : > { %v2367_v61 = vpop.f32.mrf.mxu1  ;;  %3670 = vmatpush2.bf16.msra.mxu0 %v5147_v37 }
 0x59d   : > { %3671 = vmatprep.subr.bf16.mxu0 %v5140_v16 }
 0x59e   : > { %v2370_v52 = vpop.f32.mrf.mxu1 }
 0x59f   : > { %5545 = vmatprep.mubr.msk.f32.mxu0 %vm1358_vm3, %v2370_v52  ;;  %v2843_v52 = vld [vmem:[#allocation2 + $0x1b8] sm:$0xff] }
 0x5a0   : > { %v2372_v43 = vpop.f32.mrf.mxu1  ;;  %3672 = vmatpush2.bf16.msra.mxu0 %v5139_v9 }
 0x5a1   : > { %3747 = vmatprep.subr.bf16.mxu0 %v5136_v13  ;;  %v2839_v13 = vld [vmem:[#allocation2 + $0x198] sm:$0xff] }
 0x5a2   : > { %v2375_v12 = vpop.f32.mrf.mxu1 }
 0x5a3   : > { %5546 = vmatmul.mubr.msk.f32.gmra.mxu0 %vm1358_vm3, %v2375_v12  ;;  %v5135_v12 = vcombine.low %v7192_v25, %v7194_v59 }
 0x5a4   : > { %v2377_v4 = vpop.f32.mrf.mxu1 }
 0x5a5   : > { %v5128_v4 = vcombine.high %v2839_v13, %v2843_v52 }
 0x5a6   : > { %v2380_v56 = vpop.f32.mrf.mxu1 }
 0x5a7   : > { %5548 = vmatprep.mubr.msk.f32.mxu0 %vm1358_vm3, %v2380_v56  ;;  %v2831_v56 = vld [vmem:[#allocation2 + $0x158] sm:$0xff] }
 0x5a8   : > { %v2382_v58 = vpop.f32.mrf.mxu1 }
 0x5a9   : > { %v2835_v58 = vld [vmem:[#allocation2 + $0x178] sm:$0xff] }
 0x5aa   : > { %v2385_v33 = vpop.f32.mrf.mxu1 }
 0x5ab   : > { %5549 = vmatmul.mubr.msk.f32.gmra.mxu0 %vm1358_vm3, %v2385_v33  ;;  %v5127_v33 = vcombine.low %v2839_v13, %v2843_v52 }
 0x5ac   : > { %v2387_v14 = vpop.f32.mrf.mxu1 }
 0x5ad   : > { %v5120_v14 = vcombine.high %v2831_v56, %v2835_v58 }
 0x5ae   : > { %v2390_v7 = vpop.f32.mrf.mxu1 }
 0x5af   : > { %5551 = vmatprep.mubr.msk.f32.mxu0 %vm1358_vm3, %v2390_v7  ;;  %v2823_v7 = vld [vmem:[#allocation2 + $0x118] sm:$0xff] }
 0x5b0   : > { %v2392_v24 = vpop.f32.mrf.mxu1 }
 0x5b1   : > { %v2827_v24 = vld [vmem:[#allocation2 + $0x138] sm:$0xff] }
 0x5b2   : > { %v2395_v38 = vpop.f32.mrf.mxu1  ;;  %v5111_v25 = vcombine.low %v2823_v7, %v2827_v24 }
 0x5b3   : > { %5552 = vmatmul.mubr.msk.f32.gmra.mxu0 %vm1358_vm3, %v2395_v38  ;;  %v5119_v38 = vcombine.low %v2831_v56, %v2835_v58  ;;  %v2887_v58 = vld [vmem:[#allocation2 + $0x318] sm:$0xff] }
 0x5b4   : > { %v2397_v51 = vpop.f32.mrf.mxu1 }
 0x5b5   : > { %v5112_v51 = vcombine.high %v2823_v7, %v2827_v24  ;;  %v2879_v24 = vld [vmem:[#allocation2 + $0x2d8] sm:$0xff] }
 0x5b6   : > { %v2400_v27 = vpop.f32.mrf.mxu1 }
 0x5b7   : > { %5554 = vmatprep.mubr.msk.f32.mxu0 %vm1358_vm3, %v2400_v27  ;;  %v2815_v27 = vld [vmem:[#allocation2 + $0xd8] sm:$0xff] }
 0x5b8   : > { %v2402_v5 = vpop.f32.mrf.mxu1 }
 0x5b9   : > { %v2819_v5 = vld [vmem:[#allocation2 + $0xf8] sm:$0xff] }
 0x5ba   : > { %v2405_v53 = vpop.f32.mrf.mxu1  ;;  %v5104_v59 = vcombine.high %v2815_v27, %v2819_v5 }
 0x5bb   : > { %5555 = vmatmul.mubr.msk.f32.gmra.mxu0 %vm1358_vm3, %v2405_v53  ;;  %v2807_v53 = vld [vmem:[#allocation2 + $0x98] sm:$0xff] }
 0x5bc   : > { %v2407_v42 = vpop.f32.mrf.mxu1 }
 0x5bd   : > { %v2811_v42 = vld [vmem:[#allocation2 + $0xb8] sm:$0xff] }
 0x5be   : > { %v2410_v23 = vpop.f32.mrf.mxu1 }
 0x5bf   : > { %5557 = vmatprep.mubr.msk.f32.mxu0 %vm1358_vm3, %v2410_v23  ;;  %v5103_v23 = vcombine.low %v2815_v27, %v2819_v5  ;;  %v2871_v5 = vld [vmem:[#allocation2 + $0x298] sm:$0xff] }
 0x5c0   : > { %v2412_v11 = vpop.f32.mrf.mxu1 }
 0x5c1   : > { %v5096_v11 = vcombine.high %v2807_v53, %v2811_v42 }
 0x5c2   : > { %v2415_v28 = vpop.f32.mrf.mxu1 }
 0x5c3   : > { %5558 = vmatmul.mubr.msk.f32.gmra.mxu0 %vm1358_vm3, %v2415_v28  ;;  %v2799_v28 = vld [vmem:[#allocation2 + $0x58] sm:$0xff] }
 0x5c4   : > { %v2417_v21 = vpop.f32.mrf.mxu1 }
 0x5c5   : > { %v2803_v21 = vld [vmem:[#allocation2 + $0x78] sm:$0xff] }
 0x5c6   : > { %v2420_v1 = vpop.f32.mrf.mxu1 }
 0x5c7   : > { %5560 = vmatprep.mubr.msk.f32.mxu0 %vm1358_vm3, %v2420_v1  ;;  %v5095_v1 = vcombine.low %v2807_v53, %v2811_v42  ;;  %v2863_v42 = vld [vmem:[#allocation2 + $0x258] sm:$0xff] }
 0x5c8   : > { %v2422_v2 = vpop.f32.mrf.mxu1 }
 0x5c9   : > { %v5088_v2 = vcombine.high %v2799_v28, %v2803_v21 }
 0x5ca   : > { %v2425_v10 = vpop.f32.mrf.mxu1 }
 0x5cb   : > { %5561 = vmatmul.mubr.msk.f32.gmra.mxu0 %vm1358_vm3, %v2425_v10  ;;  %v2791_v10 = vld [vmem:[#allocation2 + $0x18] sm:$0xff] }
 0x5cc   : > { %v2427_v19 = vpop.f32.mrf.mxu1 }
 0x5cd   : > { %v2795_v19 = vld [vmem:[#allocation2 + $0x38] sm:$0xff] }
 0x5ce   : > { %v2430_v57 = vpop.f32.mrf.mxu1 }
 0x5cf   : > { %5563 = vmatprep.mubr.msk.f32.mxu0 %vm1358_vm3, %v2430_v57  ;;  %v5087_v57 = vcombine.low %v2799_v28, %v2803_v21  ;;  %v2855_v21 = vld [vmem:[#allocation2 + $0x218] sm:$0xff] }
 0x5d0   : > { %v2432_v3 = vpop.f32.mrf.mxu1 }
 0x5d1   : > { %v2911_v3 = vld [vmem:[#allocation2 + $0x3d8] sm:$0xff] }
 0x5d2   : > { %v2435_v37 = vpop.f32.mrf.mxu1 }
 0x5d3   : > { %5564 = vmatmul.mubr.msk.f32.gmra.mxu0 %vm1358_vm3, %v2435_v37  ;;  %v2915_v37 = vld [vmem:[#allocation2 + $0x3f8] sm:$0xff] }
 0x5d4   : > { %v2437_v16 = vpop.f32.mrf.mxu1  ;;  %v5199_v13 = vcombine.low %v2911_v3, %v2915_v37 }
 0x5d5   : > { %v5079_v16 = vcombine.low %v2791_v10, %v2795_v19 }
 0x5d6   : > { %v2440_v46 = vpop.f32.mrf.mxu1 }
 0x5d7   : > { %5566 = vmatprep.mubr.msk.f32.mxu0 %vm1358_vm3, %v2440_v46  ;;  %v5200_v46 = vcombine.high %v2911_v3, %v2915_v37 }
 0x5d8   : > { %v2442_v61 = vpop.f32.mrf.mxu1 }
 0x5d9   : > { %v2903_v61 = vld [vmem:[#allocation2 + $0x398] sm:$0xff] }
 0x5da   : > { %v2445_v9 = vpop.f32.mrf.mxu1 }
 0x5db   : > { %5567 = vmatmul.mubr.msk.f32.gmra.mxu0 %vm1358_vm3, %v2445_v9  ;;  %v2907_v9 = vld [vmem:[#allocation2 + $0x3b8] sm:$0xff] }
 0x5dc   : > { %v2447_v43 = vpop.f32.mrf.mxu1  ;;  %3673 = vmatprep.mubr.bf16.mxu0 %v7149_v30  ;;  %v5192_v52 = vcombine.high %v2903_v61, %v2907_v9 }
 0x5dd   : > { %v2895_v43 = vld [vmem:[#allocation2 + $0x358] sm:$0xff] }
 0x5df   : > { %3674 = vmatmul.mubr.bf16.vlgmr.msra.gmra.mxu0 %v7151_v55 }
 0x5e0   : > { %3748 = vmatpush1.bf16.msra.mxu0 %v5135_v12  ;;  %3683 = vmatprep.mubr.bf16.mxu0 %v7163_v62  ;;  %v2899_v12 = vld [vmem:[#allocation2 + $0x378] sm:$0xff] }
 0x5e1   : > { %3749 = vmatprep.subr.bf16.mxu0 %v5128_v4  ;;  %v5191_v4 = vcombine.low %v2903_v61, %v2907_v9  ;;  %v5184_v56 = vcombine.high %v2895_v43, %v2899_v12 }
 0x5e4   : > { %3750 = vmatpush1.bf16.msra.mxu0 %v5127_v33  ;;  %v2891_v33 = vld [vmem:[#allocation2 + $0x338] sm:$0xff] }
 0x5e5   : > { %3751 = vmatprep.subr.bf16.mxu0 %v5120_v14  ;;  %v5183_v14 = vcombine.low %v2895_v43, %v2899_v12  ;;  %v5176_v7 = vcombine.high %v2887_v58, %v2891_v33 }
 0x5e7   : > { %3684 = vmatmul.mubr.bf16.gmra.mxu0 %v7166_v32 }
 0x5e8   : > { %3752 = vmatpush1.bf16.msra.mxu0 %v5119_v38  ;;  %3779 = vmatprep.mubr.bf16.mxu0 %v7149_v30  ;;  %v5080_v30 = vcombine.high %v2791_v10, %v2795_v19  ;;  %v2883_v38 = vld [vmem:[#allocation2 + $0x2f8] sm:$0xff] }
 0x5e9   : > { %3753 = vmatprep.subr.bf16.mxu0 %v5112_v51  ;;  %v5175_v51 = vcombine.low %v2887_v58, %v2891_v33  ;;  %v5168_v27 = vcombine.high %v2879_v24, %v2883_v38 }
 0x5ec   : > { %3754 = vmatpush1.bf16.msra.mxu0 %v5111_v25  ;;  %v2875_v25 = vld [vmem:[#allocation2 + $0x2b8] sm:$0xff] }
 0x5ed   : > { %3755 = vmatprep.subr.bf16.mxu0 %v5104_v59  ;;  %v5167_v59 = vcombine.low %v2879_v24, %v2883_v38  ;;  %v5160_v53 = vcombine.high %v2871_v5, %v2875_v25  ;;  %v3622_v24 = vpop.f32.mrf.mxu1 }
 0x5f0   : > { %3756 = vmatpush1.bf16.msra.mxu0 %v5103_v23  ;;  %v2867_v23 = vld [vmem:[#allocation2 + $0x278] sm:$0xff] }
 0x5f1   : > { %3757 = vmatprep.subr.bf16.mxu0 %v5096_v11  ;;  %v5159_v11 = vcombine.low %v2871_v5, %v2875_v25  ;;  %v5152_v28 = vcombine.high %v2863_v42, %v2867_v23 }
 0x5f4   : > { %3758 = vmatpush1.bf16.msra.mxu0 %v5095_v1  ;;  %v2859_v1 = vld [vmem:[#allocation2 + $0x238] sm:$0xff] }
 0x5f5   : > { %3759 = vmatprep.subr.bf16.mxu0 %v5088_v2  ;;  %v5151_v2 = vcombine.low %v2863_v42, %v2867_v23  ;;  %v5144_v10 = vcombine.high %v2855_v21, %v2859_v1  ;;  %v5143_v19 = vcombine.low %v2855_v21, %v2859_v1 }
 0x5f8   : > { %3760 = vmatpush1.bf16.msra.mxu0 %v5087_v57 }
 0x5f9   : > { %3761 = vmatprep.subr.bf16.mxu0 %v5080_v30 }
 0x5fc   : > { %3762 = vmatpush1.bf16.msra.mxu0 %v5079_v16 }
 0x5fd   : > { %3763 = vmatprep.subr.bf16.mxu0 %v5200_v46 }
 0x600   : > { %3764 = vmatpush2.bf16.msra.mxu0 %v5199_v13 }
 0x601   : > { %3765 = vmatprep.subr.bf16.mxu0 %v5192_v52 }
 0x604   : > { %3766 = vmatpush2.bf16.msra.mxu0 %v5191_v4 }
 0x605   : > { %3767 = vmatprep.subr.bf16.mxu0 %v5184_v56 }
 0x608   : > { %3768 = vmatpush2.bf16.msra.mxu0 %v5183_v14 }
 0x609   : > { %3769 = vmatprep.subr.bf16.mxu0 %v5176_v7 }
 0x60c   : > { %3770 = vmatpush2.bf16.msra.mxu0 %v5175_v51 }
 0x60d   : > { %3771 = vmatprep.subr.bf16.mxu0 %v5168_v27  ;;  %v3624_v27 = vpop.f32.mrf.mxu1 }
 0x60f   : > { %v3626_v25 = vpop.f32.mrf.mxu1 }
 0x610   : > { %3772 = vmatpush2.bf16.msra.mxu0 %v5167_v59 }
 0x611   : > { %3773 = vmatprep.subr.bf16.mxu0 %v5160_v53  ;;  %v3628_v53 = vpop.f32.mrf.mxu1 }
 0x614   : > { %3774 = vmatpush2.bf16.msra.mxu0 %v5159_v11  ;;  %v3632_v11 = vpop.f32.mrf.mxu1 }
 0x615   : > { %3775 = vmatprep.subr.bf16.mxu0 %v5152_v28 }
 0x616   : > { %v3634_v21 = vpop.f32.mrf.mxu1 }
 0x618   : > { %3776 = vmatpush2.bf16.msra.mxu0 %v5151_v2  ;;  %v7283_v2 = vpop.f32.mrf.mxu1 }
 0x619   : > { %3777 = vmatprep.subr.bf16.mxu0 %v5144_v10 }
 0x61a   : > { %v7289_v45 = vpop.f32.mrf.mxu1 }
 0x61c   : > { %3778 = vmatpush2.bf16.msra.mxu0 %v5143_v19 }
 0x61f   : > { %3780 = vmatmul.mubr.bf16.vlgmr.msra.gmra.mxu0 %v7151_v55 }
 0x620   : > { %3789 = vmatprep.mubr.bf16.mxu0 %v7163_v62 }
 0x623   : > { %v7225_v57 = vpop.f32.mrf.mxu0 }
 0x624   : > { %7993 = vst [vmem:[#allocation21_spill] sm:$0xff] %v7225_v57 }
 0x625   : > { %v7227_v30 = vpop.f32.mrf.mxu0 }
 0x626   : > { %7994 = vst [vmem:[#allocation22_spill] sm:$0xff] %v7227_v30 }
 0x627   : > { %3790 = vmatmul.mubr.bf16.gmra.mxu0 %v7166_v32 }
 0x62b   : > { %v7229_v3 = vpop.f32.mrf.mxu0 }
 0x62c   : > { %7995 = vst [vmem:[#allocation23_spill] sm:$0xff] %v7229_v3 }
 0x62d   : > { %v7231_v37 = vpop.f32.mrf.mxu0 }
 0x62e   : > { %7996 = vst [vmem:[#allocation24_spill] sm:$0xff] %v7231_v37 }
 0x633   : > { %v7233_v16 = vpop.f32.mrf.mxu0 }
 0x634   : > { %7997 = vst [vmem:[#allocation25_spill] sm:$0xff] %v7233_v16 }
 0x635   : > { %v7235_v46 = vpop.f32.mrf.mxu0 }
 0x636   : > { %7998 = vst [vmem:[#allocation26_spill] sm:$0xff] %v7235_v46 }
 0x63b   : > { %v7237_v61 = vpop.f32.mrf.mxu0 }
 0x63c   : > { %7999 = vst [vmem:[#allocation27_spill] sm:$0xff] %v7237_v61 }
 0x63d   : > { %v7239_v9 = vpop.f32.mrf.mxu0 }
 0x63e   : > { %8000 = vst [vmem:[#allocation28_spill] sm:$0xff] %v7239_v9 }
 0x643   : > { %v7241_v55 = vpop.f32.mrf.mxu0 }
 0x644   : > { %8001 = vst [vmem:[#allocation29_spill] sm:$0xff] %v7241_v55 }
 0x645   : > { %v7243_v62 = vpop.f32.mrf.mxu0 }
 0x646   : > { %8002 = vst [vmem:[#allocation30_spill] sm:$0xff] %v7243_v62 }
 0x64b   : > { %v7245_v32 = vpop.f32.mrf.mxu0 }
 0x64c   : > { %8003 = vst [vmem:[#allocation31_spill] sm:$0xff] %v7245_v32 }
 0x64d   : > { %v7247_v13 = vpop.f32.mrf.mxu0 }
 0x64e   : > { %8004 = vst [vmem:[#allocation32_spill] sm:$0xff] %v7247_v13 }
 0x653   : > { %v7249_v52 = vpop.f32.mrf.mxu0 }
 0x654   : > { %8005 = vst [vmem:[#allocation13_spill] sm:$0xff] %v7249_v52 }
 0x655   : > { %v7251_v43 = vpop.f32.mrf.mxu0 }
 0x656   : > { %8006 = vst [vmem:[#allocation14_spill] sm:$0xff] %v7251_v43 }
 0x65b   : > { %v7253_v12 = vpop.f32.mrf.mxu0 }
 0x65c   : > { %8007 = vst [vmem:[#allocation33_spill] sm:$0xff] %v7253_v12 }
 0x65d   : > { %v7255_v4 = vpop.f32.mrf.mxu0 }
 0x65e   : > { %8008 = vst [vmem:[#allocation34_spill] sm:$0xff] %v7255_v4 }
 0x663   : > { %v7257_v56 = vpop.f32.mrf.mxu0 }
 0x664   : > { %8009 = vst [vmem:[#allocation15_spill] sm:$0xff] %v7257_v56 }
 0x665   : > { %v7259_v58 = vpop.f32.mrf.mxu0 }
 0x666   : > { %8010 = vst [vmem:[#allocation16_spill] sm:$0xff] %v7259_v58 }
 0x66b   : > { %v7261_v33 = vpop.f32.mrf.mxu0 }
 0x66c   : > { %8011 = vst [vmem:[#allocation17_spill] sm:$0xff] %v7261_v33 }
 0x66d   : > { %v7263_v14 = vpop.f32.mrf.mxu0 }
 0x66e   : > { %8012 = vst [vmem:[#allocation18_spill] sm:$0xff] %v7263_v14 }
 0x673   : > { %v7265_v7 = vpop.f32.mrf.mxu0 }
 0x674   : > { %8013 = vst [vmem:[#allocation19_spill] sm:$0xff] %v7265_v7  ;;  %v7300_v7 = vshrl.u32 %v7868_v60, 7 }
 0x675   : > { %v7267_v38 = vpop.f32.mrf.mxu0 }
 0x676   : > { %8014 = vst [vmem:[#allocation20_spill] sm:$0xff] %v7267_v38  ;;  %v7320_v62 = vadd.s32 24, %v7300_v7 }
 0x67b   : > { %v7269_v51 = vpop.f32.mrf.mxu0 }
 0x67c   : > { %8015 = vst [vmem:[#allocation38_spill] sm:$0xff] %v7269_v51  ;;  %v3728_v51 = vpop.f32.mrf.mxu1 }
 0x67d   : > { %v7271_v5 = vpop.f32.mrf.mxu0 }
 0x67e   : > { %8016 = vst [vmem:[#allocation37_spill] sm:$0xff] %v7271_v5 }
 0x683   : > { %v7273_v59 = vpop.f32.mrf.mxu0 }
 0x684   : > { %8017 = vst [vmem:[#allocation40_spill] sm:$0xff] %v7273_v59 }
 0x685   : > { %v7275_v42 = vpop.f32.mrf.mxu0 }
 0x686   : > { %8018 = vst [vmem:[#allocation39_spill] sm:$0xff] %v7275_v42 }
 0x68b   : > { %v7277_v23 = vpop.f32.mrf.mxu0 }
 0x68c   : > { %8019 = vst [vmem:[#allocation41_spill] sm:$0xff] %v7277_v23  ;;  %v7294_v23 = vand.u32 127, %v7868_v60  ;;  %v7315_v60 = vadd.s32 16, %v7300_v7 }
 0x68d   : > { %v7279_v28 = vpop.f32.mrf.mxu0 }
 0x68e   : > { %8020 = vst [vmem:[#allocation42_spill] sm:$0xff] %v7279_v28  ;;  %v3730_v28 = vpop.f32.mrf.mxu1  ;;  %v3814_v5 = vshra.s32 %v7294_v23, 5  ;;  %v3810_v38 = vadd.s32 512, %v7294_v23  ;;  %v3811_v56 = vadd.s32 640, %v7294_v23 }
 0x690   : > { %vm3822_vm4 = vcmp.eq.s32.totalorder %v3814_v5, %v7300_v7  ;;  %v3819_v58 = vshra.s32 %v3811_v56, 5  ;;  %vm3838_vm8 = vcmp.eq.s32.totalorder %v3814_v5, %v7315_v60  ;;  %v3808_v56 = vadd.s32 256, %v7294_v23 }
 0x691   : > { %v3854_v43 = vsel %vm3822_vm4, %v3622_v24, 0.0  ;;  %v3870_v61 = vsel %vm3838_vm8, %v3632_v11, 0.0  ;;  %vm3846_vm14 = vcmp.eq.s32.totalorder %v3814_v5, %v7320_v62 }
 0x692   : > { %vm3827_vm11 = vcmp.eq.s32.totalorder %v3819_v58, %v7300_v7  ;;  %vm3843_vm0 = vcmp.eq.s32.totalorder %v3819_v58, %v7315_v60  ;;  %v3816_v37 = vshra.s32 %v3808_v56, 5  ;;  %vm3851_vm8 = vcmp.eq.s32.totalorder %v3819_v58, %v7320_v62 }
 0x693   : > { %v7281_v1 = vpop.f32.mrf.mxu0  ;;  %v3859_v46 = vsel %vm3827_vm11, %v3730_v28, 0.0 }
 0x694   : > { %8021 = vst [vmem:[#allocation44_spill] sm:$0xff] %v7281_v1  ;;  %v3807_v1 = vadd.s32 128, %v7294_v23  ;;  %vm3848_vm11 = vcmp.eq.s32.totalorder %v3816_v37, %v7320_v62 }
 0x695   : > { %v7285_v10 = vpop.f32.mrf.mxu0 }
 0x696   : > { %8022 = vst [vmem:[#allocation43_spill] sm:$0xff] %v7285_v10  ;;  %v3815_v33 = vshra.s32 %v3807_v1, 5  ;;  %v3818_v1 = vshra.s32 %v3810_v38, 5 }
 0x698   : > { %vm3823_vm5 = vcmp.eq.s32.totalorder %v3815_v33, %v7300_v7  ;;  %vm3839_vm9 = vcmp.eq.s32.totalorder %v3815_v33, %v7315_v60  ;;  %vm3826_vm10 = vcmp.eq.s32.totalorder %v3818_v1, %v7300_v7  ;;  %vm3842_vm15 = vcmp.eq.s32.totalorder %v3818_v1, %v7315_v60 }
 0x699   : > { %v3855_v32 = vsel %vm3823_vm5, %v3624_v27, 0.0  ;;  %v3871_v9 = vsel %vm3839_vm9, %v3634_v21, 0.0  ;;  %v3858_v16 = vsel %vm3826_vm10, %v3728_v51, 0.0  ;;  %vm3847_vm1 = vcmp.eq.s32.totalorder %v3815_v33, %v7320_v62 }
 0x69a   : > { %vm3850_vm4 = vcmp.eq.s32.totalorder %v3818_v1, %v7320_v62  ;;  %vm3824_vm5 = vcmp.eq.s32.totalorder %v3816_v37, %v7300_v7 }
 0x69b   : > { %v7287_v19 = vpop.f32.mrf.mxu0 }
 0x69c   : > { %8023 = vst [vmem:[#allocation46_spill] sm:$0xff] %v7287_v19  ;;  %v3732_v19 = vpop.f32.mrf.mxu1 }
 0x69d   : > { %v7291_v59 = vpop.f32.mrf.mxu0 }
 0x69e   : > { %8024 = vst [vmem:[#allocation45_spill] sm:$0xff] %v7291_v59  ;;  %v7306_v59 = vadd.s32 8, %v7300_v7  ;;  %v3734_v12 = vpop.f32.mrf.mxu1 }
 0x69f   : > { %v7296_v42 = vpop.f32.mrf.mxu0 }
 0x6a0   : > { %vm3830_vm6 = vcmp.eq.s32.totalorder %v3814_v5, %v7306_v59  ;;  %vm3831_vm7 = vcmp.eq.s32.totalorder %v3815_v33, %v7306_v59  ;;  %v3738_v52 = vpop.f32.mrf.mxu1  ;;  %vm3834_vm12 = vcmp.eq.s32.totalorder %v3818_v1, %v7306_v59  ;;  %vm3835_vm13 = vcmp.eq.s32.totalorder %v3819_v58, %v7306_v59 }
 0x6a1   : > { %v7302_v10 = vpop.f32.mrf.mxu0  ;;  %v3862_v13 = vsel %vm3830_vm6, %v3626_v25, 0.0  ;;  %v3863_v55 = vsel %vm3831_vm7, %v3628_v53, 0.0  ;;  %v3809_v25 = vadd.s32 384, %v7294_v23  ;;  %v3866_v3 = vsel %vm3834_vm12, %v3732_v19, 0.0 }
 0x6a2   : > { %v3886_v38 = vadd.f32 %v3862_v13, %v3854_v43  ;;  %v3740_v27 = vpop.f32.mrf.mxu1  ;;  %v3895_v53 = vadd.f32 %v3863_v55, %v3855_v32  ;;  %v3867_v31 = vsel %vm3835_vm13, %v3734_v12, 0.0  ;;  %v3922_v55 = vadd.f32 %v3866_v3, %v3858_v16 }
 0x6a3   : > { %v3679_v14 = vpop.f32.mrf.mxu0  ;;  %v3817_v43 = vshra.s32 %v3809_v25, 5  ;;  %v3931_v32 = vadd.f32 %v3867_v31, %v3859_v46  ;;  %vm3832_vm3 = vcmp.eq.s32.totalorder %v3816_v37, %v7306_v59  ;;  %v3878_v12 = vsel %vm3846_vm14, %v7283_v2, 0.0 }
 0x6a4   : > { %v3887_v57 = vadd.f32 %v3886_v38, %v3870_v61  ;;  %v3742_v13 = vpop.f32.mrf.mxu1  ;;  %v3896_v51 = vadd.f32 %v3895_v53, %v3871_v9  ;;  %v3874_v11 = vsel %vm3842_vm15, %v3738_v52, 0.0  ;;  %v3875_v5 = vsel %vm3843_vm0, %v3740_v27, 0.0 }
 0x6a5   : > { %v3681_v4 = vpop.f32.mrf.mxu0  ;;  %vm3833_vm6 = vcmp.eq.s32.totalorder %v3817_v43, %v7306_v59  ;;  %vm3840_vm7 = vcmp.eq.s32.totalorder %v3816_v37, %v7315_v60  ;;  %v3879_v33 = vsel %vm3847_vm1, %v7289_v45, 0.0  ;;  %vm3825_vm9 = vcmp.eq.s32.totalorder %v3817_v43, %v7300_v7 }
 0x6a6   : > { %v3744_v3 = vpop.f32.mrf.mxu1  ;;  %v3864_v31 = vsel %vm3832_vm3, %v3679_v14, 0.0  ;;  %v3923_v16 = vadd.f32 %v3922_v55, %v3874_v11  ;;  %v3932_v46 = vadd.f32 %v3931_v32, %v3875_v5  ;;  %vm3841_vm10 = vcmp.eq.s32.totalorder %v3817_v43, %v7315_v60 }
 0x6a7   : > { %v3685_v24 = vpop.f32.mrf.mxu0  ;;  %v3882_v9 = vsel %vm3850_vm4, %v3742_v13, 0.0  ;;  %v3856_v52 = vsel %vm3824_vm5, %v7296_v42, 0.0  ;;  %v3865_v28 = vsel %vm3833_vm6, %v3681_v4, 0.0  ;;  %v3883_v2 = vsel %vm3851_vm8, %v3744_v3, 0.0 }
 0x6a8   : > { %v3872_v21 = vsel %vm3840_vm7, %v3685_v24, 0.0  ;;  %v3904_v19 = vadd.f32 %v3864_v31, %v3856_v52  ;;  %vm3849_vm12 = vcmp.eq.s32.totalorder %v3817_v43, %v7320_v62  ;;  %v3812_v58 = vadd.s32 768, %v7294_v23 }
 0x6a9   : > { %v3687_v30 = vpop.f32.mrf.mxu0  ;;  %v3888_v1 = vadd.f32 %v3887_v57, %v3878_v12  ;;  %v3857_v14 = vsel %vm3825_vm9, %v7302_v10, 0.0  ;;  %v3897_v37 = vadd.f32 %v3896_v51, %v3879_v33  ;;  %v3813_v4 = vadd.s32 896, %v7294_v23 }
 0x6aa   : > { %v3873_v56 = vsel %vm3841_vm10, %v3687_v30, 0.0  ;;  %v3913_v27 = vadd.f32 %v3865_v28, %v3857_v14  ;;  %v3905_v25 = vadd.f32 %v3904_v19, %v3872_v21  ;;  %v3924_v24 = vadd.f32 %v3923_v16, %v3882_v9 }
 0x6ab   : > { %v3689_v61 = vpop.f32.mrf.mxu0  ;;  %v3933_v53 = vadd.f32 %v3932_v46, %v3883_v2  ;;  %v3820_v11 = vshra.s32 %v3812_v58, 5  ;;  %v3889_v57 = vrot.slane %v3888_v1, 4  ;;  %v3898_v12 = vrot.slane %v3897_v37, 4 }
 0x6ac   : > { %v3880_v38 = vsel %vm3848_vm11, %v3689_v61, 0.0  ;;  %v3914_v55 = vadd.f32 %v3913_v27, %v3873_v56  ;;  %v3821_v43 = vshra.s32 %v3813_v4, 5  ;;  %v3925_v30 = vrot.slane %v3924_v24, 4 }
 0x6ad   : > { %v3691_v45 = vpop.f32.mrf.mxu0  ;;  %v3906_v32 = vadd.f32 %v3905_v25, %v3880_v38  ;;  %vm3836_vm13 = vcmp.eq.s32.totalorder %v3820_v11, %v7306_v59  ;;  %v3934_v51 = vrot.slane %v3933_v53, 4  ;;  %vm3828_vm14 = vcmp.eq.s32.totalorder %v3820_v11, %v7300_v7 }
 0x6ae   : > { %v3881_v13 = vsel %vm3849_vm12, %v3691_v45, 0.0  ;;  %vm3837_vm15 = vcmp.eq.s32.totalorder %v3821_v43, %v7306_v59  ;;  %vm3844_vm0 = vcmp.eq.s32.totalorder %v3820_v11, %v7315_v60  ;;  %v3890_v33 = vadd.f32 %v3889_v57, %v3888_v1 }
 0x6af   : > { %v3915_v3 = vadd.f32 %v3914_v55, %v3881_v13  ;;  %v3907_v61 = vrot.slane %v3906_v32, 4  ;;  %v3899_v16 = vadd.f32 %v3898_v12, %v3897_v37  ;;  %vm3829_vm1 = vcmp.eq.s32.totalorder %v3821_v43, %v7300_v7 }
 0x6b0   : > { %vm3845_vm3 = vcmp.eq.s32.totalorder %v3821_v43, %v7315_v60  ;;  %v3926_v52 = vadd.f32 %v3925_v30, %v3924_v24  ;;  %v3935_v19 = vadd.f32 %v3934_v51, %v3933_v53  ;;  %vm3852_vm4 = vcmp.eq.s32.totalorder %v3820_v11, %v7320_v62 }
 0x6b1   : > { %v3916_v46 = vrot.slane %v3915_v3, 4  ;;  %v3908_v45 = vadd.f32 %v3907_v61, %v3906_v32  ;;  %vm3853_vm5 = vcmp.eq.s32.totalorder %v3821_v43, %v7320_v62  ;;  %v3891_v25 = vrot.slane %v3890_v33, 2 }
 0x6b2   : > { %v3900_v60 = vrot.slane %v3899_v16, 2  ;;  %v3927_v4 = vrot.slane %v3926_v52, 2  ;;  %v3936_v24 = vrot.slane %v3935_v19, 2  ;;  %vm4072_vm6 = vcmask 1040384  }
 0x6b3   : > { %v3917_v56 = vadd.f32 %v3916_v46, %v3915_v3  ;;  %v3909_v13 = vrot.slane %v3908_v45, 2  ;;  %vm5856_vm7 = vmmov 0   ;;  %vm4705_vm8 = vcmask 523264  }
 0x6b4   : > { %v3901_v3 = vadd.f32 %v3900_v60, %v3899_v16  ;;  %v3928_v30 = vadd.f32 %v3927_v4, %v3926_v52  ;;  %v3937_v51 = vadd.f32 %v3936_v24, %v3935_v19  ;;  %v3985_v19 = vld [vmem:[%s7767_s8 + $0x38] sm:$0xff]  ;;  %vm4714_vm9 = vcmask 785408  }
 0x6b5   : > { %v3918_v12 = vrot.slane %v3917_v56, 2  ;;  %v3910_v61 = vadd.f32 %v3909_v13, %v3908_v45  ;;  %v3984_v45 = vld [vmem:[%s7767_s8 + $0x30] sm:$0xff]  ;;  %4025 = vmatprep.subr.mxu1 %v3985_v19  ;;  %v3981_v24 = vld [vmem:[%s7767_s8 + $0x18] sm:$0xff]  ;;  %vm4763_vm10 = vcmask 80896  }
 0x6b6   : > { %4026 = vmatpush1.msra.mxu1 %v3984_v45 }
 0x6b7   : > { %v3919_v43 = vadd.f32 %v3918_v12, %v3917_v56  ;;  %v3983_v56 = vld [vmem:[%s7767_s8 + $0x28] sm:$0xff] }
 0x6b8   : > { %4027 = vmatprep.subr.mxu1 %v3983_v56 }
 0x6df   : > { %v3781_v42 = vpop.f32.mrf.mxu0 }
 0x6e0   : > { %v3860_v28 = vsel %vm3828_vm14, %v3781_v42, 0.0 }
 0x6e1   : > { %v3783_v5 = vpop.f32.mrf.mxu0 }
 0x6e2   : > { %v3861_v59 = vsel %vm3829_vm1, %v3783_v5, 0.0 }
 0x6e3   : > { %v3785_v10 = vpop.f32.mrf.mxu0 }
 0x6e4   : > { %v3868_v31 = vsel %vm3836_vm13, %v3785_v10, 0.0  ;;  %v3892_v10 = vadd.f32 %v3891_v25, %v3890_v33 }
 0x6e5   : > { %v3787_v23 = vpop.f32.mrf.mxu0  ;;  %v3940_v58 = vadd.f32 %v3868_v31, %v3860_v28  ;;  %v3902_v28 = vrot.slane %v3901_v3, 1 }
 0x6e6   : > { %v3869_v21 = vsel %vm3837_vm15, %v3787_v23, 0.0 }
 0x6e7   : > { %v3791_v9 = vpop.f32.mrf.mxu0  ;;  %v3949_v38 = vadd.f32 %v3869_v21, %v3861_v59  ;;  %v3929_v21 = vrot.slane %v3928_v30, 1  ;;  %v3903_v16 = vadd.f32 %v3902_v28, %v3901_v3  ;;  %v3990_v28 = vsub.s32 0, %v7300_v7 }
 0x6e8   : > { %v3876_v2 = vsel %vm3844_vm0, %v3791_v9, 0.0  ;;  %v3893_v9 = vrot.slane %v3892_v10, 1 }
 0x6e9   : > { %v3793_v14 = vpop.f32.mrf.mxu0  ;;  %v3941_v37 = vadd.f32 %v3940_v58, %v3876_v2  ;;  %v3938_v2 = vrot.slane %v3937_v51, 1  ;;  %v3911_v58 = vrot.slane %v3910_v61, 1  ;;  %v3930_v52 = vadd.f32 %v3929_v21, %v3928_v30  ;;  %v3979_v30 = vld [vmem:[%s7767_s8 + $0x8] sm:$0xff]  ;;  %v3986_v21 = vld [vmem:[%s7768_s9] sm:$0x3] }
 0x6ea   : > { %v3877_v1 = vsel %vm3845_vm3, %v3793_v14, 0.0  ;;  %v3894_v33 = vadd.f32 %v3893_v9, %v3892_v10 }
 0x6eb   : > { %v3795_v27 = vpop.f32.mrf.mxu0  ;;  %v3950_v53 = vadd.f32 %v3949_v38, %v3877_v1  ;;  %v3920_v1 = vrot.slane %v3919_v43, 1  ;;  %v3912_v25 = vadd.f32 %v3911_v58, %v3910_v61  ;;  %v3991_v58 = vrot.slane %v3986_v21, %v3990_v28 }
 0x6ec   : > { %v3884_v42 = vsel %vm3852_vm4, %v3795_v27, 0.0  ;;  %v3939_v27 = vadd.f32 %v3938_v2, %v3937_v51  ;;  %v3978_v51 = vld [vmem:[%s7767_s8] sm:$0xff]  ;;  %v3994_v2 = vsub.s32 1, %v7300_v7 }
 0x6ed   : > { %v3942_v55 = vadd.f32 %v3941_v37, %v3884_v42  ;;  %v3797_v32 = vpop.f32.mrf.mxu0  ;;  %v3982_v42 = vld [vmem:[%s7767_s8 + $0x20] sm:$0xff]  ;;  %v3921_v13 = vadd.f32 %v3920_v1, %v3919_v43 }
 0x6ee   : > { %v3885_v57 = vsel %vm3853_vm5, %v3797_v32, 0.0  ;;  %v3980_v32 = vld [vmem:[%s7767_s8 + $0x10] sm:$0xff]  ;;  %4028 = vmatpush1.msra.mxu1 %v3982_v42  ;;  %v3959_v12 = vadd.f32 %v3939_v27, %v3903_v16 }
 0x6ef   : > { %v3943_v11 = vrot.slane %v3942_v55, 4  ;;  %v3951_v5 = vadd.f32 %v3950_v53, %v3885_v57  ;;  %v3958_v57 = vadd.f32 %v3930_v52, %v3894_v33  ;;  %4029 = vmatprep.subr.mxu1 %v3981_v24 }
 0x6f0   : > { %4030 = vmatpush1.msra.mxu1 %v3980_v32 }
 0x6f1   : > { %v3944_v23 = vadd.f32 %v3943_v11, %v3942_v55  ;;  %v3952_v62 = vrot.slane %v3951_v5, 4  ;;  %4031 = vmatprep.subr.mxu1 %v3979_v30 }
 0x6f2   : > { %4032 = vmatpush1.msra.mxu1 %v3978_v51 }
 0x6f3   : > { %v3945_v31 = vrot.slane %v3944_v23, 2  ;;  %v3953_v46 = vadd.f32 %v3952_v62, %v3951_v5  ;;  %5569 = vmatprep.subr.mxu1 %v7992_v47  ;;  %v3975_v62 = vld [vmem:[%s7766_s7] sm:$0x1] }
 0x6f5   : > { %v3946_v14 = vadd.f32 %v3945_v31, %v3944_v23  ;;  %v3954_v59 = vrot.slane %v3953_v46, 2 }
 0x6f7   : > { %v3947_v38 = vrot.slane %v3946_v14, 1  ;;  %v3955_v37 = vadd.f32 %v3954_v59, %v3953_v46 }
 0x6f9   : > { %v3948_v60 = vadd.f32 %v3947_v38, %v3946_v14  ;;  %v3956_v4 = vrot.slane %v3955_v37, 1  ;;  %v3995_v14 = vrot.slane %v3986_v21, %v3994_v2 }
 0x6fb   : > { %v3960_v53 = vadd.f32 %v3948_v60, %v3912_v25  ;;  %v3957_v55 = vadd.f32 %v3956_v4, %v3955_v37 }
 0x6fd   : > { %v3961_v11 = vadd.f32 %v3957_v55, %v3921_v13  ;;  %v3962_v5 = vadd.f32 %v3960_v53, %v3958_v57 }
 0x6ff   : > { %v3963_v10 = vadd.f32 %v3961_v11, %v3959_v12  ;;  %v5854_v11 = vmov 0  }
 0x701   : > { %v3964_v3 = vadd.f32 %v3963_v10, %v3962_v5 }
 0x703   : > { %3966 = vrot.lane.b32.xlu1 %v3964_v3, %s5853_s27 }
 0x775   : > { %v3967_v61 = vpop.permute.xlu1 %3966 }
 0x776   : > { %v3969_v23 = vadd.f32 %v3967_v61, %v3964_v3 }
 0x778   : > { %3971 = vrot.lane.b32.xlu0 %v3969_v23, %s5851_s21 }
 0x7ea   : > { %v3972_v43 = vpop.permute.xlu0 %3971 }
 0x7eb   : > { %v3974_v31 = vadd.f32 %v3972_v43, %v3969_v23 }
 0x7ed   : > { %v3976_v46 = vadd.f32 %v3975_v62, %v3974_v31 }
 0x7ef   : > { %v3977_v9 = vmax.f32 %v3976_v46, 0.0 }
 0x7f1   : > { %5201 = vmatmul.mubr.msk.f32.vlgmr.msra.gmra.mxu1 %vm876_vm2, %v3977_v9 }
 0x7f2   : > { %5577 = vmatprep.mubr.msk.f32.mxu1 %vm5856_vm7, %v7992_v47 }
 0x8b1   : > { %v4067_v59 = vpop.f32.mrf.mxu1 }
 0x8b2   : > { %v4068_v1 = vadd.f32 %v4067_v59, %v3991_v58 }
 0x8b3   : > { %v4069_v38 = vpop.f32.mrf.mxu1 }
 0x8b4   : > { %v4070_v37 = vadd.f32 %v4069_v38, %v3995_v14  ;;  %v4073_v33 = vsel %vm4072_vm6, %v4068_v1, -inf }
 0x8b6   : > { %v4074_v16 = vsel %vm4072_vm6, %v4070_v37, -inf }
 0x8b7   : > { %v4075_v52 = vmax.f32 %v4073_v33, %v4074_v16 }
 0x8b9   : > { %4076 = vmax.xlane.f32.xlu1 %v4075_v52 }
 0x942   : > { %v4077_v19 = vpop.xlane.xlu1 %4076 }
 0x943   : > { %v4078_v45 = vsub.f32 %v4068_v1, %v4077_v19  ;;  %v4079_v56 = vsub.f32 %v4070_v37, %v4077_v19 }
 0x945   : > { %v4080_v27 = vmul.f32 1.442695, %v4078_v45  ;;  %v4082_v25 = vmul.f32 1.442695, %v4079_v56 }
 0x947   : > { %5803 = vpow2.f32 %v4080_v27 }
 0x948   : > { %5805 = vpow2.f32 %v4082_v25 }
 0x954   : > { %v5804_v60 = vpop.eup %5803 }
 0x955   : > { %v5806_v4 = vpop.eup %5805  ;;  %v4084_v42 = vsel %vm4072_vm6, %v5804_v60, 0.0 }
 0x956   : > { %v4085_v24 = vsel %vm4072_vm6, %v5806_v4, 0.0 }
 0x957   : > { %v4086_v13 = vadd.f32 %v4085_v24, %v4084_v42  ;;  %v4454_v24 = vld [vmem:[%s7769_s10 + $0x18] sm:$0xff] }
 0x958   : > { %5570 = vmatpush3.msra.mxu1 %v4454_v24 }
 0x959   : > { %4087 = vadd.xlane.f32.xlu0 %v4086_v13  ;;  %5571 = vmatprep.subr.mxu1 %v7992_v47  ;;  %v4453_v13 = vld [vmem:[%s7769_s10 + $0x10] sm:$0xff] }
 0x95a   : > { %5572 = vmatpush3.msra.mxu1 %v4453_v13 }
 0x95b   : > { %5573 = vmatprep.subr.mxu1 %v7992_v47 }
 0x9e2   : > { %v4088_v53 = vpop.xlane.xlu0 %4087 }
 0x9e3   : > { %5807 = vrcp.f32 %v4088_v53  ;;  %v4452_v53 = vld [vmem:[%s7769_s10 + $0x8] sm:$0xff] }
 0x9e4   : > { %5574 = vmatpush3.msra.mxu1 %v4452_v53 }
 0x9e5   : > { %5575 = vmatprep.subr.mxu1 %v7992_v47 }
 0x9f0   : > { %v5808_v55 = vpop.eup %5807 }
 0x9f1   : > { %v7398_v32 = vmul.f32 %v5808_v55, %v5806_v4  ;;  %v7400_v57 = vmul.f32 %v5808_v55, %v5804_v60  ;;  %v4451_v55 = vld [vmem:[%s7769_s10] sm:$0xff] }
 0x9f2   : > { %5576 = vmatpush3.msra.mxu1 %v4451_v55 }
 0x9f3   : > { %4124 = vxpose.xlu0.b32.start.end [1/1] (short) %v7398_v32, 128  ;;  %4092 = vxpose.xlu1.b32.start.end [1/1] (short) %v7400_v57, 128  ;;  %v4771_v12 = vcombine.low %v7400_v57, %v7398_v32 }
 0xa11   : > { %5610 = vset.pattern.permute.xlu1 %v5854_v11 }
 0xa1c   : > { %5609 = vset.pattern.permute.xlu0 %v5854_v11 }
 0xa6f   : > { %v4108_v5 = vpop.trf.xlu1  ;;  %v4140_v10 = vpop.trf.xlu0 }
 0xa70   : > { %4158 = vperm.xlu0 %5609, %v4108_v5  }
 0xa73   : > { %v4109_v3 = vpop.trf.xlu1  ;;  %v4141_v30 = vpop.trf.xlu0 }
 0xa74   : > { %4163 = vperm.xlu1 %5610, %v4109_v3  }
 0xa77   : > { %v4110_v51 = vpop.trf.xlu1  ;;  %v4142_v23 = vpop.trf.xlu0 }
 0xa78   : > { %4168 = vperm.xlu1 %5610, %v4110_v51   ;;  %v8026_v51 = vld [vmem:[#allocation22_spill] sm:$0xff] }
 0xa7b   : > { %v4111_v61 = vpop.trf.xlu1  ;;  %v4143_v43 = vpop.trf.xlu0 }
 0xa7c   : > { %4173 = vperm.xlu1 %5610, %v4111_v61  }
 0xa7f   : > { %v4112_v62 = vpop.trf.xlu1  ;;  %v4144_v9 = vpop.trf.xlu0 }
 0xa80   : > { %4178 = vperm.xlu0 %5609, %v4112_v62  }
 0xa83   : > { %v4113_v31 = vpop.trf.xlu1  ;;  %v4145_v21 = vpop.trf.xlu0 }
 0xa84   : > { %4183 = vperm.xlu1 %5610, %v4113_v31   ;;  %v8028_v31 = vld [vmem:[#allocation6_spill] sm:$0xff] }
 0xa87   : > { %v4114_v46 = vpop.trf.xlu1  ;;  %v4146_v14 = vpop.trf.xlu0 }
 0xa88   : > { %4188 = vperm.xlu0 %5609, %v4114_v46  }
 0xa8b   : > { %v4115_v28 = vpop.trf.xlu1  ;;  %v4147_v1 = vpop.trf.xlu0 }
 0xa8c   : > { %4193 = vperm.xlu1 %5610, %v4115_v28  }
 0xa8f   : > { %v4116_v2 = vpop.trf.xlu1  ;;  %v4148_v33 = vpop.trf.xlu0 }
 0xa90   : > { %4198 = vperm.xlu0 %5609, %v4116_v2   ;;  %v8030_v2 = vld [vmem:[#allocation5_spill] sm:$0xff] }
 0xa93   : > { %v4117_v58 = vpop.trf.xlu1  ;;  %v4149_v52 = vpop.trf.xlu0 }
 0xa94   : > { %4203 = vperm.xlu1 %5610, %v4117_v58  }
 0xa97   : > { %v4118_v59 = vpop.trf.xlu1  ;;  %v4150_v56 = vpop.trf.xlu0 }
 0xa98   : > { %4208 = vperm.xlu0 %5609, %v4118_v59  }
 0xa9b   : > { %v4119_v38 = vpop.trf.xlu1  ;;  %v4151_v27 = vpop.trf.xlu0 }
 0xa9c   : > { %4213 = vperm.xlu1 %5610, %v4119_v38  }
 0xa9f   : > { %v4120_v37 = vpop.trf.xlu1  ;;  %v4152_v25 = vpop.trf.xlu0 }
 0xaa0   : > { %4218 = vperm.xlu0 %5609, %v4120_v37  }
 0xaa3   : > { %v4121_v16 = vpop.trf.xlu1  ;;  %v4153_v60 = vpop.trf.xlu0 }
 0xaa4   : > { %4223 = vperm.xlu1 %5610, %v4121_v16   ;;  %v8033_v16 = vld [vmem:[#allocation8_spill] sm:$0xff] }
 0xaa7   : > { %v4122_v19 = vpop.trf.xlu1  ;;  %v4154_v4 = vpop.trf.xlu0 }
 0xaa8   : > { %4228 = vperm.xlu0 %5609, %v4122_v19   ;;  %v8034_v19 = vld [vmem:[#allocation25_spill] sm:$0xff] }
 0xaab   : > { %v4123_v45 = vpop.trf.xlu1  ;;  %v4155_v42 = vpop.trf.xlu0 }
 0xaac   : > { %4238 = vperm.xlu0 %5609, %v4140_v10   ;;  %4233 = vperm.xlu1 %5610, %v4123_v45   ;;  %v8025_v10 = vld [vmem:[#allocation21_spill] sm:$0xff] }
 0xab0   : > { %4248 = vperm.xlu0 %5609, %v4142_v23   ;;  %4243 = vperm.xlu1 %5610, %v4141_v30   ;;  %v8027_v23 = vld [vmem:[#allocation24_spill] sm:$0xff] }
 0xab4   : > { %4258 = vperm.xlu0 %5609, %v4144_v9   ;;  %4253 = vperm.xlu1 %5610, %v4143_v43   ;;  %v8029_v9 = vld [vmem:[#allocation23_spill] sm:$0xff] }
 0xab8   : > { %4268 = vperm.xlu0 %5609, %v4146_v14   ;;  %4263 = vperm.xlu1 %5610, %v4145_v21   ;;  %v8031_v14 = vld [vmem:[#allocation7_spill] sm:$0xff] }
 0xabc   : > { %4278 = vperm.xlu0 %5609, %v4148_v33   ;;  %4273 = vperm.xlu1 %5610, %v4147_v1   ;;  %v8032_v1 = vld [vmem:[#allocation26_spill] sm:$0xff] }
 0xac0   : > { %4288 = vperm.xlu0 %5609, %v4150_v56   ;;  %4283 = vperm.xlu1 %5610, %v4149_v52  }
 0xac4   : > { %4298 = vperm.xlu0 %5609, %v4152_v25   ;;  %4293 = vperm.xlu1 %5610, %v4151_v27  }
 0xac8   : > { %4308 = vperm.xlu0 %5609, %v4154_v4   ;;  %4303 = vperm.xlu1 %5610, %v4153_v60   ;;  %v8035_v60 = vld [vmem:[#allocation9_spill] sm:$0xff] }
 0xacc   : > { %4625 = vrot.lane.b32.xlu0 %v7964_v29, %s5855_s19  ;;  %4313 = vperm.xlu1 %5610, %v4155_v42   ;;  %v8036_v42 = vld [vmem:[#allocation28_spill] sm:$0xff] }
 0xad0   : > { %4629 = vrot.lane.b32.xlu0 %v7968_v8, %s5855_s19  ;;  %4627 = vrot.lane.b32.xlu1 %v7965_v20, %s5855_s19 }
 0xad4   : > { %4633 = vrot.lane.b32.xlu0 %v7972_v54, %s5855_s19  ;;  %4631 = vrot.lane.b32.xlu1 %v7969_v40, %s5855_s19 }
 0xad8   : > { %4637 = vrot.lane.b32.xlu0 %v7974_v17, %s5855_s19  ;;  %4635 = vrot.lane.b32.xlu1 %v7973_v18, %s5855_s19 }
 0xadc   : > { %4649 = vrot.lane.b32.xlu0 %v7944_v35, %s5853_s27  ;;  %4639 = vrot.lane.b32.xlu1 %v7975_v26, %s5855_s19 }
 0xae0   : > { %4653 = vrot.lane.b32.xlu0 %v7946_v22, %s5853_s27  ;;  %4651 = vrot.lane.b32.xlu1 %v7945_v48, %s5853_s27 }
 0xae4   : > { %4657 = vrot.lane.b32.xlu0 %v7950_v49, %s5853_s27  ;;  %4655 = vrot.lane.b32.xlu1 %v7947_v34, %s5853_s27 }
 0xae8   : > { %4661 = vrot.lane.b32.xlu0 %v7954_v0, %s5853_s27  ;;  %4659 = vrot.lane.b32.xlu1 %v7951_v36, %s5853_s27 }
 0xaeb   : > { %v4159_v5 = vpop.permute.xlu0 %4158 }
 0xaec   : > { %4673 = vrot.lane.b32.xlu0 %v7958_v6, %s5851_s21  ;;  %4663 = vrot.lane.b32.xlu1 %v7955_v63, %s5853_s27  ;;  %v4316_v61 = vmul.f32 %v4159_v5, %v8026_v51  ;;  %v8038_v5 = vld [vmem:[#allocation27_spill] sm:$0xff] }
 0xaee   : > { %v7474_v58 = vadd.f32 %v4316_v61, %v8030_v2  ;;  %v8039_v61 = vld [vmem:[#allocation11_spill] sm:$0xff] }
 0xaef   : > { %v4164_v47 = vpop.permute.xlu1 %4163 }
 0xaf0   : > { %4677 = vrot.lane.b32.xlu0 %v7962_v15, %s5851_s21  ;;  %4675 = vrot.lane.b32.xlu1 %v7959_v41, %s5851_s21  ;;  %v4317_v3 = vmul.f32 %v8025_v10, %v4164_v47  ;;  %v4380_v27 = vsel %vm876_vm2, %v7474_v58, 0.0  ;;  %v8037_v47 = vld [vmem:[#allocation10_spill] sm:$0xff] }
 0xaf2   : > { %v7470_v46 = vadd.f32 %v4317_v3, %v8028_v31 }
 0xaf3   : > { %v4169_v11 = vpop.permute.xlu1 %4168 }
 0xaf4   : > { %4681 = vrot.lane.b32.xlu0 %v7966_v39, %s5851_s21  ;;  %4679 = vrot.lane.b32.xlu1 %v7963_v50, %s5851_s21  ;;  %v4318_v62 = vmul.f32 %v4169_v11, %v8027_v23  ;;  %v4381_v33 = vsel %vm876_vm2, %v7470_v46, 0.0 }
 0xaf5   : > { %v4382_v13 = vadd.f32 %v4381_v33, %v4380_v27 }
 0xaf6   : > { %v7477_v59 = vadd.f32 %v4318_v62, %v8031_v14  ;;  %v8040_v62 = vld [vmem:[#allocation30_spill] sm:$0xff] }
 0xaf7   : > { %v4174_v30 = vpop.permute.xlu1 %4173 }
 0xaf8   : > { %4683 = vrot.lane.b32.xlu1 %v7967_v44, %s5851_s21  ;;  %v4319_v28 = vmul.f32 %v8029_v9, %v4174_v30  ;;  %v4383_v25 = vsel %vm876_vm2, %v7477_v59, 0.0 }
 0xaf9   : > { %v4384_v3 = vadd.f32 %v4383_v25, %v4382_v13  ;;  %v8043_v25 = vld [vmem:[#allocation32_spill] sm:$0xff] }
 0xafa   : > { %v7483_v52 = vadd.f32 %v4319_v28, %v8033_v16 }
 0xafb   : > { %v4179_v43 = vpop.permute.xlu0 %4178 }
 0xafc   : > { %v4320_v38 = vmul.f32 %v4179_v43, %v8032_v1  ;;  %v4385_v55 = vsel %vm876_vm2, %v7483_v52, 0.0  ;;  %v8041_v1 = vld [vmem:[#allocation12_spill] sm:$0xff] }
 0xafd   : > { %v4386_v9 = vadd.f32 %v4385_v55, %v4384_v3  ;;  %v8044_v55 = vld [vmem:[#allocation31_spill] sm:$0xff] }
 0xafe   : > { %v7491_v4 = vadd.f32 %v4320_v38, %v8035_v60 }
 0xaff   : > { %v4184_v21 = vpop.permute.xlu1 %4183 }
 0xb00   : > { %v4321_v45 = vmul.f32 %v8034_v19, %v4184_v21  ;;  %v4387_v51 = vsel %vm876_vm2, %v7491_v4, 0.0 }
 0xb01   : > { %v4388_v19 = vadd.f32 %v4387_v51, %v4386_v9 }
 0xb02   : > { %v7497_v11 = vadd.f32 %v4321_v45, %v8037_v47 }
 0xb03   : > { %v4189_v37 = vpop.permute.xlu0 %4188 }
 0xb04   : > { %v4322_v24 = vmul.f32 %v4189_v37, %v8036_v42  ;;  %v4389_v21 = vsel %vm876_vm2, %v7497_v11, 0.0  ;;  %v8042_v37 = vld [vmem:[#allocation29_spill] sm:$0xff] }
 0xb06   : > { %v7503_v23 = vadd.f32 %v4322_v24, %v8039_v61  ;;  %v4390_v24 = vadd.f32 %v4389_v21, %v4388_v19  ;;  %v8046_v19 = vld [vmem:[#allocation13_spill] sm:$0xff] }
 0xb07   : > { %v4194_v56 = vpop.permute.xlu1 %4193 }
 0xb08   : > { %v4323_v10 = vmul.f32 %v8038_v5, %v4194_v56  ;;  %v4391_v56 = vsel %vm876_vm2, %v7503_v23, 0.0 }
 0xb0a   : > { %v7509_v38 = vadd.f32 %v4323_v10, %v8041_v1  ;;  %v4392_v10 = vadd.f32 %v4391_v56, %v4390_v24 }
 0xb0b   : > { %v4199_v53 = vpop.permute.xlu0 %4198 }
 0xb0c   : > { %v4324_v43 = vmul.f32 %v4199_v53, %v8040_v62  ;;  %v4393_v13 = vsel %vm876_vm2, %v7509_v38, 0.0 }
 0xb0e   : > { %v7515_v27 = vadd.f32 %v4324_v43, %v7964_v29  ;;  %v8045_v29 = vld [vmem:[#allocation14_spill] sm:$0xff]  ;;  %v4394_v43 = vadd.f32 %v4393_v13, %v4392_v10 }
 0xb0f   : > { %v4204_v30 = vpop.permute.xlu1 %4203  ;;  %v8047_v13 = vld [vmem:[#allocation34_spill] sm:$0xff] }
 0xb10   : > { %v4325_v33 = vmul.f32 %v8042_v37, %v4204_v30  ;;  %v4395_v30 = vsel %vm876_vm2, %v7515_v27, 0.0 }
 0xb12   : > { %v7521_v53 = vadd.f32 %v4325_v33, %v7965_v20  ;;  %v4396_v20 = vadd.f32 %v4395_v30, %v4394_v43 }
 0xb13   : > { %v4209_v28 = vpop.permute.xlu0 %4208 }
 0xb14   : > { %v4326_v42 = vmul.f32 %v4209_v28, %v8043_v25  ;;  %v4397_v9 = vsel %vm876_vm2, %v7521_v53, 0.0 }
 0xb16   : > { %v7527_v51 = vadd.f32 %v4326_v42, %v7968_v8 }
 0xb17   : > { %v4214_v45 = vpop.permute.xlu1 %4213 }
 0xb18   : > { %v4327_v5 = vmul.f32 %v8044_v55, %v4214_v45  ;;  %v4399_v37 = vsel %vm876_vm2, %v7527_v51, 0.0  ;;  %v4398_v45 = vadd.f32 %v4397_v9, %v4396_v20  ;;  %v8049_v9 = vld [vmem:[#allocation33_spill] sm:$0xff] }
 0xb1a   : > { %v7533_v28 = vadd.f32 %v4327_v5, %v7969_v40  ;;  %v4400_v42 = vadd.f32 %v4399_v37, %v4398_v45 }
 0xb1b   : > { %v4219_v3 = vpop.permute.xlu0 %4218 }
 0xb1c   : > { %v4328_v62 = vmul.f32 %v4219_v3, %v8045_v29  ;;  %v4401_v56 = vsel %vm876_vm2, %v7533_v28, 0.0 }
 0xb1d   : > { %v4402_v5 = vadd.f32 %v4401_v56, %v4400_v42  ;;  %v8050_v42 = vld [vmem:[#allocation18_spill] sm:$0xff] }
 0xb1e   : > { %v7538_v33 = vadd.f32 %v4328_v62, %v7972_v54  ;;  %v8048_v62 = vld [vmem:[#allocation16_spill] sm:$0xff] }
 0xb1f   : > { %v4224_v21 = vpop.permute.xlu1 %4223 }
 0xb20   : > { %v4329_v8 = vmul.f32 %v8046_v19, %v4224_v21  ;;  %v4403_v24 = vsel %vm876_vm2, %v7538_v33, 0.0 }
 0xb21   : > { %v4404_v3 = vadd.f32 %v4403_v24, %v4402_v5  ;;  %v8051_v24 = vld [vmem:[#allocation15_spill] sm:$0xff] }
 0xb22   : > { %v7544_v25 = vadd.f32 %v4329_v8, %v7973_v18 }
 0xb23   : > { %v4229_v40 = vpop.permute.xlu0 %4228 }
 0xb24   : > { %v4330_v55 = vmul.f32 %v4229_v40, %v8047_v13  ;;  %v4405_v54 = vsel %vm876_vm2, %v7544_v25, 0.0 }
 0xb25   : > { %v4406_v21 = vadd.f32 %v4405_v54, %v4404_v3 }
 0xb26   : > { %v7552_v10 = vadd.f32 %v4330_v55, %v7974_v17 }
 0xb27   : > { %v4239_v30 = vpop.permute.xlu0 %4238  ;;  %v4234_v29 = vpop.permute.xlu1 %4233 }
 0xb28   : > { %v4407_v18 = vsel %vm876_vm2, %v7552_v10, 0.0  ;;  %v4332_v43 = vmul.f32 %v4239_v30, %v8048_v62  ;;  %v4331_v20 = vmul.f32 %v8049_v9, %v4234_v29 }
 0xb29   : > { %v4408_v8 = vadd.f32 %v4407_v18, %v4406_v21  ;;  %v8052_v18 = vld [vmem:[#allocation20_spill] sm:$0xff] }
 0xb2a   : > { %v4364_v37 = vadd.f32 %v4332_v43, %v7944_v35  ;;  %v7560_v19 = vadd.f32 %v4331_v20, %v7975_v26  ;;  %v8053_v43 = vld [vmem:[#allocation17_spill] sm:$0xff] }
 0xb2b   : > { %v4249_v45 = vpop.permute.xlu0 %4248  ;;  %v4244_v17 = vpop.permute.xlu1 %4243 }
 0xb2c   : > { %v4409_v56 = vsel %vm876_vm2, %v7560_v19, 0.0  ;;  %v4334_v40 = vmul.f32 %v4249_v45, %v8050_v42  ;;  %v4333_v13 = vmul.f32 %v8051_v24, %v4244_v17  ;;  %4569 = vrot.lane.b32.xlu0 %v4364_v37, %s5853_s27  ;;  %v4411_v5 = vsel %vm876_vm2, %v4364_v37, 0.0 }
 0xb2d   : > { %v4410_v55 = vadd.f32 %v4409_v56, %v4408_v8  ;;  %v8054_v56 = vld [vmem:[#allocation37_spill] sm:$0xff] }
 0xb2e   : > { %v4366_v35 = vadd.f32 %v4334_v40, %v7946_v22  ;;  %v4365_v26 = vadd.f32 %v4333_v13, %v7945_v48  ;;  %v8055_v40 = vld [vmem:[#allocation19_spill] sm:$0xff] }
 0xb2f   : > { %v4412_v54 = vadd.f32 %v4411_v5, %v4410_v55  ;;  %v4259_v3 = vpop.permute.xlu0 %4258  ;;  %v4254_v30 = vpop.permute.xlu1 %4253 }
 0xb30   : > { %v4413_v29 = vsel %vm876_vm2, %v4365_v26, 0.0  ;;  %v4336_v62 = vmul.f32 %v4259_v3, %v8052_v18  ;;  %v4335_v9 = vmul.f32 %v8053_v43, %v4254_v30  ;;  %4573 = vrot.lane.b32.xlu0 %v4366_v35, %s5853_s27  ;;  %4571 = vrot.lane.b32.xlu1 %v4365_v26, %s5853_s27  ;;  %v4415_v21 = vsel %vm876_vm2, %v4366_v35, 0.0  ;;  %v8056_v3 = vld [vmem:[#allocation39_spill] sm:$0xff] }
 0xb31   : > { %v4414_v20 = vadd.f32 %v4413_v29, %v4412_v54  ;;  %v8057_v29 = vld [vmem:[#allocation38_spill] sm:$0xff] }
 0xb32   : > { %v4368_v22 = vadd.f32 %v4336_v62, %v7950_v49  ;;  %v4367_v48 = vadd.f32 %v4335_v9, %v7947_v34 }
 0xb33   : > { %v4416_v37 = vadd.f32 %v4415_v21, %v4414_v20  ;;  %v4269_v8 = vpop.permute.xlu0 %4268  ;;  %v4264_v45 = vpop.permute.xlu1 %4263 }
 0xb34   : > { %v4417_v17 = vsel %vm876_vm2, %v4367_v48, 0.0  ;;  %v4338_v42 = vmul.f32 %v4269_v8, %v8054_v56  ;;  %v4337_v24 = vmul.f32 %v8055_v40, %v4264_v45  ;;  %4577 = vrot.lane.b32.xlu0 %v4368_v22, %s5853_s27  ;;  %4575 = vrot.lane.b32.xlu1 %v4367_v48, %s5853_s27  ;;  %v4419_v55 = vsel %vm876_vm2, %v4368_v22, 0.0  ;;  %v8058_v48 = vld [vmem:[#allocation42_spill] sm:$0xff]  ;;  %v8059_v8 = vld [vmem:[#allocation40_spill] sm:$0xff] }
 0xb35   : > { %v4418_v13 = vadd.f32 %v4417_v17, %v4416_v37 }
 0xb36   : > { %v4370_v49 = vadd.f32 %v4338_v42, %v7954_v0  ;;  %v4369_v34 = vadd.f32 %v4337_v24, %v7951_v36 }
 0xb37   : > { %v4420_v5 = vadd.f32 %v4419_v55, %v4418_v13  ;;  %v4279_v35 = vpop.permute.xlu0 %4278  ;;  %v4274_v26 = vpop.permute.xlu1 %4273  ;;  %v8060_v55 = vld [vmem:[#allocation43_spill] sm:$0xff] }
 0xb38   : > { %v4421_v54 = vsel %vm876_vm2, %v4369_v34, 0.0  ;;  %v4340_v30 = vmul.f32 %v4279_v35, %v8056_v3  ;;  %v4339_v18 = vmul.f32 %v8057_v29, %v4274_v26  ;;  %4581 = vrot.lane.b32.xlu0 %v4370_v49, %s5853_s27  ;;  %4579 = vrot.lane.b32.xlu1 %v4369_v34, %s5853_s27  ;;  %v4423_v43 = vsel %vm876_vm2, %v4370_v49, 0.0  ;;  %v8061_v34 = vld [vmem:[#allocation41_spill] sm:$0xff] }
 0xb39   : > { %v4422_v62 = vadd.f32 %v4421_v54, %v4420_v5  ;;  %v8062_v29 = vld [vmem:[#allocation45_spill] sm:$0xff] }
 0xb3a   : > { %v4372_v0 = vadd.f32 %v4340_v30, %v7958_v6  ;;  %v4371_v36 = vadd.f32 %v4339_v18, %v7955_v63 }
 0xb3b   : > { %v4424_v9 = vadd.f32 %v4423_v43, %v4422_v62  ;;  %v4289_v20 = vpop.permute.xlu0 %4288  ;;  %v4284_v21 = vpop.permute.xlu1 %4283  ;;  %v8063_v62 = vld [vmem:[#allocation44_spill] sm:$0xff] }
 0xb3c   : > { %v4425_v22 = vsel %vm876_vm2, %v4371_v36, 0.0  ;;  %v4342_v37 = vmul.f32 %v4289_v20, %v8058_v48  ;;  %v4341_v45 = vmul.f32 %v8059_v8, %v4284_v21  ;;  %4537 = vrot.lane.b32.xlu0 %v7515_v27, %s5855_s19  ;;  %4583 = vrot.lane.b32.xlu1 %v4371_v36, %s5853_s27  ;;  %v4427_v56 = vsel %vm876_vm2, %v4372_v0, 0.0  ;;  %v8065_v48 = vld [vmem:[#allocation46_spill] sm:$0xff]  ;;  %s5206_s27 = sshll.u32 %s8069_s26, 7 }
 0xb3d   : > { %v4426_v17 = vadd.f32 %v4425_v22, %v4424_v9  ;;  %s7661_s17 = scalar_lea.vmem %s7772_s13, %s5206_s27 }
 0xb3e   : > { %v4374_v6 = vadd.f32 %v4342_v37, %v7962_v15  ;;  %v4373_v63 = vadd.f32 %v4341_v45, %v7959_v41  ;;  %v8066_v45 = vld [vmem:[#allocation36_spill] sm:$0xff] }
 0xb3f   : > { %v4428_v42 = vadd.f32 %v4427_v56, %v4426_v17  ;;  %v4299_v40 = vpop.permute.xlu0 %4298  ;;  %v4294_v24 = vpop.permute.xlu1 %4293 }
 0xb40   : > { %v4429_v13 = vsel %vm876_vm2, %v4373_v63, 0.0  ;;  %v4344_v49 = vmul.f32 %v4299_v40, %v8060_v55  ;;  %v4343_v5 = vmul.f32 %v8061_v34, %v4294_v24  ;;  %4601 = vrot.lane.b32.xlu0 %v4372_v0, %s5851_s21  ;;  %4539 = vrot.lane.b32.xlu1 %v7521_v53, %s5855_s19  ;;  %v4431_v35 = vsel %vm876_vm2, %v4374_v6, 0.0 }
 0xb41   : > { %v4430_v27 = vadd.f32 %v4429_v13, %v4428_v42 }
 0xb42   : > { %v4376_v15 = vadd.f32 %v4344_v49, %v7966_v39  ;;  %v4375_v41 = vadd.f32 %v4343_v5, %v7963_v50  ;;  %v8064_v39 = vld [vmem:[#allocation35_spill] sm:$0xff] }
 0xb43   : > { %v4432_v26 = vadd.f32 %v4431_v35, %v4430_v27  ;;  %v4309_v54 = vpop.permute.xlu0 %4308  ;;  %v4304_v3 = vpop.permute.xlu1 %4303 }
 0xb44   : > { %v4433_v30 = vsel %vm876_vm2, %v4375_v41, 0.0  ;;  %v4346_v18 = vmul.f32 %v4309_v54, %v8062_v29  ;;  %v4345_v43 = vmul.f32 %v8063_v62, %v4304_v3  ;;  %4541 = vrot.lane.b32.xlu0 %v7527_v51, %s5855_s19  ;;  %4603 = vrot.lane.b32.xlu1 %v4373_v63, %s5851_s21  ;;  %v4435_v0 = vsel %vm876_vm2, %v4376_v15, 0.0 }
 0xb45   : > { %v4434_v53 = vadd.f32 %v4433_v30, %v4432_v26 }
 0xb46   : > { %v4378_v36 = vadd.f32 %v4346_v18, %v8064_v39  ;;  %v4377_v50 = vadd.f32 %v4345_v43, %v7967_v44 }
 0xb47   : > { %v4436_v9 = vadd.f32 %v4435_v0, %v4434_v53  ;;  %v4626_v20 = vpop.permute.xlu0 %4625  ;;  %v4314_v21 = vpop.permute.xlu1 %4313 }
 0xb48   : > { %v4437_v22 = vsel %vm876_vm2, %v4377_v50, 0.0  ;;  %v4347_v37 = vmul.f32 %v8065_v48, %v4314_v21  ;;  %4605 = vrot.lane.b32.xlu0 %v4374_v6, %s5851_s21  ;;  %4543 = vrot.lane.b32.xlu1 %v7533_v28, %s5855_s19  ;;  %v4439_v8 = vsel %vm876_vm2, %v4378_v36, 0.0  ;;  %v4723_v18 = vsel %vm876_vm2, %v8030_v2, %v4626_v20 }
 0xb49   : > { %v4438_v51 = vadd.f32 %v4437_v22, %v4436_v9 }
 0xb4a   : > { %v4379_v17 = vadd.f32 %v4347_v37, %v8066_v45 }
 0xb4b   : > { %v4440_v56 = vadd.f32 %v4439_v8, %v4438_v51  ;;  %v4630_v63 = vpop.permute.xlu0 %4629  ;;  %v4628_v44 = vpop.permute.xlu1 %4627 }
 0xb4c   : > { %v4441_v42 = vsel %vm876_vm2, %v4379_v17, 0.0  ;;  %4545 = vrot.lane.b32.xlu0 %v7538_v33, %s5855_s19  ;;  %4607 = vrot.lane.b32.xlu1 %v4375_v41, %s5851_s21  ;;  %v4725_v2 = vsel %vm876_vm2, %v8031_v14, %v4630_v63 }
 0xb4d   : > { %v4442_v40 = vadd.f32 %v4441_v42, %v4440_v56 }
 0xb4f   : > { %v4443_v6 = vrot.slane %v4442_v40, 4  ;;  %v4634_v24 = vpop.permute.xlu0 %4633  ;;  %v4632_v13 = vpop.permute.xlu1 %4631 }
 0xb50   : > { %4609 = vrot.lane.b32.xlu0 %v4376_v15, %s5851_s21  ;;  %4547 = vrot.lane.b32.xlu1 %v7544_v25, %s5855_s19  ;;  %v4727_v14 = vsel %vm876_vm2, %v8035_v60, %v4634_v24 }
 0xb51   : > { %v4444_v28 = vadd.f32 %v4443_v6, %v4442_v40 }
 0xb53   : > { %v4445_v55 = vrot.slane %v4444_v28, 2  ;;  %v4638_v49 = vpop.permute.xlu0 %4637  ;;  %v4636_v34 = vpop.permute.xlu1 %4635 }
 0xb54   : > { %4549 = vrot.lane.b32.xlu0 %v7552_v10, %s5855_s19  ;;  %4611 = vrot.lane.b32.xlu1 %v4377_v50, %s5851_s21  ;;  %v4728_v56 = vsel %vm876_vm2, %v8037_v47, %v4636_v34 }
 0xb55   : > { %v4446_v33 = vadd.f32 %v4445_v55, %v4444_v28 }
 0xb57   : > { %v4447_v5 = vrot.slane %v4446_v33, 1  ;;  %v4650_v27 = vpop.permute.xlu0 %4649  ;;  %v4640_v35 = vpop.permute.xlu1 %4639 }
 0xb58   : > { %4613 = vrot.lane.b32.xlu0 %v4378_v36, %s5851_s21  ;;  %4551 = vrot.lane.b32.xlu1 %v7560_v19, %s5855_s19  ;;  %v4729_v19 = vsel %vm876_vm2, %v8039_v61, %v4638_v49  ;;  %v4731_v61 = vsel %vm4705_vm8, %v4723_v18, %v4650_v27  ;;  %v4730_v62 = vsel %vm876_vm2, %v8041_v1, %v4640_v35  ;;  %s4907_s19 = sshll.u32 %s8069_s26, 2 }
 0xb59   : > { %v4448_v25 = vadd.f32 %v4447_v5, %v4446_v33  ;;  %v4724_v36 = vsel %vm876_vm2, %v8028_v31, %v4628_v44  ;;  %v4726_v31 = vsel %vm876_vm2, %v8033_v16, %v4632_v13  ;;  %s461_s23 = scalar_lea.vmem %s7771_s12, %s4907_s19 }
 0xb5b   : > { %v7641_v15 = vmul.f32 0.00390625, %v4448_v25  ;;  %v4654_v41 = vpop.permute.xlu0 %4653  ;;  %v4652_v26 = vpop.permute.xlu1 %4651 }
 0xb5c   : > { %4685 = vrot.lane.b32.xlu0 %v8064_v39, %s5851_s21  ;;  %4615 = vrot.lane.b32.xlu1 %v4379_v17, %s5851_s21  ;;  %v4733_v50 = vsel %vm4705_vm8, %v4725_v2, %v4654_v41  ;;  %v4732_v9 = vsel %vm4705_vm8, %v4724_v36, %v4652_v26 }
 0xb5d   : > { %5578 = vmatmul.mubr.msk.f32.vlgmr.msra.gmra.mxu1 %vm876_vm2, %v7641_v15 }
 0xb5f   : > { %v4658_v10 = vpop.permute.xlu0 %4657  ;;  %v4656_v54 = vpop.permute.xlu1 %4655 }
 0xb60   : > { %4687 = vrot.lane.b32.xlu1 %v8066_v45, %s5851_s21  ;;  %v4735_v48 = vsel %vm4705_vm8, %v4727_v14, %v4658_v10  ;;  %v4734_v37 = vsel %vm4705_vm8, %v4726_v31, %v4656_v54 }
 0xb63   : > { %v4662_v3 = vpop.permute.xlu0 %4661  ;;  %v4660_v30 = vpop.permute.xlu1 %4659 }
 0xb64   : > { %v7654_v29 = vsel %vm4705_vm8, %v4729_v19, %v4662_v3  ;;  %v4736_v60 = vsel %vm4705_vm8, %v4728_v56, %v4660_v30  ;;  %v5857_v56 = vmov 1966171168  }
 0xb67   : > { %v4674_v43 = vpop.permute.xlu0 %4673  ;;  %v4664_v53 = vpop.permute.xlu1 %4663 }
 0xb68   : > { %v4739_v0 = vsel %vm4714_vm9, %v4731_v61, %v4674_v43  ;;  %v7668_v39 = vsel %vm4705_vm8, %v4730_v62, %v4664_v53 }
 0xb69   : > { %4748 = vst [vmem:[%s7661_s17 + $0x8] sm:$0xff] %v4739_v0 }
 0xb6b   : > { %v4678_v1 = vpop.permute.xlu0 %4677  ;;  %v4676_v20 = vpop.permute.xlu1 %4675 }
 0xb6c   : > { %v4741_v21 = vsel %vm4714_vm9, %v4733_v50, %v4678_v1  ;;  %v4740_v22 = vsel %vm4714_vm9, %v4732_v9, %v4676_v20 }
 0xb6d   : > { %4752 = vst [vmem:[%s7661_s17 + $0x28] sm:$0xff] %v4741_v21  ;;  %4750 = vst [vmem:[%s7661_s17 + $0x18] sm:$0xff] %v4740_v22 }
 0xb6f   : > { %v4682_v51 = vpop.permute.xlu0 %4681  ;;  %v4680_v8 = vpop.permute.xlu1 %4679 }
 0xb70   : > { %v4743_v45 = vsel %vm4714_vm9, %v4735_v48, %v4682_v51  ;;  %v4742_v17 = vsel %vm4714_vm9, %v4734_v37, %v4680_v8 }
 0xb71   : > { %4756 = vst [vmem:[%s7661_s17 + $0x48] sm:$0xff] %v4743_v45  ;;  %4754 = vst [vmem:[%s7661_s17 + $0x38] sm:$0xff] %v4742_v17 }
 0xb73   : > { %v4684_v63 = vpop.permute.xlu1 %4683 }
 0xb74   : > { %v4744_v16 = vsel %vm4714_vm9, %v4736_v60, %v4684_v63  ;;  %v4455_v60 = vld [vmem:[%s7770_s11] sm:$0x1] }
 0xb75   : > { %4758 = vst [vmem:[%s7661_s17 + $0x58] sm:$0xff] %v4744_v16 }
 0xb9e   : > { %v4570_v44 = vpop.permute.xlu0 %4569 }
 0xba2   : > { %v4574_v42 = vpop.permute.xlu0 %4573  ;;  %v4572_v40 = vpop.permute.xlu1 %4571 }
 0xba6   : > { %v4578_v6 = vpop.permute.xlu0 %4577  ;;  %v4576_v24 = vpop.permute.xlu1 %4575 }
 0xbaa   : > { %v4582_v13 = vpop.permute.xlu0 %4581  ;;  %v4580_v28 = vpop.permute.xlu1 %4579 }
 0xbae   : > { %v4538_v55 = vpop.permute.xlu0 %4537  ;;  %v4584_v49 = vpop.permute.xlu1 %4583 }
 0xbaf   : > { %v4697_v47 = vsel %vm876_vm2, %v7474_v58, %v4538_v55  ;;  %v8067_v55 = vlaneseq }
 0xbb0   : > { %v4706_v34 = vsel %vm4705_vm8, %v4697_v47, %v4570_v44 }
 0xbb1   : > { %vm4797_vm11 = vcmp.lt.s32.totalorder %v8067_v55, 512 }
 0xbb2   : > { %v4602_v33 = vpop.permute.xlu0 %4601  ;;  %v4540_v5 = vpop.permute.xlu1 %4539 }
 0xbb3   : > { %v4715_v27 = vsel %vm4714_vm9, %v4706_v34, %v4602_v33  ;;  %v4698_v35 = vsel %vm876_vm2, %v7470_v46, %v4540_v5 }
 0xbb4   : > { %4747 = vst [vmem:[%s7661_s17] sm:$0xff] %v4715_v27  ;;  %v4707_v41 = vsel %vm4705_vm8, %v4698_v35, %v4572_v40 }
 0xbb6   : > { %v4542_v25 = vpop.permute.xlu0 %4541  ;;  %v4604_v26 = vpop.permute.xlu1 %4603 }
 0xbb7   : > { %v4699_v10 = vsel %vm876_vm2, %v7477_v59, %v4542_v25  ;;  %v4716_v58 = vsel %vm4714_vm9, %v4707_v41, %v4604_v26 }
 0xbb8   : > { %4749 = vst [vmem:[%s7661_s17 + $0x10] sm:$0xff] %v4716_v58  ;;  %v4708_v19 = vsel %vm4705_vm8, %v4699_v10, %v4574_v42 }
 0xbba   : > { %v4606_v54 = vpop.permute.xlu0 %4605  ;;  %v4544_v3 = vpop.permute.xlu1 %4543 }
 0xbbb   : > { %v4717_v30 = vsel %vm4714_vm9, %v4708_v19, %v4606_v54  ;;  %v4700_v46 = vsel %vm876_vm2, %v7483_v52, %v4544_v3 }
 0xbbc   : > { %4751 = vst [vmem:[%s7661_s17 + $0x20] sm:$0xff] %v4717_v30  ;;  %v4709_v61 = vsel %vm4705_vm8, %v4700_v46, %v4576_v24 }
 0xbbe   : > { %v4546_v18 = vpop.permute.xlu0 %4545  ;;  %v4608_v62 = vpop.permute.xlu1 %4607 }
 0xbbf   : > { %v4701_v59 = vsel %vm876_vm2, %v7491_v4, %v4546_v18  ;;  %v4718_v43 = vsel %vm4714_vm9, %v4709_v61, %v4608_v62 }
 0xbc0   : > { %4753 = vst [vmem:[%s7661_s17 + $0x30] sm:$0xff] %v4718_v43  ;;  %v4710_v53 = vsel %vm4705_vm8, %v4701_v59, %v4578_v6  ;;  %v4765_v6 = vsel %vm876_vm2, %v7641_v15, 0.0 }
 0xbc2   : > { %v4610_v0 = vpop.permute.xlu0 %4609  ;;  %v4548_v2 = vpop.permute.xlu1 %4547 }
 0xbc3   : > { %v4719_v36 = vsel %vm4714_vm9, %v4710_v53, %v4610_v0  ;;  %v4702_v52 = vsel %vm876_vm2, %v7497_v11, %v4548_v2 }
 0xbc4   : > { %4755 = vst [vmem:[%s7661_s17 + $0x40] sm:$0xff] %v4719_v36  ;;  %v4711_v9 = vsel %vm4705_vm8, %v4702_v52, %v4580_v28 }
 0xbc6   : > { %v4550_v50 = vpop.permute.xlu0 %4549  ;;  %v4612_v1 = vpop.permute.xlu1 %4611 }
 0xbc7   : > { %v4703_v4 = vsel %vm876_vm2, %v7503_v23, %v4550_v50  ;;  %v4720_v20 = vsel %vm4714_vm9, %v4711_v9, %v4612_v1 }
 0xbc8   : > { %4757 = vst [vmem:[%s7661_s17 + $0x50] sm:$0xff] %v4720_v20  ;;  %v4712_v21 = vsel %vm4705_vm8, %v4703_v4, %v4582_v13 }
 0xbca   : > { %v4614_v22 = vpop.permute.xlu0 %4613  ;;  %v4552_v14 = vpop.permute.xlu1 %4551 }
 0xbcb   : > { %v4721_v11 = vsel %vm4714_vm9, %v4712_v21, %v4614_v22  ;;  %v4704_v31 = vsel %vm876_vm2, %v7509_v38, %v4552_v14  ;;  %v4773_v38 = vunpack.c.l.s4 %v5857_v56 }
 0xbcc   : > { %4759 = vst [vmem:[%s7661_s17 + $0x60] sm:$0xff] %v4721_v11  ;;  %v4713_v37 = vsel %vm4705_vm8, %v4704_v31, %v4584_v49 }
 0xbcd   : > { %v4774_v63 = vunpack.c.0.s8 %v4773_v38 }
 0xbce   : > { %v4686_v48 = vpop.permute.xlu0 %4685  ;;  %v4616_v51 = vpop.permute.xlu1 %4615 }
 0xbcf   : > { %v4745_v23 = vsel %vm4714_vm9, %v7654_v29, %v4686_v48  ;;  %v4722_v8 = vsel %vm4714_vm9, %v4713_v37, %v4616_v51  ;;  %v4777_v44 = vsub.s32 %v4774_v63, %v7300_v7 }
 0xbd0   : > { %4760 = vst [vmem:[%s7661_s17 + $0x68] sm:$0xff] %v4745_v23  ;;  %4761 = vst [vmem:[%s7661_s17 + $0x70] sm:$0xff] %v4722_v8 }
 0xbd1   : > { %v4785_v13 = vrot.slane %v4771_v12, %v4777_v44 }
 0xbd2   : > { %v4688_v45 = vpop.permute.xlu1 %4687 }
 0xbd3   : > { %v4746_v17 = vsel %vm4714_vm9, %v7668_v39, %v4688_v45 }
 0xbd4   : > { %4762 = vst [vmem:[%s7661_s17 + $0x78] sm:$0xff] %v4746_v17 }
 0xc1d   : > { %v4525_v16 = vpop.f32.mrf.mxu1 }
 0xc1e   : > { %v4526_v29 = vadd.f32 %v4525_v16, %v4455_v60 }
 0xc1f   : > { %v5579_v42 = vpop.f32.mrf.mxu1 }
 0xc20   : > { %v4764_v40 = vsel %vm4763_vm10, %v4526_v29, 0.0 }
 0xc21   : > { %v4770_v24 = vcombine.low %v4764_v40, %v4765_v6 }
 0xc23   : > { %v4778_v39 = vrot.slane %v4770_v24, %v4777_v44 }
 0xc25   : > { %v4786_v28 = vcombine.low %v4778_v39, %v4785_v13 }
 0xc27   : > { %v4793_v7 = vrot.slane %v4786_v28, %v4777_v44 }
 0xc29   : > { %4799 = vst.msk [vmem:[%s461_s23] sm:$0xf] %vm4797_vm11, %v4793_v7 }
 0xc2a PF: > { %s25_s25 = sadd.s32 1, %s5845_s25  }
 0xc2b   : > { %p22_p1 = scmp.ge.s32.totalorder %s25_s25, 4  }
 0xc2d   :  { %24 = sbr.rel (!%p22_p1) target bundleno = 1 (0x1), region = 115 }
 0xc32   :  { %4835 = vsyncpa [#allocation3], 1 }
 0xc33   :  { %4837 = vsyncpa [#allocation3 + $0x1], 1 }

</bundles_post_ra>
